<compile_context>
chip_gen: v5e
topology: v5e:2x2
jax: 0.10.0
libtpu: 0.0.40
codegen_flags: <defaults>
</compile_context>

<pallas_src>
import numpy as np

import jax
import jax.numpy as jnp
from jax.experimental import pallas as pl
from jax.experimental.pallas import tpu as pltpu


# ----------------------------------------------------------------------------
# Host-side, one-time weight repacking (PyTorch layout -> kernel layout)
# ----------------------------------------------------------------------------
def _conv_pair_matrices(w, in_width, out_width, stride=2, pad=1):
    """w: [Co, Ci, 4, 4] (PyTorch OIHW) -> (Ma, Mb), each [2*in_width*Ci, out_width*Co].

    For a k=4, s=2, p=1 conv, output row `oh` reads input rows 2oh-1..2oh+2, i.e. the
    two non-overlapping row-pairs P[oh]=(row 2oh-1, row 2oh) and P[oh+1]=(2oh+1, 2oh+2).
    conv_row(oh) = P[oh] @ Ma + P[oh+1] @ Mb.  Horizontal zero padding is folded into
    the band matrices (taps hitting it are dropped); vertical padding is handled by the
    zero rows the host inserts into the paired input slab."""
    co, ci, kh, kw = w.shape
    band = np.zeros((kh, in_width * ci, out_width * co), np.float32)
    for k in range(kh):
        for q in range(kw):
            for ow in range(out_width):
                iw = stride * ow + q - pad
                if 0 <= iw < in_width:
                    band[k, iw * ci:(iw + 1) * ci, ow * co:(ow + 1) * co] = w[:, :, k, q].T
    ma = np.concatenate([band[0], band[1]], axis=0)   # kernel rows 0,1  (rows 2oh-1, 2oh)
    mb = np.concatenate([band[2], band[3]], axis=0)   # kernel rows 2,3  (rows 2oh+1, 2oh+2)
    return ma, mb


def init_params(key, scale=0.1):
    """Random parameters in the original PyTorch layouts."""
    ks = jax.random.split(key, 8)
    return {
        "conv1_w": jax.random.normal(ks[0], (10, 3, 4, 4), jnp.float32) * scale,
        "conv1_b": jax.random.normal(ks[1], (10,), jnp.float32) * scale,
        "conv2_w": jax.random.normal(ks[2], (20, 10, 4, 4), jnp.float32) * scale,
        "conv2_b": jax.random.normal(ks[3], (20,), jnp.float32) * scale,
        "fc1_w": jax.random.normal(ks[4], (128, 980), jnp.float32) * scale,
        "fc1_b": jax.random.normal(ks[5], (128,), jnp.float32) * scale,
        "fc2_w": jax.random.normal(ks[6], (10, 128), jnp.float32) * scale,
        "fc2_b": jax.random.normal(ks[7], (10,), jnp.float32) * scale,
    }


def prepare_params(params):
    """One-time host repack into kernel-ready pair-banded / permuted bf16 matrices."""
    w1 = np.asarray(params["conv1_w"], np.float32)
    w2 = np.asarray(params["conv2_w"], np.float32)
    w3 = np.asarray(params["fc1_w"], np.float32)     # [128, 980]
    w4 = np.asarray(params["fc2_w"], np.float32)     # [10, 128]

    m1a, m1b = _conv_pair_matrices(w1, in_width=28, out_width=14)   # [168, 140] each
    m2a, m2b = _conv_pair_matrices(w2, in_width=14, out_width=7)    # [280, 140] each
    b1 = np.tile(np.asarray(params["conv1_b"], np.float32), 14)[None, :]   # [1,140] lane=ow*10+co
    b2 = np.tile(np.asarray(params["conv2_b"], np.float32), 7)[None, :]    # [1,140] lane=ow*20+co

    # fc1: PyTorch NCHW-flatten index co*49 + oh*7 + ow  ->  kernel index oh*140 + ow*20 + co.
    fc1w = w3.reshape(128, 20, 7, 7).transpose(2, 3, 1, 0).reshape(980, 128)
    fc1b = np.asarray(params["fc1_b"], np.float32)[None, :]                # [1, 128]
    # fc2: pad output lanes 10 -> 128 so the final store is lane-dense.
    fc2w = np.zeros((128, 128), np.float32)
    fc2w[:, :10] = w4.T
    fc2b = np.zeros((1, 128), np.float32)
    fc2b[0, :10] = np.asarray(params["fc2_b"], np.float32)

    bf16 = jnp.bfloat16
    return (jnp.asarray(m1a, bf16), jnp.asarray(m1b, bf16), jnp.asarray(b1),
            jnp.asarray(m2a, bf16), jnp.asarray(m2b, bf16), jnp.asarray(b2),
            jnp.asarray(fc1w, bf16), jnp.asarray(fc1b),
            jnp.asarray(fc2w, bf16), jnp.asarray(fc2b))


# ----------------------------------------------------------------------------
# Fused Pallas kernel: whole forward pass for one batch tile
# ----------------------------------------------------------------------------
def _clf_img_fused_kernel(xp_ref, m1a_ref, m1b_ref, b1_ref, m2a_ref, m2b_ref, b2_ref,
                          fc1w_ref, fc1b_ref, fc2w_ref, fc2b_ref, o_ref):
    f32, bf16 = jnp.float32, jnp.bfloat16
    m1a, m1b = m1a_ref[...], m1b_ref[...]
    m2a, m2b = m2a_ref[...], m2b_ref[...]
    b1, b2 = b1_ref[...], b2_ref[...]

    # conv1 + bias + ReLU (Dropout2d == identity):
    # xp_ref[j] is the row pair (input rows 2j-1, 2j), [TB, 168] bf16, lane = t*84 + iw*3 + ci.
    p = [xp_ref[j] for j in range(15)]
    r1 = []
    for oh in range(14):                              # two tap-stacked K=168 dots per row
        acc = (jnp.dot(p[oh], m1a, preferred_element_type=f32)
               + jnp.dot(p[oh + 1], m1b, preferred_element_type=f32))
        r1.append(jnp.maximum(acc + b1, 0.0).astype(bf16))   # [TB, 140], lane = ow*10 + co

    # conv2 + bias + ReLU (Dropout2d == identity):
    # pair the conv1 rows (zero rows are the conv2 vertical padding; ReLU(0)-correct since pad=0).
    zrow = jnp.zeros_like(r1[0])
    q = [jnp.concatenate([zrow if 2 * j - 1 < 0 else r1[2 * j - 1],
                          zrow if 2 * j >= 14 else r1[2 * j]], axis=-1)
         for j in range(8)]                           # [TB, 280] bf16
    r2 = []
    for oh in range(7):                               # two tap-stacked K=280 dots per row
        acc = (jnp.dot(q[oh], m2a, preferred_element_type=f32)
               + jnp.dot(q[oh + 1], m2b, preferred_element_type=f32))
        r2.append(jnp.maximum(acc + b2, 0.0).astype(bf16))   # [TB, 140], lane = ow*20 + co

    # fc1 + ReLU (Dropout == identity): single K=980 matmul over the flattened features.
    feat = jnp.concatenate(r2, axis=-1)               # [TB, 980] bf16, idx = oh*140 + ow*20 + co
    h = jnp.maximum(jnp.dot(feat, fc1w_ref[...], preferred_element_type=f32)
                    + fc1b_ref[...], 0.0).astype(bf16)        # [TB, 128]

    # fc2 (output lanes padded to 128 -> unmasked, lane-dense store)
    out = jnp.dot(h, fc2w_ref[...], preferred_element_type=f32) + fc2b_ref[...]
    o_ref[...] = out.astype(o_ref.dtype)              # [TB, 128]


def _pick_batch_tile(batch, cap):
    """Multiple-of-8 tile <= cap; guarantees >=2 grid steps when batch >= 16 (v7x megacore)."""
    cap = max(8, (cap // 8) * 8)
    if batch <= 8:
        return 8
    half = (batch + 1) // 2
    half = ((half + 7) // 8) * 8
    return min(cap, half)


def clf_img_forward(kernel_params, x, *, batch_tile=256):
    """x: [B, 3, 28, 28] f32 (NCHW) -> logits [B, 10] f32."""
    (m1a, m1b, b1, m2a, m2b, b2, fc1w, fc1b, fc2w, fc2b) = kernel_params
    batch = x.shape[0]
    tb = _pick_batch_tile(batch, batch_tile)
    pb = ((batch + tb - 1) // tb) * tb                # pad batch to a tile multiple
    grid = (pb // tb,)

    # One fused host-side prep pass (transpose + vertical pad + bf16 cast + row pairing):
    # NCHW -> [28, B, 84] (lane = iw*3+ci) -> pad rows -1/28 with zeros -> non-overlapping
    # row pairs [15, PB, 168].  This is the only HBM traffic besides the [PB,128] logits.
    xt = jnp.transpose(x, (2, 0, 3, 1)).reshape(28, batch, 84).astype(jnp.bfloat16)
    xp = jnp.pad(xt, ((1, 1), (0, pb - batch), (0, 0)))                 # [30, PB, 84]
    xp = xp.reshape(15, 2, pb, 84).transpose(0, 2, 1, 3).reshape(15, pb, 168)

    def _resident(a):
        zeros = (0,) * a.ndim
        return pl.BlockSpec(a.shape, lambda i, z=zeros: z)   # constant block index -> DMA'd once

    out = pl.pallas_call(
        _clf_img_fused_kernel,
        out_shape=jax.ShapeDtypeStruct((pb, 128), jnp.float32),
        grid=grid,
        in_specs=[
            pl.BlockSpec((15, tb, 168), lambda i: (0, i, 0)),    # batch-tiled paired input rows
            _resident(m1a), _resident(m1b), _resident(b1),
            _resident(m2a), _resident(m2b), _resident(b2),
            _resident(fc1w), _resident(fc1b), _resident(fc2w), _resident(fc2b),
        ],
        out_specs=pl.BlockSpec((tb, 128), lambda i: (i, 0)),
        compiler_params=pltpu.CompilerParams(
            dimension_semantics=("parallel",),            # megacore-shardable batch axis
            vmem_limit_bytes=32 * 1024 * 1024,            # safe on v5e/v6e (128MiB) & v7x (64MiB)
        ),
    )(xp, m1a, m1b, b1, m2a, m2b, b2, fc1w, fc1b, fc2w, fc2b)
    return out[:batch, :10]


# ----------------------------------------------------------------------------
# Pure-JAX reference (PyTorch ClfImg semantics, eval mode) for self-checking
# ----------------------------------------------------------------------------
def clf_img_reference(params, x):
    h = jax.lax.conv_general_dilated(
        x, params["conv1_w"], window_strides=(2, 2), padding=((1, 1), (1, 1)),
        dimension_numbers=("NCHW", "OIHW", "NCHW"))
    h = jnp.maximum(h + params["conv1_b"][None, :, None, None], 0.0)
    h = jax.lax.conv_general_dilated(
        h, params["conv2_w"], window_strides=(2, 2), padding=((1, 1), (1, 1)),
        dimension_numbers=("NCHW", "OIHW", "NCHW"))
    h = jnp.maximum(h + params["conv2_b"][None, :, None, None], 0.0)
    h = h.reshape(h.shape[0], -1)                                  # NCHW flatten -> [B, 980]
    h = jnp.maximum(h @ params["fc1_w"].T + params["fc1_b"], 0.0)
    return h @ params["fc2_w"].T + params["fc2_b"]


if __name__ == "__main__":
    key = jax.random.PRNGKey(0)
    k_param, k_x = jax.random.split(key)
    params = init_params(k_param)
    kernel_params = prepare_params(params)

    # MNIST-sized input implied by Linear(980, 128): 3x28x28 -> 20x7x7 = 980.
    x = jax.random.normal(k_x, (2, 3, 28, 28), jnp.float32)

    fwd = jax.jit(clf_img_forward)
    out = jax.block_until_ready(fwd(kernel_params, x))
    assert out.shape == (2, 10), out.shape
    assert out.dtype == jnp.float32

    ref = jax.block_until_ready(clf_img_reference(params, x))
    max_err = float(jnp.max(jnp.abs(out - ref)))
    tol = 5e-2 * max(1.0, float(jnp.max(jnp.abs(ref))))   # loose: bf16 MXU path by design
    assert max_err < tol, f"kernel/reference mismatch: max abs err = {max_err}"

    print("KERNEL_OK")
</pallas_src>

<mosaic_0001>
module attributes {stable_mosaic.version = 11 : i64} {
  func.func @_clf_img_fused_kernel(%arg0: i32, %arg1: memref<15x8x168xbf16, #tpu.memory_space<vmem>>, %arg2: memref<168x140xbf16, #tpu.memory_space<vmem>>, %arg3: memref<168x140xbf16, #tpu.memory_space<vmem>>, %arg4: memref<1x140xf32, #tpu.memory_space<vmem>>, %arg5: memref<280x140xbf16, #tpu.memory_space<vmem>>, %arg6: memref<280x140xbf16, #tpu.memory_space<vmem>>, %arg7: memref<1x140xf32, #tpu.memory_space<vmem>>, %arg8: memref<980x128xbf16, #tpu.memory_space<vmem>>, %arg9: memref<1x128xf32, #tpu.memory_space<vmem>>, %arg10: memref<128x128xbf16, #tpu.memory_space<vmem>>, %arg11: memref<1x128xf32, #tpu.memory_space<vmem>>, %arg12: memref<8x128xf32, #tpu.memory_space<vmem>>) attributes {dimension_semantics = [#tpu.dimension_semantics<parallel>], iteration_bounds = array<i64: 1>, scalar_prefetch = 0 : i64, scratch_operands = 0 : i64, tpu.core_type = #tpu.core_type<tc>, window_params = [{transform_indices = @transform_0, window_bounds = array<i64: 15, 8, 168>}, {pipeline_mode = #tpu.pipeline_mode<synchronous>, transform_indices = @transform_1, window_bounds = array<i64: 168, 140>}, {pipeline_mode = #tpu.pipeline_mode<synchronous>, transform_indices = @transform_2, window_bounds = array<i64: 168, 140>}, {pipeline_mode = #tpu.pipeline_mode<synchronous>, transform_indices = @transform_3, window_bounds = array<i64: 1, 140>}, {pipeline_mode = #tpu.pipeline_mode<synchronous>, transform_indices = @transform_4, window_bounds = array<i64: 280, 140>}, {pipeline_mode = #tpu.pipeline_mode<synchronous>, transform_indices = @transform_5, window_bounds = array<i64: 280, 140>}, {pipeline_mode = #tpu.pipeline_mode<synchronous>, transform_indices = @transform_6, window_bounds = array<i64: 1, 140>}, {pipeline_mode = #tpu.pipeline_mode<synchronous>, transform_indices = @transform_7, window_bounds = array<i64: 980, 128>}, {pipeline_mode = #tpu.pipeline_mode<synchronous>, transform_indices = @transform_8, window_bounds = array<i64: 1, 128>}, {pipeline_mode = #tpu.pipeline_mode<synchronous>, transform_indices = @transform_9, window_bounds = array<i64: 128, 128>}, {pipeline_mode = #tpu.pipeline_mode<synchronous>, transform_indices = @transform_10, window_bounds = array<i64: 1, 128>}, {transform_indices = @transform_11, window_bounds = array<i64: 8, 128>}]} {
    %c0 = arith.constant 0 : index
    %c0_0 = arith.constant 0 : index
    %0 = vector.load %arg2[%c0, %c0_0] : memref<168x140xbf16, #tpu.memory_space<vmem>>, vector<168x140xbf16>
    %c0_1 = arith.constant 0 : index
    %c0_2 = arith.constant 0 : index
    %1 = vector.load %arg3[%c0_1, %c0_2] : memref<168x140xbf16, #tpu.memory_space<vmem>>, vector<168x140xbf16>
    %c0_3 = arith.constant 0 : index
    %c0_4 = arith.constant 0 : index
    %2 = vector.load %arg5[%c0_3, %c0_4] : memref<280x140xbf16, #tpu.memory_space<vmem>>, vector<280x140xbf16>
    %c0_5 = arith.constant 0 : index
    %c0_6 = arith.constant 0 : index
    %3 = vector.load %arg6[%c0_5, %c0_6] : memref<280x140xbf16, #tpu.memory_space<vmem>>, vector<280x140xbf16>
    %c0_7 = arith.constant 0 : index
    %c0_8 = arith.constant 0 : index
    %4 = vector.load %arg4[%c0_7, %c0_8] : memref<1x140xf32, #tpu.memory_space<vmem>>, vector<1x140xf32>
    %c0_9 = arith.constant 0 : index
    %c0_10 = arith.constant 0 : index
    %5 = vector.load %arg7[%c0_9, %c0_10] : memref<1x140xf32, #tpu.memory_space<vmem>>, vector<1x140xf32>
    %c0_11 = arith.constant 0 : index
    %c0_12 = arith.constant 0 : index
    %c0_13 = arith.constant 0 : index
    %6 = vector.load %arg1[%c0_11, %c0_12, %c0_13] : memref<15x8x168xbf16, #tpu.memory_space<vmem>>, vector<1x8x168xbf16>
    %7 = vector.shape_cast %6 : vector<1x8x168xbf16> to vector<8x168xbf16>
    %c1 = arith.constant 1 : index
    %c0_14 = arith.constant 0 : index
    %c0_15 = arith.constant 0 : index
    %8 = vector.load %arg1[%c1, %c0_14, %c0_15] : memref<15x8x168xbf16, #tpu.memory_space<vmem>>, vector<1x8x168xbf16>
    %9 = vector.shape_cast %8 : vector<1x8x168xbf16> to vector<8x168xbf16>
    %c2 = arith.constant 2 : index
    %c0_16 = arith.constant 0 : index
    %c0_17 = arith.constant 0 : index
    %10 = vector.load %arg1[%c2, %c0_16, %c0_17] : memref<15x8x168xbf16, #tpu.memory_space<vmem>>, vector<1x8x168xbf16>
    %11 = vector.shape_cast %10 : vector<1x8x168xbf16> to vector<8x168xbf16>
    %c3 = arith.constant 3 : index
    %c0_18 = arith.constant 0 : index
    %c0_19 = arith.constant 0 : index
    %12 = vector.load %arg1[%c3, %c0_18, %c0_19] : memref<15x8x168xbf16, #tpu.memory_space<vmem>>, vector<1x8x168xbf16>
    %13 = vector.shape_cast %12 : vector<1x8x168xbf16> to vector<8x168xbf16>
    %c4 = arith.constant 4 : index
    %c0_20 = arith.constant 0 : index
    %c0_21 = arith.constant 0 : index
    %14 = vector.load %arg1[%c4, %c0_20, %c0_21] : memref<15x8x168xbf16, #tpu.memory_space<vmem>>, vector<1x8x168xbf16>
    %15 = vector.shape_cast %14 : vector<1x8x168xbf16> to vector<8x168xbf16>
    %c5 = arith.constant 5 : index
    %c0_22 = arith.constant 0 : index
    %c0_23 = arith.constant 0 : index
    %16 = vector.load %arg1[%c5, %c0_22, %c0_23] : memref<15x8x168xbf16, #tpu.memory_space<vmem>>, vector<1x8x168xbf16>
    %17 = vector.shape_cast %16 : vector<1x8x168xbf16> to vector<8x168xbf16>
    %c6 = arith.constant 6 : index
    %c0_24 = arith.constant 0 : index
    %c0_25 = arith.constant 0 : index
    %18 = vector.load %arg1[%c6, %c0_24, %c0_25] : memref<15x8x168xbf16, #tpu.memory_space<vmem>>, vector<1x8x168xbf16>
    %19 = vector.shape_cast %18 : vector<1x8x168xbf16> to vector<8x168xbf16>
    %c7 = arith.constant 7 : index
    %c0_26 = arith.constant 0 : index
    %c0_27 = arith.constant 0 : index
    %20 = vector.load %arg1[%c7, %c0_26, %c0_27] : memref<15x8x168xbf16, #tpu.memory_space<vmem>>, vector<1x8x168xbf16>
    %21 = vector.shape_cast %20 : vector<1x8x168xbf16> to vector<8x168xbf16>
    %c8 = arith.constant 8 : index
    %c0_28 = arith.constant 0 : index
    %c0_29 = arith.constant 0 : index
    %22 = vector.load %arg1[%c8, %c0_28, %c0_29] : memref<15x8x168xbf16, #tpu.memory_space<vmem>>, vector<1x8x168xbf16>
    %23 = vector.shape_cast %22 : vector<1x8x168xbf16> to vector<8x168xbf16>
    %c9 = arith.constant 9 : index
    %c0_30 = arith.constant 0 : index
    %c0_31 = arith.constant 0 : index
    %24 = vector.load %arg1[%c9, %c0_30, %c0_31] : memref<15x8x168xbf16, #tpu.memory_space<vmem>>, vector<1x8x168xbf16>
    %25 = vector.shape_cast %24 : vector<1x8x168xbf16> to vector<8x168xbf16>
    %c10 = arith.constant 10 : index
    %c0_32 = arith.constant 0 : index
    %c0_33 = arith.constant 0 : index
    %26 = vector.load %arg1[%c10, %c0_32, %c0_33] : memref<15x8x168xbf16, #tpu.memory_space<vmem>>, vector<1x8x168xbf16>
    %27 = vector.shape_cast %26 : vector<1x8x168xbf16> to vector<8x168xbf16>
    %c11 = arith.constant 11 : index
    %c0_34 = arith.constant 0 : index
    %c0_35 = arith.constant 0 : index
    %28 = vector.load %arg1[%c11, %c0_34, %c0_35] : memref<15x8x168xbf16, #tpu.memory_space<vmem>>, vector<1x8x168xbf16>
    %29 = vector.shape_cast %28 : vector<1x8x168xbf16> to vector<8x168xbf16>
    %c12 = arith.constant 12 : index
    %c0_36 = arith.constant 0 : index
    %c0_37 = arith.constant 0 : index
    %30 = vector.load %arg1[%c12, %c0_36, %c0_37] : memref<15x8x168xbf16, #tpu.memory_space<vmem>>, vector<1x8x168xbf16>
    %31 = vector.shape_cast %30 : vector<1x8x168xbf16> to vector<8x168xbf16>
    %c13 = arith.constant 13 : index
    %c0_38 = arith.constant 0 : index
    %c0_39 = arith.constant 0 : index
    %32 = vector.load %arg1[%c13, %c0_38, %c0_39] : memref<15x8x168xbf16, #tpu.memory_space<vmem>>, vector<1x8x168xbf16>
    %33 = vector.shape_cast %32 : vector<1x8x168xbf16> to vector<8x168xbf16>
    %c14 = arith.constant 14 : index
    %c0_40 = arith.constant 0 : index
    %c0_41 = arith.constant 0 : index
    %34 = vector.load %arg1[%c14, %c0_40, %c0_41] : memref<15x8x168xbf16, #tpu.memory_space<vmem>>, vector<1x8x168xbf16>
    %35 = vector.shape_cast %34 : vector<1x8x168xbf16> to vector<8x168xbf16>
    %cst = arith.constant dense<0.000000e+00> : vector<8x140xf32>
    %36 = tpu.matmul %7, %0, %cst {dimension_numbers = #tpu.dot_dimension_numbers<[1], [0], [0], [1], [0, 0, 1, 1], [], []>} : vector<8x168xbf16>, vector<168x140xbf16>, vector<8x140xf32> -> vector<8x140xf32>
    %cst_42 = arith.constant dense<0.000000e+00> : vector<8x140xf32>
    %37 = tpu.matmul %9, %1, %cst_42 {dimension_numbers = #tpu.dot_dimension_numbers<[1], [0], [0], [1], [0, 0, 1, 1], [], []>} : vector<8x168xbf16>, vector<168x140xbf16>, vector<8x140xf32> -> vector<8x140xf32>
    %38 = arith.addf %36, %37 : vector<8x140xf32>
    %39 = vector.broadcast %4 : vector<1x140xf32> to vector<8x140xf32>
    %40 = arith.addf %38, %39 : vector<8x140xf32>
    %cst_43 = arith.constant 0.000000e+00 : f32
    %41 = vector.broadcast %cst_43 : f32 to vector<8x140xf32>
    %42 = arith.maximumf %40, %41 : vector<8x140xf32>
    %43 = arith.truncf %42 : vector<8x140xf32> to vector<8x140xbf16>
    %cst_44 = arith.constant dense<0.000000e+00> : vector<8x140xf32>
    %44 = tpu.matmul %9, %0, %cst_44 {dimension_numbers = #tpu.dot_dimension_numbers<[1], [0], [0], [1], [0, 0, 1, 1], [], []>} : vector<8x168xbf16>, vector<168x140xbf16>, vector<8x140xf32> -> vector<8x140xf32>
    %cst_45 = arith.constant dense<0.000000e+00> : vector<8x140xf32>
    %45 = tpu.matmul %11, %1, %cst_45 {dimension_numbers = #tpu.dot_dimension_numbers<[1], [0], [0], [1], [0, 0, 1, 1], [], []>} : vector<8x168xbf16>, vector<168x140xbf16>, vector<8x140xf32> -> vector<8x140xf32>
    %46 = arith.addf %44, %45 : vector<8x140xf32>
    %47 = vector.broadcast %4 : vector<1x140xf32> to vector<8x140xf32>
    %48 = arith.addf %46, %47 : vector<8x140xf32>
    %cst_46 = arith.constant 0.000000e+00 : f32
    %49 = vector.broadcast %cst_46 : f32 to vector<8x140xf32>
    %50 = arith.maximumf %48, %49 : vector<8x140xf32>
    %51 = arith.truncf %50 : vector<8x140xf32> to vector<8x140xbf16>
    %cst_47 = arith.constant dense<0.000000e+00> : vector<8x140xf32>
    %52 = tpu.matmul %11, %0, %cst_47 {dimension_numbers = #tpu.dot_dimension_numbers<[1], [0], [0], [1], [0, 0, 1, 1], [], []>} : vector<8x168xbf16>, vector<168x140xbf16>, vector<8x140xf32> -> vector<8x140xf32>
    %cst_48 = arith.constant dense<0.000000e+00> : vector<8x140xf32>
    %53 = tpu.matmul %13, %1, %cst_48 {dimension_numbers = #tpu.dot_dimension_numbers<[1], [0], [0], [1], [0, 0, 1, 1], [], []>} : vector<8x168xbf16>, vector<168x140xbf16>, vector<8x140xf32> -> vector<8x140xf32>
    %54 = arith.addf %52, %53 : vector<8x140xf32>
    %55 = vector.broadcast %4 : vector<1x140xf32> to vector<8x140xf32>
    %56 = arith.addf %54, %55 : vector<8x140xf32>
    %cst_49 = arith.constant 0.000000e+00 : f32
    %57 = vector.broadcast %cst_49 : f32 to vector<8x140xf32>
    %58 = arith.maximumf %56, %57 : vector<8x140xf32>
    %59 = arith.truncf %58 : vector<8x140xf32> to vector<8x140xbf16>
    %cst_50 = arith.constant dense<0.000000e+00> : vector<8x140xf32>
    %60 = tpu.matmul %13, %0, %cst_50 {dimension_numbers = #tpu.dot_dimension_numbers<[1], [0], [0], [1], [0, 0, 1, 1], [], []>} : vector<8x168xbf16>, vector<168x140xbf16>, vector<8x140xf32> -> vector<8x140xf32>
    %cst_51 = arith.constant dense<0.000000e+00> : vector<8x140xf32>
    %61 = tpu.matmul %15, %1, %cst_51 {dimension_numbers = #tpu.dot_dimension_numbers<[1], [0], [0], [1], [0, 0, 1, 1], [], []>} : vector<8x168xbf16>, vector<168x140xbf16>, vector<8x140xf32> -> vector<8x140xf32>
    %62 = arith.addf %60, %61 : vector<8x140xf32>
    %63 = vector.broadcast %4 : vector<1x140xf32> to vector<8x140xf32>
    %64 = arith.addf %62, %63 : vector<8x140xf32>
    %cst_52 = arith.constant 0.000000e+00 : f32
    %65 = vector.broadcast %cst_52 : f32 to vector<8x140xf32>
    %66 = arith.maximumf %64, %65 : vector<8x140xf32>
    %67 = arith.truncf %66 : vector<8x140xf32> to vector<8x140xbf16>
    %cst_53 = arith.constant dense<0.000000e+00> : vector<8x140xf32>
    %68 = tpu.matmul %15, %0, %cst_53 {dimension_numbers = #tpu.dot_dimension_numbers<[1], [0], [0], [1], [0, 0, 1, 1], [], []>} : vector<8x168xbf16>, vector<168x140xbf16>, vector<8x140xf32> -> vector<8x140xf32>
    %cst_54 = arith.constant dense<0.000000e+00> : vector<8x140xf32>
    %69 = tpu.matmul %17, %1, %cst_54 {dimension_numbers = #tpu.dot_dimension_numbers<[1], [0], [0], [1], [0, 0, 1, 1], [], []>} : vector<8x168xbf16>, vector<168x140xbf16>, vector<8x140xf32> -> vector<8x140xf32>
    %70 = arith.addf %68, %69 : vector<8x140xf32>
    %71 = vector.broadcast %4 : vector<1x140xf32> to vector<8x140xf32>
    %72 = arith.addf %70, %71 : vector<8x140xf32>
    %cst_55 = arith.constant 0.000000e+00 : f32
    %73 = vector.broadcast %cst_55 : f32 to vector<8x140xf32>
    %74 = arith.maximumf %72, %73 : vector<8x140xf32>
    %75 = arith.truncf %74 : vector<8x140xf32> to vector<8x140xbf16>
    %cst_56 = arith.constant dense<0.000000e+00> : vector<8x140xf32>
    %76 = tpu.matmul %17, %0, %cst_56 {dimension_numbers = #tpu.dot_dimension_numbers<[1], [0], [0], [1], [0, 0, 1, 1], [], []>} : vector<8x168xbf16>, vector<168x140xbf16>, vector<8x140xf32> -> vector<8x140xf32>
    %cst_57 = arith.constant dense<0.000000e+00> : vector<8x140xf32>
    %77 = tpu.matmul %19, %1, %cst_57 {dimension_numbers = #tpu.dot_dimension_numbers<[1], [0], [0], [1], [0, 0, 1, 1], [], []>} : vector<8x168xbf16>, vector<168x140xbf16>, vector<8x140xf32> -> vector<8x140xf32>
    %78 = arith.addf %76, %77 : vector<8x140xf32>
    %79 = vector.broadcast %4 : vector<1x140xf32> to vector<8x140xf32>
    %80 = arith.addf %78, %79 : vector<8x140xf32>
    %cst_58 = arith.constant 0.000000e+00 : f32
    %81 = vector.broadcast %cst_58 : f32 to vector<8x140xf32>
    %82 = arith.maximumf %80, %81 : vector<8x140xf32>
    %83 = arith.truncf %82 : vector<8x140xf32> to vector<8x140xbf16>
    %cst_59 = arith.constant dense<0.000000e+00> : vector<8x140xf32>
    %84 = tpu.matmul %19, %0, %cst_59 {dimension_numbers = #tpu.dot_dimension_numbers<[1], [0], [0], [1], [0, 0, 1, 1], [], []>} : vector<8x168xbf16>, vector<168x140xbf16>, vector<8x140xf32> -> vector<8x140xf32>
    %cst_60 = arith.constant dense<0.000000e+00> : vector<8x140xf32>
    %85 = tpu.matmul %21, %1, %cst_60 {dimension_numbers = #tpu.dot_dimension_numbers<[1], [0], [0], [1], [0, 0, 1, 1], [], []>} : vector<8x168xbf16>, vector<168x140xbf16>, vector<8x140xf32> -> vector<8x140xf32>
    %86 = arith.addf %84, %85 : vector<8x140xf32>
    %87 = vector.broadcast %4 : vector<1x140xf32> to vector<8x140xf32>
    %88 = arith.addf %86, %87 : vector<8x140xf32>
    %cst_61 = arith.constant 0.000000e+00 : f32
    %89 = vector.broadcast %cst_61 : f32 to vector<8x140xf32>
    %90 = arith.maximumf %88, %89 : vector<8x140xf32>
    %91 = arith.truncf %90 : vector<8x140xf32> to vector<8x140xbf16>
    %cst_62 = arith.constant dense<0.000000e+00> : vector<8x140xf32>
    %92 = tpu.matmul %21, %0, %cst_62 {dimension_numbers = #tpu.dot_dimension_numbers<[1], [0], [0], [1], [0, 0, 1, 1], [], []>} : vector<8x168xbf16>, vector<168x140xbf16>, vector<8x140xf32> -> vector<8x140xf32>
    %cst_63 = arith.constant dense<0.000000e+00> : vector<8x140xf32>
    %93 = tpu.matmul %23, %1, %cst_63 {dimension_numbers = #tpu.dot_dimension_numbers<[1], [0], [0], [1], [0, 0, 1, 1], [], []>} : vector<8x168xbf16>, vector<168x140xbf16>, vector<8x140xf32> -> vector<8x140xf32>
    %94 = arith.addf %92, %93 : vector<8x140xf32>
    %95 = vector.broadcast %4 : vector<1x140xf32> to vector<8x140xf32>
    %96 = arith.addf %94, %95 : vector<8x140xf32>
    %cst_64 = arith.constant 0.000000e+00 : f32
    %97 = vector.broadcast %cst_64 : f32 to vector<8x140xf32>
    %98 = arith.maximumf %96, %97 : vector<8x140xf32>
    %99 = arith.truncf %98 : vector<8x140xf32> to vector<8x140xbf16>
    %cst_65 = arith.constant dense<0.000000e+00> : vector<8x140xf32>
    %100 = tpu.matmul %23, %0, %cst_65 {dimension_numbers = #tpu.dot_dimension_numbers<[1], [0], [0], [1], [0, 0, 1, 1], [], []>} : vector<8x168xbf16>, vector<168x140xbf16>, vector<8x140xf32> -> vector<8x140xf32>
    %cst_66 = arith.constant dense<0.000000e+00> : vector<8x140xf32>
    %101 = tpu.matmul %25, %1, %cst_66 {dimension_numbers = #tpu.dot_dimension_numbers<[1], [0], [0], [1], [0, 0, 1, 1], [], []>} : vector<8x168xbf16>, vector<168x140xbf16>, vector<8x140xf32> -> vector<8x140xf32>
    %102 = arith.addf %100, %101 : vector<8x140xf32>
    %103 = vector.broadcast %4 : vector<1x140xf32> to vector<8x140xf32>
    %104 = arith.addf %102, %103 : vector<8x140xf32>
    %cst_67 = arith.constant 0.000000e+00 : f32
    %105 = vector.broadcast %cst_67 : f32 to vector<8x140xf32>
    %106 = arith.maximumf %104, %105 : vector<8x140xf32>
    %107 = arith.truncf %106 : vector<8x140xf32> to vector<8x140xbf16>
    %cst_68 = arith.constant dense<0.000000e+00> : vector<8x140xf32>
    %108 = tpu.matmul %25, %0, %cst_68 {dimension_numbers = #tpu.dot_dimension_numbers<[1], [0], [0], [1], [0, 0, 1, 1], [], []>} : vector<8x168xbf16>, vector<168x140xbf16>, vector<8x140xf32> -> vector<8x140xf32>
    %cst_69 = arith.constant dense<0.000000e+00> : vector<8x140xf32>
    %109 = tpu.matmul %27, %1, %cst_69 {dimension_numbers = #tpu.dot_dimension_numbers<[1], [0], [0], [1], [0, 0, 1, 1], [], []>} : vector<8x168xbf16>, vector<168x140xbf16>, vector<8x140xf32> -> vector<8x140xf32>
    %110 = arith.addf %108, %109 : vector<8x140xf32>
    %111 = vector.broadcast %4 : vector<1x140xf32> to vector<8x140xf32>
    %112 = arith.addf %110, %111 : vector<8x140xf32>
    %cst_70 = arith.constant 0.000000e+00 : f32
    %113 = vector.broadcast %cst_70 : f32 to vector<8x140xf32>
    %114 = arith.maximumf %112, %113 : vector<8x140xf32>
    %115 = arith.truncf %114 : vector<8x140xf32> to vector<8x140xbf16>
    %cst_71 = arith.constant dense<0.000000e+00> : vector<8x140xf32>
    %116 = tpu.matmul %27, %0, %cst_71 {dimension_numbers = #tpu.dot_dimension_numbers<[1], [0], [0], [1], [0, 0, 1, 1], [], []>} : vector<8x168xbf16>, vector<168x140xbf16>, vector<8x140xf32> -> vector<8x140xf32>
    %cst_72 = arith.constant dense<0.000000e+00> : vector<8x140xf32>
    %117 = tpu.matmul %29, %1, %cst_72 {dimension_numbers = #tpu.dot_dimension_numbers<[1], [0], [0], [1], [0, 0, 1, 1], [], []>} : vector<8x168xbf16>, vector<168x140xbf16>, vector<8x140xf32> -> vector<8x140xf32>
    %118 = arith.addf %116, %117 : vector<8x140xf32>
    %119 = vector.broadcast %4 : vector<1x140xf32> to vector<8x140xf32>
    %120 = arith.addf %118, %119 : vector<8x140xf32>
    %cst_73 = arith.constant 0.000000e+00 : f32
    %121 = vector.broadcast %cst_73 : f32 to vector<8x140xf32>
    %122 = arith.maximumf %120, %121 : vector<8x140xf32>
    %123 = arith.truncf %122 : vector<8x140xf32> to vector<8x140xbf16>
    %cst_74 = arith.constant dense<0.000000e+00> : vector<8x140xf32>
    %124 = tpu.matmul %29, %0, %cst_74 {dimension_numbers = #tpu.dot_dimension_numbers<[1], [0], [0], [1], [0, 0, 1, 1], [], []>} : vector<8x168xbf16>, vector<168x140xbf16>, vector<8x140xf32> -> vector<8x140xf32>
    %cst_75 = arith.constant dense<0.000000e+00> : vector<8x140xf32>
    %125 = tpu.matmul %31, %1, %cst_75 {dimension_numbers = #tpu.dot_dimension_numbers<[1], [0], [0], [1], [0, 0, 1, 1], [], []>} : vector<8x168xbf16>, vector<168x140xbf16>, vector<8x140xf32> -> vector<8x140xf32>
    %126 = arith.addf %124, %125 : vector<8x140xf32>
    %127 = vector.broadcast %4 : vector<1x140xf32> to vector<8x140xf32>
    %128 = arith.addf %126, %127 : vector<8x140xf32>
    %cst_76 = arith.constant 0.000000e+00 : f32
    %129 = vector.broadcast %cst_76 : f32 to vector<8x140xf32>
    %130 = arith.maximumf %128, %129 : vector<8x140xf32>
    %131 = arith.truncf %130 : vector<8x140xf32> to vector<8x140xbf16>
    %cst_77 = arith.constant dense<0.000000e+00> : vector<8x140xf32>
    %132 = tpu.matmul %31, %0, %cst_77 {dimension_numbers = #tpu.dot_dimension_numbers<[1], [0], [0], [1], [0, 0, 1, 1], [], []>} : vector<8x168xbf16>, vector<168x140xbf16>, vector<8x140xf32> -> vector<8x140xf32>
    %cst_78 = arith.constant dense<0.000000e+00> : vector<8x140xf32>
    %133 = tpu.matmul %33, %1, %cst_78 {dimension_numbers = #tpu.dot_dimension_numbers<[1], [0], [0], [1], [0, 0, 1, 1], [], []>} : vector<8x168xbf16>, vector<168x140xbf16>, vector<8x140xf32> -> vector<8x140xf32>
    %134 = arith.addf %132, %133 : vector<8x140xf32>
    %135 = vector.broadcast %4 : vector<1x140xf32> to vector<8x140xf32>
    %136 = arith.addf %134, %135 : vector<8x140xf32>
    %cst_79 = arith.constant 0.000000e+00 : f32
    %137 = vector.broadcast %cst_79 : f32 to vector<8x140xf32>
    %138 = arith.maximumf %136, %137 : vector<8x140xf32>
    %139 = arith.truncf %138 : vector<8x140xf32> to vector<8x140xbf16>
    %cst_80 = arith.constant dense<0.000000e+00> : vector<8x140xf32>
    %140 = tpu.matmul %33, %0, %cst_80 {dimension_numbers = #tpu.dot_dimension_numbers<[1], [0], [0], [1], [0, 0, 1, 1], [], []>} : vector<8x168xbf16>, vector<168x140xbf16>, vector<8x140xf32> -> vector<8x140xf32>
    %cst_81 = arith.constant dense<0.000000e+00> : vector<8x140xf32>
    %141 = tpu.matmul %35, %1, %cst_81 {dimension_numbers = #tpu.dot_dimension_numbers<[1], [0], [0], [1], [0, 0, 1, 1], [], []>} : vector<8x168xbf16>, vector<168x140xbf16>, vector<8x140xf32> -> vector<8x140xf32>
    %142 = arith.addf %140, %141 : vector<8x140xf32>
    %143 = vector.broadcast %4 : vector<1x140xf32> to vector<8x140xf32>
    %144 = arith.addf %142, %143 : vector<8x140xf32>
    %cst_82 = arith.constant 0.000000e+00 : f32
    %145 = vector.broadcast %cst_82 : f32 to vector<8x140xf32>
    %146 = arith.maximumf %144, %145 : vector<8x140xf32>
    %147 = arith.truncf %146 : vector<8x140xf32> to vector<8x140xbf16>
    %cst_83 = arith.constant 0.000000e+00 : bf16
    %148 = vector.broadcast %cst_83 : bf16 to vector<8x140xbf16>
    %149 = tpu.concatenate %148, %43 in 1 : vector<8x140xbf16>, vector<8x140xbf16> -> vector<8x280xbf16>
    %150 = tpu.concatenate %51, %59 in 1 : vector<8x140xbf16>, vector<8x140xbf16> -> vector<8x280xbf16>
    %151 = tpu.concatenate %67, %75 in 1 : vector<8x140xbf16>, vector<8x140xbf16> -> vector<8x280xbf16>
    %152 = tpu.concatenate %83, %91 in 1 : vector<8x140xbf16>, vector<8x140xbf16> -> vector<8x280xbf16>
    %153 = tpu.concatenate %99, %107 in 1 : vector<8x140xbf16>, vector<8x140xbf16> -> vector<8x280xbf16>
    %154 = tpu.concatenate %115, %123 in 1 : vector<8x140xbf16>, vector<8x140xbf16> -> vector<8x280xbf16>
    %155 = tpu.concatenate %131, %139 in 1 : vector<8x140xbf16>, vector<8x140xbf16> -> vector<8x280xbf16>
    %156 = tpu.concatenate %147, %148 in 1 : vector<8x140xbf16>, vector<8x140xbf16> -> vector<8x280xbf16>
    %cst_84 = arith.constant dense<0.000000e+00> : vector<8x140xf32>
    %157 = tpu.matmul %149, %2, %cst_84 {dimension_numbers = #tpu.dot_dimension_numbers<[1], [0], [0], [1], [0, 0, 1, 1], [], []>} : vector<8x280xbf16>, vector<280x140xbf16>, vector<8x140xf32> -> vector<8x140xf32>
    %cst_85 = arith.constant dense<0.000000e+00> : vector<8x140xf32>
    %158 = tpu.matmul %150, %3, %cst_85 {dimension_numbers = #tpu.dot_dimension_numbers<[1], [0], [0], [1], [0, 0, 1, 1], [], []>} : vector<8x280xbf16>, vector<280x140xbf16>, vector<8x140xf32> -> vector<8x140xf32>
    %159 = arith.addf %157, %158 : vector<8x140xf32>
    %160 = vector.broadcast %5 : vector<1x140xf32> to vector<8x140xf32>
    %161 = arith.addf %159, %160 : vector<8x140xf32>
    %cst_86 = arith.constant 0.000000e+00 : f32
    %162 = vector.broadcast %cst_86 : f32 to vector<8x140xf32>
    %163 = arith.maximumf %161, %162 : vector<8x140xf32>
    %164 = arith.truncf %163 : vector<8x140xf32> to vector<8x140xbf16>
    %cst_87 = arith.constant dense<0.000000e+00> : vector<8x140xf32>
    %165 = tpu.matmul %150, %2, %cst_87 {dimension_numbers = #tpu.dot_dimension_numbers<[1], [0], [0], [1], [0, 0, 1, 1], [], []>} : vector<8x280xbf16>, vector<280x140xbf16>, vector<8x140xf32> -> vector<8x140xf32>
    %cst_88 = arith.constant dense<0.000000e+00> : vector<8x140xf32>
    %166 = tpu.matmul %151, %3, %cst_88 {dimension_numbers = #tpu.dot_dimension_numbers<[1], [0], [0], [1], [0, 0, 1, 1], [], []>} : vector<8x280xbf16>, vector<280x140xbf16>, vector<8x140xf32> -> vector<8x140xf32>
    %167 = arith.addf %165, %166 : vector<8x140xf32>
    %168 = vector.broadcast %5 : vector<1x140xf32> to vector<8x140xf32>
    %169 = arith.addf %167, %168 : vector<8x140xf32>
    %cst_89 = arith.constant 0.000000e+00 : f32
    %170 = vector.broadcast %cst_89 : f32 to vector<8x140xf32>
    %171 = arith.maximumf %169, %170 : vector<8x140xf32>
    %172 = arith.truncf %171 : vector<8x140xf32> to vector<8x140xbf16>
    %cst_90 = arith.constant dense<0.000000e+00> : vector<8x140xf32>
    %173 = tpu.matmul %151, %2, %cst_90 {dimension_numbers = #tpu.dot_dimension_numbers<[1], [0], [0], [1], [0, 0, 1, 1], [], []>} : vector<8x280xbf16>, vector<280x140xbf16>, vector<8x140xf32> -> vector<8x140xf32>
    %cst_91 = arith.constant dense<0.000000e+00> : vector<8x140xf32>
    %174 = tpu.matmul %152, %3, %cst_91 {dimension_numbers = #tpu.dot_dimension_numbers<[1], [0], [0], [1], [0, 0, 1, 1], [], []>} : vector<8x280xbf16>, vector<280x140xbf16>, vector<8x140xf32> -> vector<8x140xf32>
    %175 = arith.addf %173, %174 : vector<8x140xf32>
    %176 = vector.broadcast %5 : vector<1x140xf32> to vector<8x140xf32>
    %177 = arith.addf %175, %176 : vector<8x140xf32>
    %cst_92 = arith.constant 0.000000e+00 : f32
    %178 = vector.broadcast %cst_92 : f32 to vector<8x140xf32>
    %179 = arith.maximumf %177, %178 : vector<8x140xf32>
    %180 = arith.truncf %179 : vector<8x140xf32> to vector<8x140xbf16>
    %cst_93 = arith.constant dense<0.000000e+00> : vector<8x140xf32>
    %181 = tpu.matmul %152, %2, %cst_93 {dimension_numbers = #tpu.dot_dimension_numbers<[1], [0], [0], [1], [0, 0, 1, 1], [], []>} : vector<8x280xbf16>, vector<280x140xbf16>, vector<8x140xf32> -> vector<8x140xf32>
    %cst_94 = arith.constant dense<0.000000e+00> : vector<8x140xf32>
    %182 = tpu.matmul %153, %3, %cst_94 {dimension_numbers = #tpu.dot_dimension_numbers<[1], [0], [0], [1], [0, 0, 1, 1], [], []>} : vector<8x280xbf16>, vector<280x140xbf16>, vector<8x140xf32> -> vector<8x140xf32>
    %183 = arith.addf %181, %182 : vector<8x140xf32>
    %184 = vector.broadcast %5 : vector<1x140xf32> to vector<8x140xf32>
    %185 = arith.addf %183, %184 : vector<8x140xf32>
    %cst_95 = arith.constant 0.000000e+00 : f32
    %186 = vector.broadcast %cst_95 : f32 to vector<8x140xf32>
    %187 = arith.maximumf %185, %186 : vector<8x140xf32>
    %188 = arith.truncf %187 : vector<8x140xf32> to vector<8x140xbf16>
    %cst_96 = arith.constant dense<0.000000e+00> : vector<8x140xf32>
    %189 = tpu.matmul %153, %2, %cst_96 {dimension_numbers = #tpu.dot_dimension_numbers<[1], [0], [0], [1], [0, 0, 1, 1], [], []>} : vector<8x280xbf16>, vector<280x140xbf16>, vector<8x140xf32> -> vector<8x140xf32>
    %cst_97 = arith.constant dense<0.000000e+00> : vector<8x140xf32>
    %190 = tpu.matmul %154, %3, %cst_97 {dimension_numbers = #tpu.dot_dimension_numbers<[1], [0], [0], [1], [0, 0, 1, 1], [], []>} : vector<8x280xbf16>, vector<280x140xbf16>, vector<8x140xf32> -> vector<8x140xf32>
    %191 = arith.addf %189, %190 : vector<8x140xf32>
    %192 = vector.broadcast %5 : vector<1x140xf32> to vector<8x140xf32>
    %193 = arith.addf %191, %192 : vector<8x140xf32>
    %cst_98 = arith.constant 0.000000e+00 : f32
    %194 = vector.broadcast %cst_98 : f32 to vector<8x140xf32>
    %195 = arith.maximumf %193, %194 : vector<8x140xf32>
    %196 = arith.truncf %195 : vector<8x140xf32> to vector<8x140xbf16>
    %cst_99 = arith.constant dense<0.000000e+00> : vector<8x140xf32>
    %197 = tpu.matmul %154, %2, %cst_99 {dimension_numbers = #tpu.dot_dimension_numbers<[1], [0], [0], [1], [0, 0, 1, 1], [], []>} : vector<8x280xbf16>, vector<280x140xbf16>, vector<8x140xf32> -> vector<8x140xf32>
    %cst_100 = arith.constant dense<0.000000e+00> : vector<8x140xf32>
    %198 = tpu.matmul %155, %3, %cst_100 {dimension_numbers = #tpu.dot_dimension_numbers<[1], [0], [0], [1], [0, 0, 1, 1], [], []>} : vector<8x280xbf16>, vector<280x140xbf16>, vector<8x140xf32> -> vector<8x140xf32>
    %199 = arith.addf %197, %198 : vector<8x140xf32>
    %200 = vector.broadcast %5 : vector<1x140xf32> to vector<8x140xf32>
    %201 = arith.addf %199, %200 : vector<8x140xf32>
    %cst_101 = arith.constant 0.000000e+00 : f32
    %202 = vector.broadcast %cst_101 : f32 to vector<8x140xf32>
    %203 = arith.maximumf %201, %202 : vector<8x140xf32>
    %204 = arith.truncf %203 : vector<8x140xf32> to vector<8x140xbf16>
    %cst_102 = arith.constant dense<0.000000e+00> : vector<8x140xf32>
    %205 = tpu.matmul %155, %2, %cst_102 {dimension_numbers = #tpu.dot_dimension_numbers<[1], [0], [0], [1], [0, 0, 1, 1], [], []>} : vector<8x280xbf16>, vector<280x140xbf16>, vector<8x140xf32> -> vector<8x140xf32>
    %cst_103 = arith.constant dense<0.000000e+00> : vector<8x140xf32>
    %206 = tpu.matmul %156, %3, %cst_103 {dimension_numbers = #tpu.dot_dimension_numbers<[1], [0], [0], [1], [0, 0, 1, 1], [], []>} : vector<8x280xbf16>, vector<280x140xbf16>, vector<8x140xf32> -> vector<8x140xf32>
    %207 = arith.addf %205, %206 : vector<8x140xf32>
    %208 = vector.broadcast %5 : vector<1x140xf32> to vector<8x140xf32>
    %209 = arith.addf %207, %208 : vector<8x140xf32>
    %cst_104 = arith.constant 0.000000e+00 : f32
    %210 = vector.broadcast %cst_104 : f32 to vector<8x140xf32>
    %211 = arith.maximumf %209, %210 : vector<8x140xf32>
    %212 = arith.truncf %211 : vector<8x140xf32> to vector<8x140xbf16>
    %213 = tpu.concatenate %164, %172, %180, %188, %196, %204, %212 in 1 : vector<8x140xbf16>, vector<8x140xbf16>, vector<8x140xbf16>, vector<8x140xbf16>, vector<8x140xbf16>, vector<8x140xbf16>, vector<8x140xbf16> -> vector<8x980xbf16>
    %c0_105 = arith.constant 0 : index
    %c0_106 = arith.constant 0 : index
    %214 = vector.load %arg8[%c0_105, %c0_106] : memref<980x128xbf16, #tpu.memory_space<vmem>>, vector<980x128xbf16>
    %cst_107 = arith.constant dense<0.000000e+00> : vector<8x128xf32>
    %215 = tpu.matmul %213, %214, %cst_107 {dimension_numbers = #tpu.dot_dimension_numbers<[1], [0], [0], [1], [0, 0, 1, 1], [], []>} : vector<8x980xbf16>, vector<980x128xbf16>, vector<8x128xf32> -> vector<8x128xf32>
    %c0_108 = arith.constant 0 : index
    %c0_109 = arith.constant 0 : index
    %216 = vector.load %arg9[%c0_108, %c0_109] : memref<1x128xf32, #tpu.memory_space<vmem>>, vector<1x128xf32>
    %217 = vector.broadcast %216 : vector<1x128xf32> to vector<8x128xf32>
    %218 = arith.addf %215, %217 : vector<8x128xf32>
    %cst_110 = arith.constant 0.000000e+00 : f32
    %219 = vector.broadcast %cst_110 : f32 to vector<8x128xf32>
    %220 = arith.maximumf %218, %219 : vector<8x128xf32>
    %221 = arith.truncf %220 : vector<8x128xf32> to vector<8x128xbf16>
    %c0_111 = arith.constant 0 : index
    %c0_112 = arith.constant 0 : index
    %222 = vector.load %arg10[%c0_111, %c0_112] : memref<128x128xbf16, #tpu.memory_space<vmem>>, vector<128x128xbf16>
    %cst_113 = arith.constant dense<0.000000e+00> : vector<8x128xf32>
    %223 = tpu.matmul %221, %222, %cst_113 {dimension_numbers = #tpu.dot_dimension_numbers<[1], [0], [0], [1], [0, 0, 1, 1], [], []>} : vector<8x128xbf16>, vector<128x128xbf16>, vector<8x128xf32> -> vector<8x128xf32>
    %c0_114 = arith.constant 0 : index
    %c0_115 = arith.constant 0 : index
    %224 = vector.load %arg11[%c0_114, %c0_115] : memref<1x128xf32, #tpu.memory_space<vmem>>, vector<1x128xf32>
    %225 = vector.broadcast %224 : vector<1x128xf32> to vector<8x128xf32>
    %226 = arith.addf %223, %225 : vector<8x128xf32>
    %c0_116 = arith.constant 0 : index
    %c0_117 = arith.constant 0 : index
    %227 = vector.load %arg12[%c0_116, %c0_117] : memref<8x128xf32, #tpu.memory_space<vmem>>, vector<8x128xf32>
    tpu.vector_store %arg12[%c0_116, %c0_117], %226 {strides = array<i32>} : memref<8x128xf32, #tpu.memory_space<vmem>>, vector<8x128xf32>,
    return
  }
  func.func @transform_0(%arg0: i32) -> (i32, i32, i32) {
    %c0_i32 = arith.constant 0 : i32
    %c0_i32_0 = arith.constant 0 : i32
    %c0_i32_1 = arith.constant 0 : i32
    return %c0_i32, %arg0, %c0_i32_0 : i32, i32, i32
  }
  func.func @transform_1(%arg0: i32) -> (i32, i32) {
    %c0_i32 = arith.constant 0 : i32
    %c0_i32_0 = arith.constant 0 : i32
    %c0_i32_1 = arith.constant 0 : i32
    return %c0_i32, %c0_i32_0 : i32, i32
  }
  func.func @transform_2(%arg0: i32) -> (i32, i32) {
    %c0_i32 = arith.constant 0 : i32
    %c0_i32_0 = arith.constant 0 : i32
    %c0_i32_1 = arith.constant 0 : i32
    return %c0_i32, %c0_i32_0 : i32, i32
  }
  func.func @transform_3(%arg0: i32) -> (i32, i32) {
    %c0_i32 = arith.constant 0 : i32
    %c0_i32_0 = arith.constant 0 : i32
    %c0_i32_1 = arith.constant 0 : i32
    return %c0_i32, %c0_i32_0 : i32, i32
  }
  func.func @transform_4(%arg0: i32) -> (i32, i32) {
    %c0_i32 = arith.constant 0 : i32
    %c0_i32_0 = arith.constant 0 : i32
    %c0_i32_1 = arith.constant 0 : i32
    return %c0_i32, %c0_i32_0 : i32, i32
  }
  func.func @transform_5(%arg0: i32) -> (i32, i32) {
    %c0_i32 = arith.constant 0 : i32
    %c0_i32_0 = arith.constant 0 : i32
    %c0_i32_1 = arith.constant 0 : i32
    return %c0_i32, %c0_i32_0 : i32, i32
  }
  func.func @transform_6(%arg0: i32) -> (i32, i32) {
    %c0_i32 = arith.constant 0 : i32
    %c0_i32_0 = arith.constant 0 : i32
    %c0_i32_1 = arith.constant 0 : i32
    return %c0_i32, %c0_i32_0 : i32, i32
  }
  func.func @transform_7(%arg0: i32) -> (i32, i32) {
    %c0_i32 = arith.constant 0 : i32
    %c0_i32_0 = arith.constant 0 : i32
    %c0_i32_1 = arith.constant 0 : i32
    return %c0_i32, %c0_i32_0 : i32, i32
  }
  func.func @transform_8(%arg0: i32) -> (i32, i32) {
    %c0_i32 = arith.constant 0 : i32
    %c0_i32_0 = arith.constant 0 : i32
    %c0_i32_1 = arith.constant 0 : i32
    return %c0_i32, %c0_i32_0 : i32, i32
  }
  func.func @transform_9(%arg0: i32) -> (i32, i32) {
    %c0_i32 = arith.constant 0 : i32
    %c0_i32_0 = arith.constant 0 : i32
    %c0_i32_1 = arith.constant 0 : i32
    return %c0_i32, %c0_i32_0 : i32, i32
  }
  func.func @transform_10(%arg0: i32) -> (i32, i32) {
    %c0_i32 = arith.constant 0 : i32
    %c0_i32_0 = arith.constant 0 : i32
    %c0_i32_1 = arith.constant 0 : i32
    return %c0_i32, %c0_i32_0 : i32, i32
  }
  func.func @transform_11(%arg0: i32) -> (i32, i32) {
    %c0_i32 = arith.constant 0 : i32
    %c0_i32_0 = arith.constant 0 : i32
    return %arg0, %c0_i32 : i32, i32
  }
}

</mosaic_0001>

<bundles_post_ra>
// kernel: clf_img_forward.1
= control target key start
LH: loop header
LB: loop body
LE: loop exit
PB: predicated region body
PF: predicated region fallthrough
CT: control target
= control target key end

     0   :  { %vm297_vm0 = vcmask 1043456   ;;  %vm293_vm1 = vcmask 326656   ;;  %vm2081_vm2 = vcmask 97280   ;;  %vm2392_vm3 = vcmask 195584   ;;  %s5531_s26 = smov 48   ;;  %s5532_s27 = smov 60   ;;  %s8550_s2 = inlined_call_operand.vmem [shape: bf16[168,140], index: 2, kind: input, shape index: {}]   ;;  %s8551_s1 = inlined_call_operand.vmem [shape: bf16[168,140], index: 1, kind: input, shape index: {}]   ;;  %s8552_s0 = inlined_call_operand.vmem [shape: bf16[15,8,168], index: 0, kind: input, shape index: {}]   ;;  %s8553_s3 = inlined_call_operand.vmem [shape: f32[1,140], index: 3, kind: input, shape index: {}]   ;;  %s8554_s5 = inlined_call_operand.vmem [shape: bf16[280,140], index: 5, kind: input, shape index: {}]   ;;  %s8555_s4 = inlined_call_operand.vmem [shape: bf16[280,140], index: 4, kind: input, shape index: {}]   ;;  %s8556_s6 = inlined_call_operand.vmem [shape: f32[1,140], index: 6, kind: input, shape index: {}]   ;;  %s8557_s7 = inlined_call_operand.vmem [shape: bf16[980,128], index: 7, kind: input, shape index: {}]   ;;  %s8558_s8 = inlined_call_operand.vmem [shape: f32[1,128], index: 8, kind: input, shape index: {}]   ;;  %s8559_s10 = inlined_call_operand.vmem [shape: f32[1,128], index: 10, kind: input, shape index: {}]   ;;  %s8560_s9 = inlined_call_operand.vmem [shape: bf16[128,128], index: 9, kind: input, shape index: {}]   ;;  %s8561_s11 = inlined_call_operand.vmem [shape: f32[8,128], index: 11, kind: output, shape index: {}]  }
   0x1   :  { %v4602_v0 = vld [vmem:[%s8550_s2 + $0x70] sm:$0xf]  ;;  %v5376_v1 = vld [vmem:[%s8550_s2 + $0x74] sm:$0xf0]  ;;  %v5375_v2 = vld [vmem:[%s8550_s2 + $0x74] sm:$0xf] }
   0x2   :  { %v5603_v3 = vor.u32 %v5376_v1, %v4602_v0  ;;  %v4604_v4 = vld [vmem:[%s8550_s2 + $0x78] sm:$0xf0]  ;;  %v80_v5 = vld [vmem:[%s8550_s2 + $0xa0] sm:$0xff]  ;;  %v5374_v10 = vld [vmem:[%s8550_s2 + $0x64] sm:$0xf0]  ;;  %vm3771_vm5 = vcmask 293888  }
   0x3   :  { %v4594_v6 = vld [vmem:[%s8550_s2 + $0x60] sm:$0xf]  ;;  %v5614_v7 = vor.u32 %v5375_v2, %v4604_v4  ;;  %v249_v8 = vunpack.c.l.b16 %v80_v5  ;;  %v250_v9 = vunpack.c.h.b16 %v80_v5  ;;  %v5373_v11 = vld [vmem:[%s8550_s2 + $0x64] sm:$0xf]  ;;  %v4596_v12 = vld [vmem:[%s8550_s2 + $0x68] sm:$0xf0] }
   0x4   :  { %304 = vmatpush.bf16.msra.mxu0 %v5603_v3  ;;  %v4618_v13 = vld [vmem:[%s8550_s2 + $0x90] sm:$0xf]  ;;  %v5380_v14 = vld [vmem:[%s8550_s2 + $0x94] sm:$0xf0]  ;;  %v5633_v17 = vor.u32 %v5374_v10, %v4594_v6  ;;  %v5635_v18 = vor.u32 %v5373_v11, %v4596_v12  ;;  %v5379_v19 = vld [vmem:[%s8550_s2 + $0x94] sm:$0xf] }
   0x5   :  { %330 = vmatpush.bf16.msra.mxu2 %v5614_v7  ;;  %v271_v15 = vpack.c.b16 %v249_v8, %v249_v8  ;;  %v272_v16 = vpack.c.b16 %v250_v9, %v250_v9  ;;  %v4620_v20 = vld [vmem:[%s8550_s2 + $0x98] sm:$0xf0]  ;;  %v4586_v21 = vld [vmem:[%s8550_s2 + $0x50] sm:$0xf]  ;;  %v5372_v22 = vld [vmem:[%s8550_s2 + $0x54] sm:$0xf0]  ;;  %v5666_v28 = vor.u32 %v5380_v14, %v4618_v13 }
   0x6   :  { %v5371_v23 = vld [vmem:[%s8550_s2 + $0x54] sm:$0xf]  ;;  %v4588_v24 = vld [vmem:[%s8550_s2 + $0x58] sm:$0xf0]  ;;  %v4610_v27 = vld [vmem:[%s8550_s2 + $0x80] sm:$0xf]  ;;  %v5668_v29 = vor.u32 %v5379_v19, %v4620_v20  ;;  %v5681_v33 = vor.u32 %v5372_v22, %v4586_v21 }
   0x7   :  { %v5656_v25 = vsel %vm297_vm0, %v271_v15, 0  ;;  %v5659_v26 = vsel %vm297_vm0, %v272_v16, 0  ;;  %v5378_v30 = vld [vmem:[%s8550_s2 + $0x84] sm:$0xf0]  ;;  %v5377_v31 = vld [vmem:[%s8550_s2 + $0x84] sm:$0xf]  ;;  %v5683_v34 = vor.u32 %v5371_v23, %v4588_v24  ;;  %vm7413_vm4 = vmneg %vm2081_vm2 }
   0x8   :  { %322 = vmatpush.bf16.msra.mxu1 %v5656_v25  ;;  %348 = vmatpush.bf16.msra.mxu3 %v5659_v26  ;;  %v4612_v32 = vld [vmem:[%s8550_s2 + $0x88] sm:$0xf0]  ;;  %v4578_v35 = vld [vmem:[%s8550_s2 + $0x40] sm:$0xf]  ;;  %v5370_v36 = vld [vmem:[%s8550_s2 + $0x44] sm:$0xf0]  ;;  %v5717_v45 = vor.u32 %v5378_v30, %v4610_v27 }
   0x9   :  { %305 = vmatpush.bf16.msra.mxu0 %v5633_v17  ;;  %331 = vmatpush.bf16.msra.mxu2 %v5635_v18  ;;  %v5369_v37 = vld [vmem:[%s8550_s2 + $0x44] sm:$0xf]  ;;  %v4580_v38 = vld [vmem:[%s8550_s2 + $0x48] sm:$0xf0]  ;;  %v4684_v41 = vld [vmem:[%s8551_s1 + $0x70] sm:$0xf]  ;;  %v5719_v46 = vor.u32 %v5377_v31, %v4612_v32  ;;  %v5723_v47 = vor.u32 %v5370_v36, %v4578_v35 }
   0xa   :  { %v5700_v39 = vld [vmem:[%s8551_s1 + $0xa0] sm:$0xff]  ;;  %v5705_v40 = vld [vmem:[%s8552_s0 + $0x8] sm:$0xff]  ;;  %v5356_v42 = vld [vmem:[%s8551_s1 + $0x74] sm:$0xf0]  ;;  %v5725_v48 = vor.u32 %v5369_v37, %v4580_v38  ;;  %vm3782_vm6 = vcmask 392192   ;;  %s5533_s16 = smov 72  }
   0xb   :  { %v423_v43 = vunpack.c.l.b16 %v5700_v39  ;;  %v184_v44 = vunpack.c.h.b16 %v5705_v40  ;;  %v4570_v50 = vld [vmem:[%s8550_s2 + $0x30] sm:$0xf]  ;;  %v5368_v51 = vld [vmem:[%s8550_s2 + $0x34] sm:$0xf0]  ;;  %v5367_v52 = vld [vmem:[%s8550_s2 + $0x34] sm:$0xf]  ;;  %v5736_v53 = vor.u32 %v5356_v42, %v4684_v41  ;;  %v424_v23 = vunpack.c.h.b16 %v5700_v39 }
   0xc   :  { %323 = vmatpush.bf16.msra.mxu1 %v5666_v28  ;;  %349 = vmatpush.bf16.msra.mxu3 %v5668_v29  ;;  %v4572_v54 = vld [vmem:[%s8550_s2 + $0x38] sm:$0xf0]  ;;  %v4676_v55 = vld [vmem:[%s8551_s1 + $0x60] sm:$0xf]  ;;  %v5354_v56 = vld [vmem:[%s8551_s1 + $0x64] sm:$0xf0]  ;;  %v5762_v61 = vor.u32 %v5368_v51, %v4570_v50 }
   0xd   :  { %306 = vmatpush.bf16.msra.mxu0 %v5681_v33  ;;  %332 = vmatpush.bf16.msra.mxu2 %v5683_v34  ;;  %v445_v49 = vpack.c.b16 %v423_v43, %v423_v43  ;;  %v5750_v58 = vpack.c.b16 %v184_v44, %v184_v44  ;;  %v4700_v59 = vld [vmem:[%s8551_s1 + $0x90] sm:$0xf]  ;;  %v5360_v60 = vld [vmem:[%s8551_s1 + $0x94] sm:$0xf0]  ;;  %v5764_v62 = vor.u32 %v5367_v52, %v4572_v54  ;;  %v4562_v63 = vld [vmem:[%s8550_s2 + $0x20] sm:$0xf] }
   0xe   :  { %v5366_v0 = vld [vmem:[%s8550_s2 + $0x24] sm:$0xf0]  ;;  %v5774_v1 = vor.u32 %v5354_v56, %v4676_v55  ;;  %v5776_v2 = vor.u32 %v5360_v60, %v4700_v59  ;;  %v5365_v4 = vld [vmem:[%s8550_s2 + $0x24] sm:$0xf]  ;;  %v4564_v5 = vld [vmem:[%s8550_s2 + $0x28] sm:$0xf0]  ;;  %v446_v44 = vpack.c.b16 %v424_v23, %v424_v23  ;;  %v183_v55 = vunpack.c.l.b16 %v5705_v40 }
   0xf   :  { %v5748_v57 = vsel %vm297_vm0, %v445_v49, 0  ;;  %v4668_v6 = vld [vmem:[%s8551_s1 + $0x50] sm:$0xf]  ;;  %v5352_v8 = vld [vmem:[%s8551_s1 + $0x54] sm:$0xf0]  ;;  %v5808_v13 = vor.u32 %v5366_v0, %v4562_v63  ;;  %v5810_v14 = vor.u32 %v5365_v4, %v4564_v5  ;;  %v5857_v38 = vld [vmem:[%s8552_s0] sm:$0xff] }
  0x10   :  { %324 = vmatpush.bf16.msra.mxu1 %v5717_v45  ;;  %350 = vmatpush.bf16.msra.mxu3 %v5719_v46  ;;  %v4692_v9 = vld [vmem:[%s8551_s1 + $0x80] sm:$0xf]  ;;  %v5358_v10 = vld [vmem:[%s8551_s1 + $0x84] sm:$0xf0]  ;;  %v5355_v11 = vld [vmem:[%s8551_s1 + $0x74] sm:$0xf]  ;;  %v5817_v16 = vor.u32 %v5352_v8, %v4668_v6  ;;  %v358_v56 = vunpack.c.h.b16 %v5857_v38 }
  0x11   :  { %307 = vmatpush.bf16.msra.mxu0 %v5723_v47  ;;  %333 = vmatpush.bf16.msra.mxu2 %v5725_v48  ;;  %v4686_v12 = vld [vmem:[%s8551_s1 + $0x78] sm:$0xf0]  ;;  %v4554_v15 = vld [vmem:[%s8550_s2 + $0x10] sm:$0xf]  ;;  %v5819_v19 = vor.u32 %v5358_v10, %v4692_v9  ;;  %v5364_v20 = vld [vmem:[%s8550_s2 + $0x14] sm:$0xf0]  ;;  %v5916_v9 = vpack.c.b16 %v183_v55, %v183_v55 }
  0x12   :  { %v5363_v21 = vld [vmem:[%s8550_s2 + $0x14] sm:$0xf]  ;;  %v4556_v22 = vld [vmem:[%s8550_s2 + $0x18] sm:$0xf0]  ;;  %v5831_v24 = vor.u32 %v5355_v11, %v4686_v12  ;;  %v4660_v27 = vld [vmem:[%s8551_s1 + $0x40] sm:$0xf]  ;;  %v5847_v35 = vor.u32 %v5364_v20, %v4554_v15  ;;  %v360_v12 = vpack.c.b16 %v358_v56, %v358_v56 }
  0x13   :  { %4625 = vmatmul.msk.bf16.vlgmr.msra.gmra.mxu3 %vm293_vm1, %v5750_v58  ;;  %4624 = vmatmul.msk.bf16.vlgmr.msra.gmra.mxu1 %vm293_vm1, %v5750_v58  ;;  %v5350_v30 = vld [vmem:[%s8551_s1 + $0x44] sm:$0xf0]  ;;  %v5353_v31 = vld [vmem:[%s8551_s1 + $0x64] sm:$0xf]  ;;  %v4678_v32 = vld [vmem:[%s8551_s1 + $0x68] sm:$0xf0]  ;;  %v5849_v36 = vor.u32 %v5363_v21, %v4556_v22 }
  0x14   :  { %476 = vmatpush.bf16.msrb.mxu1 %v5736_v53  ;;  %494 = vmatpush.bf16.msrb.mxu3 %v5748_v57  ;;  %v4546_v37 = vld [vmem:[%s8550_s2] sm:$0xf]  ;;  %v5861_v39 = vor.u32 %v5350_v30, %v4660_v27  ;;  %v5362_v41 = vld [vmem:[%s8550_s2 + $0x4] sm:$0xf0]  ;;  %v5361_v42 = vld [vmem:[%s8550_s2 + $0x4] sm:$0xf]  ;;  %v5873_v49 = vor.u32 %v5353_v31, %v4678_v32 }
  0x15   :  { %308 = vmatpush.bf16.msra.mxu0 %v5762_v61  ;;  %334 = vmatpush.bf16.msra.mxu2 %v5764_v62  ;;  %v4548_v43 = vld [vmem:[%s8550_s2 + $0x8] sm:$0xf0]  ;;  %v4652_v50 = vld [vmem:[%s8551_s1 + $0x30] sm:$0xf]  ;;  %v5348_v51 = vld [vmem:[%s8551_s1 + $0x34] sm:$0xf0]  ;;  %v5891_v59 = vor.u32 %v5362_v41, %v4546_v37 }
  0x16   :  { %v5351_v52 = vld [vmem:[%s8551_s1 + $0x54] sm:$0xf]  ;;  %v4670_v54 = vld [vmem:[%s8551_s1 + $0x58] sm:$0xf0]  ;;  %v5893_v60 = vor.u32 %v5361_v42, %v4548_v43  ;;  %v5896_v63 = vor.u32 %v5348_v51, %v4652_v50  ;;  %v5899_v0 = vsel %vm297_vm0, %v446_v44, 0  ;;  %vm4334_vm7 = vcmask 1041408  }
  0x17   :  { %v4644_v40 = vld [vmem:[%s8551_s1 + $0x20] sm:$0xf]  ;;  %v5905_v4 = vor.u32 %v5351_v52, %v4670_v54  ;;  %v5346_v5 = vld [vmem:[%s8551_s1 + $0x24] sm:$0xf0]  ;;  %v5359_v6 = vld [vmem:[%s8551_s1 + $0x94] sm:$0xf]  ;;  %v357_v52 = vunpack.c.l.b16 %v5857_v38 }
  0x18   :  { %477 = vmatpush.bf16.msrb.mxu1 %v5774_v1  ;;  %495 = vmatpush.bf16.msrb.mxu3 %v5776_v2  ;;  %v4702_v8 = vld [vmem:[%s8551_s1 + $0x98] sm:$0xf0]  ;;  %v5349_v10 = vld [vmem:[%s8551_s1 + $0x44] sm:$0xf]  ;;  %v4662_v11 = vld [vmem:[%s8551_s1 + $0x48] sm:$0xf0]  ;;  %v5928_v15 = vor.u32 %v5346_v5, %v4644_v40 }
  0x19   :  { %309 = vmatpush.bf16.msra.mxu0 %v5808_v13  ;;  %335 = vmatpush.bf16.msra.mxu2 %v5810_v14  ;;  %v5930_v20 = vor.u32 %v5359_v6, %v4702_v8  ;;  %v4636_v21 = vld [vmem:[%s8551_s1 + $0x10] sm:$0xf]  ;;  %v5937_v22 = vor.u32 %v5349_v10, %v4662_v11  ;;  %v5344_v23 = vld [vmem:[%s8551_s1 + $0x14] sm:$0xf0]  ;;  %v5357_v27 = vld [vmem:[%s8551_s1 + $0x84] sm:$0xf]  ;;  %v359_v40 = vpack.c.b16 %v357_v52, %v357_v52 }
  0x1a   :  { %v4694_v30 = vld [vmem:[%s8551_s1 + $0x88] sm:$0xf0]  ;;  %v5347_v31 = vld [vmem:[%s8551_s1 + $0x34] sm:$0xf]  ;;  %v4654_v32 = vld [vmem:[%s8551_s1 + $0x38] sm:$0xf0]  ;;  %v5959_v37 = vor.u32 %v5344_v23, %v4636_v21 }
  0x1b   :  { %v5961_v41 = vor.u32 %v5357_v27, %v4694_v30  ;;  %v5965_v42 = vor.u32 %v5347_v31, %v4654_v32  ;;  %v4628_v43 = vld [vmem:[%s8551_s1] sm:$0xf]  ;;  %v5342_v44 = vld [vmem:[%s8551_s1 + $0x4] sm:$0xf0]  ;;  %v5345_v50 = vld [vmem:[%s8551_s1 + $0x24] sm:$0xf] }
  0x1c   :  { %478 = vmatpush.bf16.msrb.mxu1 %v5817_v16  ;;  %496 = vmatpush.bf16.msrb.mxu3 %v5819_v19  ;;  %v4646_v51 = vld [vmem:[%s8551_s1 + $0x28] sm:$0xf0]  ;;  %v5982_v54 = vor.u32 %v5342_v44, %v4628_v43  ;;  %v5343_v56 = vld [vmem:[%s8551_s1 + $0x14] sm:$0xf]  ;;  %v4638_v38 = vld [vmem:[%s8551_s1 + $0x18] sm:$0xf0] }
  0x1d   :  { %310 = vmatpush.bf16.msra.mxu0 %v5847_v35  ;;  %336 = vmatpush.bf16.msra.mxu2 %v5849_v36  ;;  %v5986_v55 = vor.u32 %v5345_v50, %v4646_v51  ;;  %v5998_v5 = vor.u32 %v5343_v56, %v4638_v38  ;;  %v5341_v6 = vld [vmem:[%s8551_s1 + $0x4] sm:$0xf]  ;;  %v4630_v8 = vld [vmem:[%s8551_s1 + $0x8] sm:$0xf0]  ;;  %v4531_v11 = vld [vmem:[%s8552_s0 + $0x10] sm:$0xff]  ;;  %vm3793_vm8 = vcmask 490496  }
  0x1e   :  { %v6010_v10 = vor.u32 %v5341_v6, %v4630_v8  ;;  %v540_v21 = vunpack.c.h.b16 %v4531_v11  ;;  %v539_v23 = vunpack.c.l.b16 %v4531_v11  ;;  %v4532_v30 = vld [vmem:[%s8552_s0 + $0x18] sm:$0xff]  ;;  %v4533_v43 = vld [vmem:[%s8552_s0 + $0x20] sm:$0xff]  ;;  %v4534_v11 = vld [vmem:[%s8552_s0 + $0x28] sm:$0xff]  ;;  %vm3804_vm9 = vcmask 588800  }
  0x1f   :  { %v657_v31 = vunpack.c.l.b16 %v4532_v30  ;;  %v775_v44 = vunpack.c.l.b16 %v4533_v43  ;;  %v776_v51 = vunpack.c.h.b16 %v4533_v43  ;;  %vm4330_vm10 = vcmask 687104  }
  0x20   :  { %502 = vmatpush.bf16.msra.mxu3 %v5831_v24  ;;  %479 = vmatpush.bf16.msrb.mxu1 %v5861_v39  ;;  %v6030_v27 = vpack.c.b16 %v539_v23, %v539_v23 }
  0x21   :  { %311 = vmatpush.bf16.msra.mxu0 %v5891_v59  ;;  %337 = vmatpush.bf16.msra.mxu2 %v5893_v60  ;;  %v6078_v32 = vpack.c.b16 %v657_v31, %v657_v31  ;;  %v6146_v50 = vpack.c.b16 %v775_v44, %v775_v44  ;;  %v6168_v56 = vpack.c.b16 %v776_v51, %v776_v51 }
  0x23   :  { %4706 = vmatmul.msk.bf16.vlgmr.msrb.gmra.mxu3 %vm293_vm1, %v360_v12 }
  0x24   :  { %503 = vmatpush.bf16.msra.mxu3 %v5873_v49  ;;  %480 = vmatpush.bf16.msrb.mxu1 %v5896_v63 }
  0x25   :  { %520 = vmatpush.bf16.msrb.mxu0 %v5899_v0  ;;  %547 = vmatpush.bf16.msrb.mxu2 %v5603_v3 }
  0x26   :  { %338 = vmatmul.bf16.vlgmr.msra.gmra.mxu2 %v5916_v9  ;;  %312 = vmatmul.bf16.vlgmr.msra.gmra.mxu0 %v5916_v9 }
  0x28   :  { %504 = vmatpush.bf16.msra.mxu3 %v5905_v4  ;;  %481 = vmatpush.bf16.msrb.mxu1 %v5928_v15 }
  0x29   :  { %521 = vmatpush.bf16.msrb.mxu0 %v5930_v20  ;;  %548 = vmatpush.bf16.msrb.mxu2 %v5633_v17 }
  0x2c   :  { %505 = vmatpush.bf16.msra.mxu3 %v5937_v22  ;;  %482 = vmatpush.bf16.msrb.mxu1 %v5959_v37 }
  0x2d   :  { %522 = vmatpush.bf16.msrb.mxu0 %v5961_v41  ;;  %549 = vmatpush.bf16.msrb.mxu2 %v5681_v33 }
  0x30   :  { %506 = vmatpush.bf16.msra.mxu3 %v5965_v42  ;;  %483 = vmatpush.bf16.msrb.mxu1 %v5982_v54 }
  0x31   :  { %573 = vmatpush.bf16.msra.mxu0 %v5614_v7  ;;  %550 = vmatpush.bf16.msrb.mxu2 %v5723_v47 }
  0x33   :  { %484 = vmatmul.bf16.vlgmr.msrb.gmra.mxu1 %v359_v40 }
  0x34   :  { %507 = vmatpush.bf16.msra.mxu3 %v5986_v55  ;;  %565 = vmatpush.bf16.msra.mxu1 %v5656_v25 }
  0x35   :  { %574 = vmatpush.bf16.msra.mxu0 %v5635_v18  ;;  %551 = vmatpush.bf16.msrb.mxu2 %v5762_v61 }
  0x36   :  { %4707 = vmatmul.msk.bf16.vlgmr.msrb.gmra.mxu0 %vm293_vm1, %v360_v12  ;;  %v6028_v12 = vpack.c.b16 %v540_v21, %v540_v21 }
  0x38   :  { %508 = vmatpush.bf16.msra.mxu3 %v5998_v5  ;;  %566 = vmatpush.bf16.msra.mxu1 %v5666_v28 }
  0x39   :  { %575 = vmatpush.bf16.msra.mxu0 %v5683_v34  ;;  %552 = vmatpush.bf16.msrb.mxu2 %v5808_v13 }
  0x3c   :  { %509 = vmatpush.bf16.msra.mxu3 %v6010_v10  ;;  %567 = vmatpush.bf16.msra.mxu1 %v5717_v45 }
  0x3d   :  { %576 = vmatpush.bf16.msra.mxu0 %v5725_v48  ;;  %553 = vmatpush.bf16.msrb.mxu2 %v5847_v35 }
  0x3f   :  { %510 = vmatmul.bf16.vlgmr.msra.gmra.mxu3 %v359_v40 }
  0x40   :  { %591 = vmatpush.bf16.msrb.mxu1 %v5659_v26  ;;  %599 = vmatpush.bf16.msrb.mxu3 %v5736_v53 }
  0x41   :  { %577 = vmatpush.bf16.msra.mxu0 %v5764_v62  ;;  %554 = vmatpush.bf16.msrb.mxu2 %v5891_v59 }
  0x43   :  { %4708 = vmatmul.msk.bf16.vlgmr.msra.gmra.mxu1 %vm293_vm1, %v6028_v12 }
  0x44   :  { %592 = vmatpush.bf16.msrb.mxu1 %v5668_v29  ;;  %600 = vmatpush.bf16.msrb.mxu3 %v5774_v1 }
  0x45   :  { %578 = vmatpush.bf16.msra.mxu0 %v5810_v14  ;;  %665 = vmatpush.bf16.msra.mxu2 %v5603_v3 }
  0x46   :  { %555 = vmatmul.bf16.vlgmr.msrb.gmra.mxu2 %v6030_v27 }
  0x48   :  { %593 = vmatpush.bf16.msrb.mxu1 %v5719_v46  ;;  %601 = vmatpush.bf16.msrb.mxu3 %v5817_v16 }
  0x49   :  { %579 = vmatpush.bf16.msra.mxu0 %v5849_v36  ;;  %666 = vmatpush.bf16.msra.mxu2 %v5633_v17 }
  0x4c   :  { %625 = vmatpush.bf16.msra.mxu1 %v5831_v24  ;;  %602 = vmatpush.bf16.msrb.mxu3 %v5861_v39 }
  0x4d   :  { %580 = vmatpush.bf16.msra.mxu0 %v5893_v60  ;;  %667 = vmatpush.bf16.msra.mxu2 %v5681_v33 }
  0x50   :  { %626 = vmatpush.bf16.msra.mxu1 %v5873_v49  ;;  %603 = vmatpush.bf16.msrb.mxu3 %v5896_v63 }
  0x51   :  { %643 = vmatpush.bf16.msrb.mxu0 %v5899_v0  ;;  %668 = vmatpush.bf16.msra.mxu2 %v5723_v47 }
  0x52   :  { %581 = vmatmul.bf16.vlgmr.msra.gmra.mxu0 %v6030_v27 }
  0x53   :  { %4709 = vmatmul.msk.bf16.vlgmr.msrb.gmra.mxu1 %vm293_vm1, %v6028_v12 }
  0x54   :  { %627 = vmatpush.bf16.msra.mxu1 %v5905_v4  ;;  %604 = vmatpush.bf16.msrb.mxu3 %v5928_v15 }
  0x55   :  { %644 = vmatpush.bf16.msrb.mxu0 %v5930_v20  ;;  %669 = vmatpush.bf16.msra.mxu2 %v5762_v61 }
  0x58   :  { %628 = vmatpush.bf16.msra.mxu1 %v5937_v22  ;;  %605 = vmatpush.bf16.msrb.mxu3 %v5959_v37 }
  0x59   :  { %645 = vmatpush.bf16.msrb.mxu0 %v5961_v41  ;;  %670 = vmatpush.bf16.msra.mxu2 %v5808_v13 }
  0x5c   :  { %629 = vmatpush.bf16.msra.mxu1 %v5965_v42  ;;  %606 = vmatpush.bf16.msrb.mxu3 %v5982_v54 }
  0x5d   :  { %691 = vmatpush.bf16.msra.mxu0 %v5614_v7  ;;  %671 = vmatpush.bf16.msra.mxu2 %v5847_v35 }
  0x5f   :  { %607 = vmatmul.bf16.vlgmr.msrb.gmra.mxu3 %v5916_v9 }
  0x60   :  { %617 = vmatpush.bf16.msra.mxu3 %v5748_v57  ;;  %630 = vmatpush.bf16.msra.mxu1 %v5986_v55 }
  0x61   :  { %692 = vmatpush.bf16.msra.mxu0 %v5635_v18  ;;  %672 = vmatpush.bf16.msra.mxu2 %v5891_v59 }
  0x62   :  { %4711 = vmatmul.msk.bf16.vlgmr.msrb.gmra.mxu0 %vm293_vm1, %v5750_v58 }
  0x64   :  { %618 = vmatpush.bf16.msra.mxu3 %v5776_v2  ;;  %631 = vmatpush.bf16.msra.mxu1 %v5998_v5 }
  0x65   :  { %693 = vmatpush.bf16.msra.mxu0 %v5683_v34  ;;  %735 = vmatpush.bf16.msrb.mxu2 %v5748_v57 }
  0x66   :  { %673 = vmatmul.bf16.vlgmr.msra.gmra.mxu2 %v6078_v32 }
  0x68   :  { %619 = vmatpush.bf16.msra.mxu3 %v5819_v19  ;;  %632 = vmatpush.bf16.msra.mxu1 %v6010_v10 }
  0x69   :  { %694 = vmatpush.bf16.msra.mxu0 %v5725_v48  ;;  %736 = vmatpush.bf16.msrb.mxu2 %v5776_v2 }
  0x6b   :  { %633 = vmatmul.bf16.vlgmr.msra.gmra.mxu1 %v5916_v9  ;;  %v658_v9 = vunpack.c.h.b16 %v4532_v30 }
  0x6c   :  { %683 = vmatpush.bf16.msrb.mxu3 %v5656_v25  ;;  %709 = vmatpush.bf16.msrb.mxu1 %v5659_v26 }
  0x6d   :  { %695 = vmatpush.bf16.msra.mxu0 %v5764_v62  ;;  %737 = vmatpush.bf16.msrb.mxu2 %v5819_v19 }
  0x6f   :  { %4710 = vmatmul.msk.bf16.vlgmr.msra.gmra.mxu3 %vm293_vm1, %v5750_v58  ;;  %v6110_v58 = vpack.c.b16 %v658_v9, %v658_v9 }
  0x70   :  { %684 = vmatpush.bf16.msrb.mxu3 %v5666_v28  ;;  %710 = vmatpush.bf16.msrb.mxu1 %v5668_v29 }
  0x71   :  { %696 = vmatpush.bf16.msra.mxu0 %v5810_v14  ;;  %783 = vmatpush.bf16.msra.mxu2 %v5603_v3 }
  0x74   :  { %685 = vmatpush.bf16.msrb.mxu3 %v5717_v45  ;;  %711 = vmatpush.bf16.msrb.mxu1 %v5719_v46 }
  0x75   :  { %697 = vmatpush.bf16.msra.mxu0 %v5849_v36  ;;  %784 = vmatpush.bf16.msra.mxu2 %v5633_v17 }
  0x76   :  { %4714 = vmatmul.msk.bf16.vlgmr.msrb.gmra.mxu2 %vm293_vm1, %v6028_v12 }
  0x78   :  { %717 = vmatpush.bf16.msra.mxu3 %v5736_v53  ;;  %743 = vmatpush.bf16.msra.mxu1 %v5831_v24 }
  0x79   :  { %698 = vmatpush.bf16.msra.mxu0 %v5893_v60  ;;  %785 = vmatpush.bf16.msra.mxu2 %v5681_v33 }
  0x7b   :  { %4713 = vmatmul.msk.bf16.vlgmr.msrb.gmra.mxu1 %vm293_vm1, %v6110_v58 }
  0x7c   :  { %718 = vmatpush.bf16.msra.mxu3 %v5774_v1  ;;  %744 = vmatpush.bf16.msra.mxu1 %v5873_v49 }
  0x7d   :  { %761 = vmatpush.bf16.msrb.mxu0 %v5899_v0  ;;  %786 = vmatpush.bf16.msra.mxu2 %v5723_v47 }
  0x7e   :  { %699 = vmatmul.bf16.vlgmr.msra.gmra.mxu0 %v6078_v32 }
  0x7f   :  { %4712 = vmatmul.msk.bf16.vlgmr.msrb.gmra.mxu3 %vm293_vm1, %v6110_v58 }
  0x80   :  { %719 = vmatpush.bf16.msra.mxu3 %v5817_v16  ;;  %745 = vmatpush.bf16.msra.mxu1 %v5905_v4 }
  0x81   :  { %762 = vmatpush.bf16.msrb.mxu0 %v5930_v20  ;;  %787 = vmatpush.bf16.msra.mxu2 %v5762_v61 }
  0x84   :  { %720 = vmatpush.bf16.msra.mxu3 %v5861_v39  ;;  %746 = vmatpush.bf16.msra.mxu1 %v5937_v22 }
  0x85   :  { %763 = vmatpush.bf16.msrb.mxu0 %v5961_v41  ;;  %788 = vmatpush.bf16.msra.mxu2 %v5808_v13 }
  0x88   :  { %721 = vmatpush.bf16.msra.mxu3 %v5896_v63  ;;  %747 = vmatpush.bf16.msra.mxu1 %v5965_v42 }
  0x89   :  { %809 = vmatpush.bf16.msra.mxu0 %v5614_v7  ;;  %789 = vmatpush.bf16.msra.mxu2 %v5847_v35 }
  0x8c   :  { %722 = vmatpush.bf16.msra.mxu3 %v5928_v15  ;;  %748 = vmatpush.bf16.msra.mxu1 %v5986_v55 }
  0x8d   :  { %810 = vmatpush.bf16.msra.mxu0 %v5635_v18  ;;  %790 = vmatpush.bf16.msra.mxu2 %v5891_v59 }
  0x8e   :  { %4715 = vmatmul.msk.bf16.vlgmr.msrb.gmra.mxu0 %vm293_vm1, %v6028_v12  ;;  %v893_v12 = vunpack.c.l.b16 %v4534_v11 }
  0x90   :  { %723 = vmatpush.bf16.msra.mxu3 %v5959_v37  ;;  %749 = vmatpush.bf16.msra.mxu1 %v5998_v5  ;;  %v326_v52 = vpop.f32.mrf.mxu1  ;;  %v6209_v30 = vpack.c.b16 %v893_v12, %v893_v12 }
  0x91   :  { %811 = vmatpush.bf16.msra.mxu0 %v5683_v34  ;;  %853 = vmatpush.bf16.msrb.mxu2 %v5748_v57 }
  0x92   :  { %791 = vmatmul.bf16.vlgmr.msra.gmra.mxu2 %v6146_v50 }
  0x94   :  { %724 = vmatpush.bf16.msra.mxu3 %v5982_v54  ;;  %750 = vmatpush.bf16.msra.mxu1 %v6010_v10 }
  0x95   :  { %812 = vmatpush.bf16.msra.mxu0 %v5725_v48  ;;  %854 = vmatpush.bf16.msrb.mxu2 %v5776_v2 }
  0x96   :  { %v6173_v38 = vpop.f32.mrf.mxu3 }
  0x97   :  { %725 = vmatmul.bf16.vlgmr.msra.gmra.mxu3 %v6030_v27  ;;  %751 = vmatmul.bf16.vlgmr.msra.gmra.mxu1 %v6030_v27 }
  0x98   :  { %801 = vmatpush.bf16.msrb.mxu3 %v5656_v25  ;;  %827 = vmatpush.bf16.msrb.mxu1 %v5659_v26  ;;  %v328_v40 = vpop.f32.mrf.mxu1 }
  0x99   :  { %813 = vmatpush.bf16.msra.mxu0 %v5764_v62  ;;  %855 = vmatpush.bf16.msrb.mxu2 %v5819_v19 }
  0x9c   :  { %802 = vmatpush.bf16.msrb.mxu3 %v5666_v28  ;;  %828 = vmatpush.bf16.msrb.mxu1 %v5668_v29 }
  0x9d   :  { %814 = vmatpush.bf16.msra.mxu0 %v5810_v14  ;;  %901 = vmatpush.bf16.msra.mxu2 %v5603_v3 }
  0x9e   :  { %v354_v6 = vpop.f32.mrf.mxu3 }
  0x9f   :  { %v151_v6 = vld [vmem:[%s8553_s3] sm:$0x3]  ;;  %s5527_s3 = smov 12  }
  0xa0   :  { %803 = vmatpush.bf16.msrb.mxu3 %v5717_v45  ;;  %829 = vmatpush.bf16.msrb.mxu1 %v5719_v46 }
  0xa1   :  { %815 = vmatpush.bf16.msra.mxu0 %v5849_v36  ;;  %902 = vmatpush.bf16.msra.mxu2 %v5633_v17 }
  0xa2   :  { %4718 = vmatmul.msk.bf16.vlgmr.msrb.gmra.mxu2 %vm293_vm1, %v6110_v58 }
  0xa3   :  { %v313_v8 = vpop.f32.mrf.mxu0 }
  0xa4   :  { %835 = vmatpush.bf16.msra.mxu3 %v5736_v53  ;;  %861 = vmatpush.bf16.msra.mxu1 %v5831_v24  ;;  %v327_v44 = vadd.f32 %v326_v52, %v313_v8 }
  0xa5   :  { %816 = vmatpush.bf16.msra.mxu0 %v5893_v60  ;;  %903 = vmatpush.bf16.msra.mxu2 %v5681_v33 }
  0xa6   :  { %v498_v23 = vpop.f32.mrf.mxu3 }
  0xa7   :  { %4716 = vmatmul.msk.bf16.vlgmr.msrb.gmra.mxu3 %vm293_vm1, %v6168_v56  ;;  %4717 = vmatmul.msk.bf16.vlgmr.msrb.gmra.mxu1 %vm293_vm1, %v6168_v56 }
  0xa8   :  { %836 = vmatpush.bf16.msra.mxu3 %v5774_v1  ;;  %862 = vmatpush.bf16.msra.mxu1 %v5873_v49 }
  0xa9   :  { %879 = vmatpush.bf16.msrb.mxu0 %v5899_v0  ;;  %904 = vmatpush.bf16.msra.mxu2 %v5723_v47  ;;  %v339_v21 = vpop.f32.mrf.mxu2 }
  0xaa   :  { %817 = vmatmul.bf16.vlgmr.msra.gmra.mxu0 %v6146_v50 }
  0xab   :  { %v315_v27 = vpop.f32.mrf.mxu0 }
  0xac   :  { %837 = vmatpush.bf16.msra.mxu3 %v5817_v16  ;;  %863 = vmatpush.bf16.msra.mxu1 %v5905_v4  ;;  %v6242_v27 = vperm.slane %v151_v6, 0 }
  0xad   :  { %880 = vmatpush.bf16.msrb.mxu0 %v5930_v20  ;;  %905 = vmatpush.bf16.msra.mxu2 %v5762_v61 }
  0xae   :  { %v500_v9 = vpop.f32.mrf.mxu3 }
  0xb0   :  { %838 = vmatpush.bf16.msra.mxu3 %v5861_v39  ;;  %864 = vmatpush.bf16.msra.mxu1 %v5937_v22  ;;  %v485_v31 = vpop.f32.mrf.mxu1 }
  0xb1   :  { %881 = vmatpush.bf16.msrb.mxu0 %v5961_v41  ;;  %906 = vmatpush.bf16.msra.mxu2 %v5808_v13  ;;  %v341_v43 = vpop.f32.mrf.mxu2  ;;  %v486_v40 = vadd.f32 %v485_v31, %v327_v44 }
  0xb2   :  { %v6247_v43 = vperm.slane %v151_v6, 1 }
  0xb3   :  { %v499_v12 = vadd.f32 %v498_v23, %v486_v40 }
  0xb4   :  { %839 = vmatpush.bf16.msra.mxu3 %v5896_v63  ;;  %865 = vmatpush.bf16.msra.mxu1 %v5965_v42 }
  0xb5   :  { %927 = vmatpush.bf16.msra.mxu0 %v5614_v7  ;;  %907 = vmatpush.bf16.msra.mxu2 %v5847_v35 }
  0xb8   :  { %840 = vmatpush.bf16.msra.mxu3 %v5928_v15  ;;  %866 = vmatpush.bf16.msra.mxu1 %v5986_v55  ;;  %v487_v51 = vpop.f32.mrf.mxu1 }
  0xb9   :  { %928 = vmatpush.bf16.msra.mxu0 %v5635_v18  ;;  %908 = vmatpush.bf16.msra.mxu2 %v5891_v59 }
  0xba   :  { %4719 = vmatmul.msk.bf16.vlgmr.msrb.gmra.mxu0 %vm293_vm1, %v6110_v58  ;;  %v524_v58 = vpop.f32.mrf.mxu0 }
  0xbc   :  { %841 = vmatpush.bf16.msra.mxu3 %v5959_v37  ;;  %867 = vmatpush.bf16.msra.mxu1 %v5998_v5 }
  0xbd   :  { %929 = vmatpush.bf16.msra.mxu0 %v5683_v34  ;;  %971 = vmatpush.bf16.msrb.mxu2 %v5748_v57 }
  0xbe   :  { %909 = vmatmul.bf16.vlgmr.msra.gmra.mxu2 %v6209_v30 }
  0xc0   :  { %842 = vmatpush.bf16.msra.mxu3 %v5982_v54  ;;  %868 = vmatpush.bf16.msra.mxu1 %v6010_v10  ;;  %v569_v44 = vpop.f32.mrf.mxu1 }
  0xc1   :  { %930 = vmatpush.bf16.msra.mxu0 %v5725_v48  ;;  %972 = vmatpush.bf16.msrb.mxu2 %v5776_v2 }
  0xc2   :  { %v526_v8 = vpop.f32.mrf.mxu0  ;;  %v511_v31 = vpop.f32.mrf.mxu3 }
  0xc3   :  { %843 = vmatmul.bf16.vlgmr.msra.gmra.mxu3 %v6078_v32  ;;  %869 = vmatmul.bf16.vlgmr.msra.gmra.mxu1 %v6078_v32  ;;  %v894_v32 = vunpack.c.h.b16 %v4534_v11  ;;  %v353_v11 = vadd.f32 %v6173_v38, %v339_v21  ;;  %v533_v38 = vadd.f32 %v6242_v27, %v499_v12 }
  0xc4   :  { %919 = vmatpush.bf16.msrb.mxu3 %v5656_v25  ;;  %945 = vmatpush.bf16.msrb.mxu1 %v5659_v26 }
  0xc5   :  { %931 = vmatpush.bf16.msra.mxu0 %v5764_v62  ;;  %973 = vmatpush.bf16.msrb.mxu2 %v5819_v19  ;;  %v6236_v52 = vpack.c.b16 %v894_v32, %v894_v32  ;;  %v512_v9 = vadd.f32 %v511_v31, %v353_v11  ;;  %v535_v32 = vmax.f32 %v533_v38, 0.0 }
  0xc7   :  { %v525_v21 = vadd.f32 %v524_v58, %v512_v9 }
  0xc8   :  { %920 = vmatpush.bf16.msrb.mxu3 %v5666_v28  ;;  %946 = vmatpush.bf16.msrb.mxu1 %v5668_v29  ;;  %v571_v11 = vpop.f32.mrf.mxu1 }
  0xc9   :  { %932 = vmatpush.bf16.msra.mxu0 %v5810_v14  ;;  %1019 = vmatpush.bf16.msra.mxu2 %v5603_v3  ;;  %v534_v23 = vadd.f32 %v6247_v43, %v525_v21  ;;  %v556_v40 = vpop.f32.mrf.mxu2 }
  0xca   :  { %v513_v58 = vpop.f32.mrf.mxu3  ;;  %v570_v8 = vadd.f32 %v569_v44, %v556_v40  ;;  %v4535_v44 = vld [vmem:[%s8552_s0 + $0x30] sm:$0xff] }
  0xcb   :  { %v536_v51 = vmax.f32 %v534_v23, 0.0 }
  0xcc   :  { %921 = vmatpush.bf16.msrb.mxu3 %v5717_v45  ;;  %947 = vmatpush.bf16.msrb.mxu1 %v5719_v46 }
  0xcd   :  { %933 = vmatpush.bf16.msra.mxu0 %v5849_v36  ;;  %1020 = vmatpush.bf16.msra.mxu2 %v5633_v17  ;;  %v537_v6 = vpack.c.bf16 %v536_v51, %v535_v32  ;;  %v1011_v51 = vunpack.c.l.b16 %v4535_v44 }
  0xce   :  { %4722 = vmatmul.msk.bf16.vlgmr.msrb.gmra.mxu2 %vm293_vm1, %v6168_v56 }
  0xcf   :  { %v2073_v12 = vunpack.c.l.b16 %v537_v6  ;;  %v582_v31 = vpop.f32.mrf.mxu0  ;;  %v2074_v21 = vunpack.c.h.b16 %v537_v6  ;;  %v6290_v6 = vpack.c.b16 %v1011_v51, %v1011_v51 }
  0xd0   :  { %953 = vmatpush.bf16.msra.mxu3 %v5736_v53  ;;  %979 = vmatpush.bf16.msra.mxu1 %v5831_v24  ;;  %v595_v23 = vpop.f32.mrf.mxu1 }
  0xd1   :  { %934 = vmatpush.bf16.msra.mxu0 %v5893_v60  ;;  %1021 = vmatpush.bf16.msra.mxu2 %v5681_v33  ;;  %v2075_v9 = vpack.c.b16 %v2073_v12, %v2073_v12  ;;  %v558_v38 = vpop.f32.mrf.mxu2  ;;  %v596_v32 = vadd.f32 %v595_v23, %v582_v31  ;;  %v2076_v40 = vpack.c.b16 %v2074_v21, %v2074_v21  ;;  %v1012_v12 = vunpack.c.h.b16 %v4535_v44 }
  0xd3   :  { %4720 = vmatmul.msk.bf16.vlgmr.msrb.gmra.mxu3 %vm293_vm1, %v6236_v52  ;;  %4721 = vmatmul.msk.bf16.vlgmr.msrb.gmra.mxu1 %vm293_vm1, %v6236_v52  ;;  %v6308_v38 = vpack.c.b16 %v1012_v12, %v1012_v12  ;;  %v4536_v12 = vld [vmem:[%s8552_s0 + $0x38] sm:$0xff] }
  0xd4   :  { %954 = vmatpush.bf16.msra.mxu3 %v5774_v1  ;;  %980 = vmatpush.bf16.msra.mxu1 %v5873_v49 }
  0xd5   :  { %997 = vmatpush.bf16.msrb.mxu0 %v5899_v0  ;;  %1022 = vmatpush.bf16.msra.mxu2 %v5723_v47 }
  0xd6   :  { %935 = vmatmul.bf16.vlgmr.msra.gmra.mxu0 %v6209_v30  ;;  %2077 = vrot.lane.b32.xlu1 %v2075_v9, %s5527_s3 }
  0xd7   :  { %v584_v58 = vpop.f32.mrf.mxu0 }
  0xd8   :  { %955 = vmatpush.bf16.msra.mxu3 %v5817_v16  ;;  %981 = vmatpush.bf16.msra.mxu1 %v5905_v4  ;;  %v597_v11 = vpop.f32.mrf.mxu1 }
  0xd9   :  { %998 = vmatpush.bf16.msrb.mxu0 %v5930_v20  ;;  %1023 = vmatpush.bf16.msra.mxu2 %v5762_v61 }
  0xdc   :  { %956 = vmatpush.bf16.msra.mxu3 %v5861_v39  ;;  %982 = vmatpush.bf16.msra.mxu1 %v5937_v22 }
  0xdd   :  { %999 = vmatpush.bf16.msrb.mxu0 %v5961_v41  ;;  %1024 = vmatpush.bf16.msra.mxu2 %v5808_v13 }
  0xde   :  { %2079 = vrot.lane.b32.xlu1 %v2076_v40, %s5527_s3 }
  0xe0   :  { %957 = vmatpush.bf16.msra.mxu3 %v5896_v63  ;;  %983 = vmatpush.bf16.msra.mxu1 %v5965_v42 }
  0xe1   :  { %1045 = vmatpush.bf16.msra.mxu0 %v5614_v7  ;;  %1025 = vmatpush.bf16.msra.mxu2 %v5847_v35 }
  0xe4   :  { %958 = vmatpush.bf16.msra.mxu3 %v5928_v15  ;;  %984 = vmatpush.bf16.msra.mxu1 %v5986_v55 }
  0xe5   :  { %1046 = vmatpush.bf16.msra.mxu0 %v5635_v18  ;;  %1026 = vmatpush.bf16.msra.mxu2 %v5891_v59 }
  0xe6   :  { %4723 = vmatmul.msk.bf16.vlgmr.msrb.gmra.mxu0 %vm293_vm1, %v6168_v56  ;;  %v647_v56 = vpop.f32.mrf.mxu0 }
  0xe8   :  { %959 = vmatpush.bf16.msra.mxu3 %v5959_v37  ;;  %985 = vmatpush.bf16.msra.mxu1 %v5998_v5  ;;  %v634_v9 = vpop.f32.mrf.mxu1 }
  0xe9   :  { %1047 = vmatpush.bf16.msra.mxu0 %v5683_v34  ;;  %1089 = vmatpush.bf16.msrb.mxu2 %v5748_v57  ;;  %v635_v21 = vadd.f32 %v634_v9, %v596_v32  ;;  %v6315_v51 = vpop.f32.mrf.mxu2 }
  0xea   :  { %1027 = vmatmul.bf16.vlgmr.msra.gmra.mxu2 %v6290_v6 }
  0xec   :  { %960 = vmatpush.bf16.msra.mxu3 %v5982_v54  ;;  %986 = vmatpush.bf16.msra.mxu1 %v6010_v10 }
  0xed   :  { %1048 = vmatpush.bf16.msra.mxu0 %v5725_v48  ;;  %1090 = vmatpush.bf16.msrb.mxu2 %v5776_v2 }
  0xee   :  { %v649_v23 = vpop.f32.mrf.mxu0 }
  0xef   :  { %961 = vmatmul.bf16.vlgmr.msra.gmra.mxu3 %v6146_v50  ;;  %987 = vmatmul.bf16.vlgmr.msra.gmra.mxu1 %v6146_v50  ;;  %v608_v50 = vpop.f32.mrf.mxu3 }
  0xf0   :  { %1037 = vmatpush.bf16.msrb.mxu3 %v5656_v25  ;;  %1063 = vmatpush.bf16.msrb.mxu1 %v5659_v26  ;;  %v609_v31 = vadd.f32 %v608_v50, %v570_v8  ;;  %v648_v8 = vadd.f32 %v647_v56, %v635_v21  ;;  %v636_v32 = vpop.f32.mrf.mxu1 }
  0xf1   :  { %1049 = vmatpush.bf16.msra.mxu0 %v5764_v62  ;;  %1091 = vmatpush.bf16.msrb.mxu2 %v5819_v19  ;;  %v676_v40 = vpop.f32.mrf.mxu2 }
  0xf2   :  { %v652_v11 = vadd.f32 %v648_v8, %v6247_v43 }
  0xf4   :  { %1038 = vmatpush.bf16.msrb.mxu3 %v5666_v28  ;;  %1064 = vmatpush.bf16.msrb.mxu1 %v5668_v29  ;;  %v654_v21 = vmax.f32 %v652_v11, 0.0 }
  0xf5   :  { %1050 = vmatpush.bf16.msra.mxu0 %v5810_v14  ;;  %1137 = vmatpush.bf16.msra.mxu2 %v5603_v3 }
  0xf7   :  { %v610_v44 = vpop.f32.mrf.mxu3 }
  0xf8   :  { %1039 = vmatpush.bf16.msrb.mxu3 %v5717_v45  ;;  %1065 = vmatpush.bf16.msrb.mxu1 %v5719_v46  ;;  %v713_v44 = vpop.f32.mrf.mxu1 }
  0xf9   :  { %1051 = vmatpush.bf16.msra.mxu0 %v5849_v36  ;;  %1138 = vmatpush.bf16.msra.mxu2 %v5633_v17 }
  0xfa   :  { %4726 = vmatmul.msk.bf16.vlgmr.msrb.gmra.mxu2 %vm293_vm1, %v6236_v52 }
  0xfb   :  { %v700_v9 = vpop.f32.mrf.mxu0 }
  0xfc   :  { %1071 = vmatpush.bf16.msra.mxu3 %v5736_v53  ;;  %1097 = vmatpush.bf16.msra.mxu1 %v5831_v24 }
  0xfd   :  { %1052 = vmatpush.bf16.msra.mxu0 %v5893_v60  ;;  %1139 = vmatpush.bf16.msra.mxu2 %v5681_v33 }
  0xff   :  { %4724 = vmatmul.msk.bf16.vlgmr.msrb.gmra.mxu3 %vm293_vm1, %v6308_v38  ;;  %4725 = vmatmul.msk.bf16.vlgmr.msrb.gmra.mxu1 %vm293_vm1, %v6308_v38  ;;  %v621_v58 = vpop.f32.mrf.mxu3 }
 0x100   :  { %1072 = vmatpush.bf16.msra.mxu3 %v5774_v1  ;;  %1098 = vmatpush.bf16.msra.mxu1 %v5873_v49  ;;  %v622_v56 = vadd.f32 %v621_v58, %v609_v31  ;;  %v1129_v31 = vunpack.c.l.b16 %v4536_v12  ;;  %v739_v58 = vpop.f32.mrf.mxu2 }
 0x101   :  { %1115 = vmatpush.bf16.msrb.mxu0 %v5899_v0  ;;  %1140 = vmatpush.bf16.msra.mxu2 %v5723_v47 }
 0x102   :  { %1053 = vmatmul.bf16.vlgmr.msra.gmra.mxu0 %v6290_v6  ;;  %v651_v50 = vadd.f32 %v622_v56, %v6242_v27  ;;  %v6351_v40 = vpack.c.b16 %v1129_v31, %v1129_v31  ;;  %v715_v56 = vpop.f32.mrf.mxu1 }
 0x103   :  { %v702_v11 = vpop.f32.mrf.mxu0 }
 0x104   :  { %1073 = vmatpush.bf16.msra.mxu3 %v5817_v16  ;;  %1099 = vmatpush.bf16.msra.mxu1 %v5905_v4  ;;  %v653_v23 = vmax.f32 %v651_v50, 0.0 }
 0x105   :  { %1116 = vmatpush.bf16.msrb.mxu0 %v5930_v20  ;;  %1141 = vmatpush.bf16.msra.mxu2 %v5762_v61 }
 0x106   :  { %v6343_v8 = vpack.c.bf16 %v654_v21, %v653_v23  ;;  %v714_v23 = vadd.f32 %v713_v44, %v700_v9 }
 0x107   :  { %v623_v32 = vpop.f32.mrf.mxu3 }
 0x108   :  { %1074 = vmatpush.bf16.msra.mxu3 %v5861_v39  ;;  %1100 = vmatpush.bf16.msra.mxu1 %v5937_v22  ;;  %8746 = vst [vmem:[#allocation2_spill] sm:$0xff] %v6343_v8  ;;  %v741_v50 = vpop.f32.mrf.mxu2 }
 0x109   :  { %1117 = vmatpush.bf16.msrb.mxu0 %v5961_v41  ;;  %1142 = vmatpush.bf16.msra.mxu2 %v5808_v13 }
 0x10b   :  { %v765_v21 = vpop.f32.mrf.mxu0 }
 0x10c   :  { %1075 = vmatpush.bf16.msra.mxu3 %v5896_v63  ;;  %1101 = vmatpush.bf16.msra.mxu1 %v5965_v42 }
 0x10d   :  { %1163 = vmatpush.bf16.msra.mxu0 %v5614_v7  ;;  %1143 = vmatpush.bf16.msra.mxu2 %v5847_v35 }
 0x110   :  { %1076 = vmatpush.bf16.msra.mxu3 %v5928_v15  ;;  %1102 = vmatpush.bf16.msra.mxu1 %v5986_v55 }
 0x111   :  { %1164 = vmatpush.bf16.msra.mxu0 %v5635_v18  ;;  %1144 = vmatpush.bf16.msra.mxu2 %v5891_v59 }
 0x112   :  { %4727 = vmatmul.msk.bf16.vlgmr.msrb.gmra.mxu0 %vm293_vm1, %v6236_v52  ;;  %v687_v52 = vpop.f32.mrf.mxu3 }
 0x113   :  { %v767_v50 = vpop.f32.mrf.mxu0  ;;  %v688_v9 = vadd.f32 %v687_v52, %v6315_v51 }
 0x114   :  { %1077 = vmatpush.bf16.msra.mxu3 %v5959_v37  ;;  %1103 = vmatpush.bf16.msra.mxu1 %v5998_v5  ;;  %v752_v11 = vpop.f32.mrf.mxu1 }
 0x115   :  { %1165 = vmatpush.bf16.msra.mxu0 %v5683_v34  ;;  %1207 = vmatpush.bf16.msrb.mxu2 %v5748_v57  ;;  %v753_v56 = vadd.f32 %v752_v11, %v714_v23  ;;  %v792_v51 = vpop.f32.mrf.mxu2 }
 0x116   :  { %1145 = vmatmul.bf16.vlgmr.msra.gmra.mxu2 %v6351_v40 }
 0x118   :  { %1078 = vmatpush.bf16.msra.mxu3 %v5982_v54  ;;  %1104 = vmatpush.bf16.msra.mxu1 %v6010_v10 }
 0x119   :  { %1166 = vmatpush.bf16.msra.mxu0 %v5725_v48  ;;  %1208 = vmatpush.bf16.msrb.mxu2 %v5776_v2 }
 0x11a   :  { %v689_v31 = vpop.f32.mrf.mxu3 }
 0x11b   :  { %1079 = vmatmul.bf16.vlgmr.msra.gmra.mxu3 %v6209_v30  ;;  %1105 = vmatmul.bf16.vlgmr.msra.gmra.mxu1 %v6209_v30  ;;  %v1130_v30 = vunpack.c.h.b16 %v4536_v12  ;;  %v766_v12 = vadd.f32 %v765_v21, %v753_v56 }
 0x11c   :  { %1155 = vmatpush.bf16.msrb.mxu3 %v5656_v25  ;;  %1181 = vmatpush.bf16.msrb.mxu1 %v5659_v26  ;;  %v754_v21 = vpop.f32.mrf.mxu1 }
 0x11d   :  { %1167 = vmatpush.bf16.msra.mxu0 %v5764_v62  ;;  %1209 = vmatpush.bf16.msrb.mxu2 %v5819_v19  ;;  %v6377_v32 = vpack.c.b16 %v1130_v30, %v1130_v30  ;;  %v770_v23 = vadd.f32 %v766_v12, %v6247_v43 }
 0x11f   :  { %v772_v11 = vmax.f32 %v770_v23, 0.0 }
 0x120   :  { %1156 = vmatpush.bf16.msrb.mxu3 %v5666_v28  ;;  %1182 = vmatpush.bf16.msrb.mxu1 %v5668_v29 }
 0x121   :  { %1168 = vmatpush.bf16.msra.mxu0 %v5810_v14  ;;  %1255 = vmatpush.bf16.msra.mxu2 %v5603_v3 }
 0x122   :  { %v726_v44 = vpop.f32.mrf.mxu3 }
 0x123   :  { %v727_v30 = vadd.f32 %v726_v44, %v688_v9  ;;  %v794_v9 = vpop.f32.mrf.mxu2 }
 0x124   :  { %1157 = vmatpush.bf16.msrb.mxu3 %v5717_v45  ;;  %1183 = vmatpush.bf16.msrb.mxu1 %v5719_v46 }
 0x125   :  { %1169 = vmatpush.bf16.msra.mxu0 %v5849_v36  ;;  %1256 = vmatpush.bf16.msra.mxu2 %v5633_v17  ;;  %v740_v52 = vadd.f32 %v739_v58, %v727_v30  ;;  %v4537_v58 = vld [vmem:[%s8552_s0 + $0x40] sm:$0xff]  ;;  %v831_v30 = vpop.f32.mrf.mxu1 }
 0x126   :  { %4730 = vmatmul.msk.bf16.vlgmr.msrb.gmra.mxu2 %vm293_vm1, %v6308_v38 }
 0x127   :  { %v769_v31 = vadd.f32 %v740_v52, %v6242_v27  ;;  %v818_v23 = vpop.f32.mrf.mxu0  ;;  %v1247_v52 = vunpack.c.l.b16 %v4537_v58 }
 0x128   :  { %1189 = vmatpush.bf16.msra.mxu3 %v5736_v53  ;;  %1215 = vmatpush.bf16.msra.mxu1 %v5831_v24 }
 0x129   :  { %1170 = vmatpush.bf16.msra.mxu0 %v5893_v60  ;;  %1257 = vmatpush.bf16.msra.mxu2 %v5681_v33  ;;  %v771_v56 = vmax.f32 %v769_v31, 0.0  ;;  %v832_v31 = vadd.f32 %v831_v30, %v818_v23 }
 0x12a   :  { %v728_v50 = vpop.f32.mrf.mxu3 }
 0x12b   :  { %4728 = vmatmul.msk.bf16.vlgmr.msrb.gmra.mxu3 %vm293_vm1, %v6377_v32  ;;  %4729 = vmatmul.msk.bf16.vlgmr.msrb.gmra.mxu1 %vm293_vm1, %v6377_v32  ;;  %v773_v12 = vpack.c.bf16 %v772_v11, %v771_v56  ;;  %v6416_v56 = vpack.c.b16 %v1247_v52, %v1247_v52 }
 0x12c   :  { %1190 = vmatpush.bf16.msra.mxu3 %v5774_v1  ;;  %1216 = vmatpush.bf16.msra.mxu1 %v5873_v49 }
 0x12d   :  { %1233 = vmatpush.bf16.msrb.mxu0 %v5899_v0  ;;  %1258 = vmatpush.bf16.msra.mxu2 %v5723_v47  ;;  %v2095_v44 = vunpack.c.l.b16 %v773_v12  ;;  %v2096_v9 = vunpack.c.h.b16 %v773_v12  ;;  %v833_v30 = vpop.f32.mrf.mxu1 }
 0x12e   :  { %1171 = vmatmul.bf16.vlgmr.msra.gmra.mxu0 %v6351_v40 }
 0x12f   :  { %v2097_v21 = vpack.c.b16 %v2095_v44, %v2095_v44  ;;  %v857_v44 = vpop.f32.mrf.mxu2  ;;  %v820_v23 = vpop.f32.mrf.mxu0 }
 0x130   :  { %1191 = vmatpush.bf16.msra.mxu3 %v5817_v16  ;;  %1217 = vmatpush.bf16.msra.mxu1 %v5905_v4 }
 0x131   :  { %1234 = vmatpush.bf16.msrb.mxu0 %v5930_v20  ;;  %1259 = vmatpush.bf16.msra.mxu2 %v5762_v61 }
 0x132   :  { %2099 = vrot.lane.b32.xlu0 %v2097_v21, %s5527_s3  ;;  %v805_v11 = vpop.f32.mrf.mxu3 }
 0x133   :  { %v806_v50 = vadd.f32 %v805_v11, %v792_v51 }
 0x134   :  { %1192 = vmatpush.bf16.msra.mxu3 %v5861_v39  ;;  %1218 = vmatpush.bf16.msra.mxu1 %v5937_v22 }
 0x135   :  { %1235 = vmatpush.bf16.msrb.mxu0 %v5961_v41  ;;  %1260 = vmatpush.bf16.msra.mxu2 %v5808_v13 }
 0x137   :  { %v859_v12 = vpop.f32.mrf.mxu2  ;;  %v883_v52 = vpop.f32.mrf.mxu0 }
 0x138   :  { %1193 = vmatpush.bf16.msra.mxu3 %v5896_v63  ;;  %1219 = vmatpush.bf16.msra.mxu1 %v5965_v42 }
 0x139   :  { %1281 = vmatpush.bf16.msra.mxu0 %v5614_v7  ;;  %1261 = vmatpush.bf16.msra.mxu2 %v5847_v35 }
 0x13a   :  { %v807_v51 = vpop.f32.mrf.mxu3 }
 0x13c   :  { %1194 = vmatpush.bf16.msra.mxu3 %v5928_v15  ;;  %1220 = vmatpush.bf16.msra.mxu1 %v5986_v55 }
 0x13d   :  { %1282 = vmatpush.bf16.msra.mxu0 %v5635_v18  ;;  %1262 = vmatpush.bf16.msra.mxu2 %v5891_v59 }
 0x13e   :  { %4731 = vmatmul.msk.bf16.vlgmr.msrb.gmra.mxu0 %vm293_vm1, %v6308_v38  ;;  %v2098_v38 = vpack.c.b16 %v2096_v9, %v2096_v9 }
 0x140   :  { %1195 = vmatpush.bf16.msra.mxu3 %v5959_v37  ;;  %1221 = vmatpush.bf16.msra.mxu1 %v5998_v5  ;;  %v870_v11 = vpop.f32.mrf.mxu1 }
 0x141   :  { %1283 = vmatpush.bf16.msra.mxu0 %v5683_v34  ;;  %1325 = vmatpush.bf16.msrb.mxu2 %v5748_v57  ;;  %v871_v9 = vadd.f32 %v870_v11, %v832_v31  ;;  %v6461_v51 = vpop.f32.mrf.mxu2 }
 0x142   :  { %1263 = vmatmul.bf16.vlgmr.msra.gmra.mxu2 %v6416_v56  ;;  %2101 = vrot.lane.b32.xlu0 %v2098_v38, %s5527_s3  ;;  %v885_v38 = vpop.f32.mrf.mxu0 }
 0x144   :  { %1196 = vmatpush.bf16.msra.mxu3 %v5982_v54  ;;  %1222 = vmatpush.bf16.msra.mxu1 %v6010_v10 }
 0x145   :  { %1284 = vmatpush.bf16.msra.mxu0 %v5725_v48  ;;  %1326 = vmatpush.bf16.msrb.mxu2 %v5776_v2 }
 0x146   :  { %v844_v30 = vpop.f32.mrf.mxu3 }
 0x147   :  { %1197 = vmatmul.bf16.vlgmr.msra.gmra.mxu3 %v6290_v6  ;;  %1223 = vmatmul.bf16.vlgmr.msra.gmra.mxu1 %v6290_v6  ;;  %v1248_v6 = vunpack.c.h.b16 %v4537_v58  ;;  %v884_v58 = vadd.f32 %v883_v52, %v871_v9  ;;  %v845_v23 = vadd.f32 %v844_v30, %v806_v50 }
 0x148   :  { %1273 = vmatpush.bf16.msrb.mxu3 %v5656_v25  ;;  %1299 = vmatpush.bf16.msrb.mxu1 %v5659_v26 }
 0x149   :  { %1285 = vmatpush.bf16.msra.mxu0 %v5764_v62  ;;  %1327 = vmatpush.bf16.msrb.mxu2 %v5819_v19  ;;  %v6444_v21 = vpack.c.b16 %v1248_v6, %v1248_v6  ;;  %v888_v31 = vadd.f32 %v884_v58, %v6247_v43  ;;  %v858_v12 = vadd.f32 %v857_v44, %v845_v23  ;;  %v872_v6 = vpop.f32.mrf.mxu1  ;;  %v912_v58 = vpop.f32.mrf.mxu2  ;;  %v4538_v23 = vld [vmem:[%s8552_s0 + $0x48] sm:$0xff] }
 0x14a   :  { %v1365_v38 = vunpack.c.l.b16 %v4538_v23  ;;  %v1366_v58 = vunpack.c.h.b16 %v4538_v23 }
 0x14b   :  { %v887_v50 = vadd.f32 %v858_v12, %v6242_v27  ;;  %v890_v52 = vmax.f32 %v888_v31, 0.0 }
 0x14c   :  { %1274 = vmatpush.bf16.msrb.mxu3 %v5666_v28  ;;  %1300 = vmatpush.bf16.msrb.mxu1 %v5668_v29  ;;  %v6490_v6 = vpack.c.b16 %v1365_v38, %v1365_v38 }
 0x14d   :  { %1373 = vmatpush.bf16.msra.mxu2 %v5603_v3  ;;  %1286 = vmatpush.bf16.msra.mxu0 %v5810_v14  ;;  %v889_v11 = vmax.f32 %v887_v50, 0.0 }
 0x14e   :  { %v846_v9 = vpop.f32.mrf.mxu3 }
 0x14f   :  { %v6473_v44 = vpack.c.bf16 %v890_v52, %v889_v11 }
 0x150   :  { %1275 = vmatpush.bf16.msrb.mxu3 %v5717_v45  ;;  %1301 = vmatpush.bf16.msrb.mxu1 %v5719_v46 }
 0x151   :  { %1374 = vmatpush.bf16.msra.mxu2 %v5633_v17  ;;  %1287 = vmatpush.bf16.msra.mxu0 %v5849_v36  ;;  %8747 = vst [vmem:[#allocation3_spill] sm:$0xff] %v6473_v44  ;;  %v949_v30 = vpop.f32.mrf.mxu1  ;;  %v975_v50 = vpop.f32.mrf.mxu2 }
 0x152   :  { %4734 = vmatmul.msk.bf16.vlgmr.msrb.gmra.mxu2 %vm293_vm1, %v6377_v32 }
 0x153   :  { %v936_v31 = vpop.f32.mrf.mxu0 }
 0x154   :  { %1307 = vmatpush.bf16.msra.mxu3 %v5736_v53  ;;  %1333 = vmatpush.bf16.msra.mxu1 %v5831_v24 }
 0x155   :  { %1375 = vmatpush.bf16.msra.mxu2 %v5681_v33  ;;  %1288 = vmatpush.bf16.msra.mxu0 %v5893_v60 }
 0x156   :  { %v923_v12 = vpop.f32.mrf.mxu3 }
 0x157   :  { %4732 = vmatmul.msk.bf16.vlgmr.msrb.gmra.mxu3 %vm293_vm1, %v6444_v21  ;;  %4733 = vmatmul.msk.bf16.vlgmr.msrb.gmra.mxu1 %vm293_vm1, %v6444_v21 }
 0x158   :  { %1308 = vmatpush.bf16.msra.mxu3 %v5774_v1  ;;  %1334 = vmatpush.bf16.msra.mxu1 %v5873_v49 }
 0x159   :  { %1351 = vmatpush.bf16.msrb.mxu0 %v5899_v0  ;;  %1376 = vmatpush.bf16.msra.mxu2 %v5723_v47  ;;  %v951_v52 = vpop.f32.mrf.mxu1  ;;  %v977_v9 = vpop.f32.mrf.mxu2 }
 0x15a   :  { %1289 = vmatmul.bf16.vlgmr.msra.gmra.mxu0 %v6416_v56 }
 0x15b   :  { %v938_v11 = vpop.f32.mrf.mxu0 }
 0x15c   :  { %1309 = vmatpush.bf16.msra.mxu3 %v5817_v16  ;;  %1335 = vmatpush.bf16.msra.mxu1 %v5905_v4 }
 0x15d   :  { %1352 = vmatpush.bf16.msrb.mxu0 %v5930_v20  ;;  %1377 = vmatpush.bf16.msra.mxu2 %v5762_v61 }
 0x160   :  { %1310 = vmatpush.bf16.msra.mxu3 %v5861_v39  ;;  %1336 = vmatpush.bf16.msra.mxu1 %v5937_v22 }
 0x161   :  { %1353 = vmatpush.bf16.msrb.mxu0 %v5961_v41  ;;  %1378 = vmatpush.bf16.msra.mxu2 %v5808_v13 }
 0x163   :  { %v1001_v38 = vpop.f32.mrf.mxu0 }
 0x164   :  { %1311 = vmatpush.bf16.msra.mxu3 %v5896_v63  ;;  %1337 = vmatpush.bf16.msra.mxu1 %v5965_v42 }
 0x165   :  { %1399 = vmatpush.bf16.msra.mxu0 %v5614_v7  ;;  %1379 = vmatpush.bf16.msra.mxu2 %v5847_v35 }
 0x168   :  { %1312 = vmatpush.bf16.msra.mxu3 %v5928_v15  ;;  %1338 = vmatpush.bf16.msra.mxu1 %v5986_v55 }
 0x169   :  { %1400 = vmatpush.bf16.msra.mxu0 %v5635_v18  ;;  %1380 = vmatpush.bf16.msra.mxu2 %v5891_v59 }
 0x16a   :  { %4735 = vmatmul.msk.bf16.vlgmr.msrb.gmra.mxu0 %vm293_vm1, %v6377_v32  ;;  %v925_v32 = vpop.f32.mrf.mxu3 }
 0x16b   :  { %v6515_v32 = vpack.c.b16 %v1366_v58, %v1366_v58 }
 0x16c   :  { %1313 = vmatpush.bf16.msra.mxu3 %v5959_v37  ;;  %1339 = vmatpush.bf16.msra.mxu1 %v5998_v5  ;;  %v988_v52 = vpop.f32.mrf.mxu1 }
 0x16d   :  { %1401 = vmatpush.bf16.msra.mxu0 %v5683_v34  ;;  %1443 = vmatpush.bf16.msrb.mxu2 %v5748_v57  ;;  %v1028_v58 = vpop.f32.mrf.mxu2 }
 0x16e   :  { %1381 = vmatmul.bf16.vlgmr.msra.gmra.mxu2 %v6490_v6 }
 0x170   :  { %1314 = vmatpush.bf16.msra.mxu3 %v5982_v54  ;;  %1340 = vmatpush.bf16.msra.mxu1 %v6010_v10 }
 0x171   :  { %1402 = vmatpush.bf16.msra.mxu0 %v5725_v48  ;;  %1444 = vmatpush.bf16.msrb.mxu2 %v5776_v2 }
 0x172   :  { %v962_v23 = vpop.f32.mrf.mxu3 }
 0x173   :  { %1315 = vmatmul.bf16.vlgmr.msra.gmra.mxu3 %v6351_v40  ;;  %1341 = vmatmul.bf16.vlgmr.msra.gmra.mxu1 %v6351_v40  ;;  %v950_v40 = vadd.f32 %v949_v30, %v936_v31  ;;  %v924_v30 = vadd.f32 %v923_v12, %v6461_v51 }
 0x174   :  { %1391 = vmatpush.bf16.msrb.mxu3 %v5656_v25  ;;  %1417 = vmatpush.bf16.msrb.mxu1 %v5659_v26  ;;  %v990_v12 = vpop.f32.mrf.mxu1 }
 0x175   :  { %1403 = vmatpush.bf16.msra.mxu0 %v5764_v62  ;;  %1445 = vmatpush.bf16.msrb.mxu2 %v5819_v19  ;;  %v989_v11 = vadd.f32 %v988_v52, %v950_v40  ;;  %v963_v31 = vadd.f32 %v962_v23, %v924_v30  ;;  %v1003_v40 = vpop.f32.mrf.mxu0 }
 0x176   :  { %v1030_v40 = vpop.f32.mrf.mxu2 }
 0x177   :  { %v1002_v9 = vadd.f32 %v1001_v38, %v989_v11  ;;  %v976_v51 = vadd.f32 %v975_v50, %v963_v31  ;;  %v4539_v31 = vld [vmem:[%s8552_s0 + $0x50] sm:$0xff] }
 0x178   :  { %1392 = vmatpush.bf16.msrb.mxu3 %v5666_v28  ;;  %1418 = vmatpush.bf16.msrb.mxu1 %v5668_v29 }
 0x179   :  { %1491 = vmatpush.bf16.msra.mxu2 %v5603_v3  ;;  %1404 = vmatpush.bf16.msra.mxu0 %v5810_v14  ;;  %v1006_v44 = vadd.f32 %v1002_v9, %v6247_v43  ;;  %v1005_v38 = vadd.f32 %v976_v51, %v6242_v27 }
 0x17a   :  { %v964_v50 = vpop.f32.mrf.mxu3 }
 0x17b   :  { %v1008_v52 = vmax.f32 %v1006_v44, 0.0  ;;  %v1007_v11 = vmax.f32 %v1005_v38, 0.0  ;;  %v1483_v38 = vunpack.c.l.b16 %v4539_v31 }
 0x17c   :  { %1393 = vmatpush.bf16.msrb.mxu3 %v5717_v45  ;;  %1419 = vmatpush.bf16.msrb.mxu1 %v5719_v46  ;;  %v1067_v44 = vpop.f32.mrf.mxu1 }
 0x17d   :  { %1492 = vmatpush.bf16.msra.mxu2 %v5633_v17  ;;  %1405 = vmatpush.bf16.msra.mxu0 %v5849_v36  ;;  %v1009_v9 = vpack.c.bf16 %v1008_v52, %v1007_v11 }
 0x17e   :  { %4738 = vmatmul.msk.bf16.vlgmr.msrb.gmra.mxu2 %vm293_vm1, %v6444_v21  ;;  %v1093_v40 = vpop.f32.mrf.mxu2 }
 0x17f   :  { %v1054_v30 = vpop.f32.mrf.mxu0  ;;  %v2115_v23 = vunpack.c.l.b16 %v1009_v9 }
 0x180   :  { %1425 = vmatpush.bf16.msra.mxu3 %v5736_v53  ;;  %1451 = vmatpush.bf16.msra.mxu1 %v5831_v24  ;;  %v1068_v12 = vadd.f32 %v1067_v44, %v1054_v30  ;;  %v2116_v30 = vunpack.c.h.b16 %v1009_v9 }
 0x181   :  { %1493 = vmatpush.bf16.msra.mxu2 %v5681_v33  ;;  %1406 = vmatpush.bf16.msra.mxu0 %v5893_v60  ;;  %v2117_v51 = vpack.c.b16 %v2115_v23, %v2115_v23  ;;  %v6558_v23 = vpack.c.b16 %v1483_v38, %v1483_v38 }
 0x182   :  { %v1041_v52 = vpop.f32.mrf.mxu3 }
 0x183   :  { %4736 = vmatmul.msk.bf16.vlgmr.msrb.gmra.mxu3 %vm293_vm1, %v6515_v32  ;;  %4737 = vmatmul.msk.bf16.vlgmr.msrb.gmra.mxu1 %vm293_vm1, %v6515_v32  ;;  %v1042_v11 = vadd.f32 %v1041_v52, %v1028_v58 }
 0x184   :  { %1426 = vmatpush.bf16.msra.mxu3 %v5774_v1  ;;  %1452 = vmatpush.bf16.msra.mxu1 %v5873_v49  ;;  %v1069_v44 = vpop.f32.mrf.mxu1 }
 0x185   :  { %1469 = vmatpush.bf16.msrb.mxu0 %v5899_v0  ;;  %1494 = vmatpush.bf16.msra.mxu2 %v5723_v47 }
 0x186   :  { %1407 = vmatmul.bf16.vlgmr.msra.gmra.mxu0 %v6490_v6  ;;  %2119 = vrot.lane.b32.xlu2 %v2117_v51, %s5527_s3  ;;  %v1484_v51 = vunpack.c.h.b16 %v4539_v31 }
 0x187   :  { %v1056_v50 = vpop.f32.mrf.mxu0 }
 0x188   :  { %1427 = vmatpush.bf16.msra.mxu3 %v5817_v16  ;;  %1453 = vmatpush.bf16.msra.mxu1 %v5905_v4 }
 0x189   :  { %1470 = vmatpush.bf16.msrb.mxu0 %v5930_v20  ;;  %1495 = vmatpush.bf16.msra.mxu2 %v5762_v61 }
 0x18a   :  { %v1043_v58 = vpop.f32.mrf.mxu3 }
 0x18c   :  { %1428 = vmatpush.bf16.msra.mxu3 %v5861_v39  ;;  %1454 = vmatpush.bf16.msra.mxu1 %v5937_v22 }
 0x18d   :  { %1471 = vmatpush.bf16.msrb.mxu0 %v5961_v41  ;;  %1496 = vmatpush.bf16.msra.mxu2 %v5808_v13 }
 0x18f   :  { %v1119_v9 = vpop.f32.mrf.mxu0 }
 0x190   :  { %1429 = vmatpush.bf16.msra.mxu3 %v5896_v63  ;;  %1455 = vmatpush.bf16.msra.mxu1 %v5965_v42 }
 0x191   :  { %1517 = vmatpush.bf16.msra.mxu0 %v5614_v7  ;;  %1497 = vmatpush.bf16.msra.mxu2 %v5847_v35 }
 0x194   :  { %1430 = vmatpush.bf16.msra.mxu3 %v5928_v15  ;;  %1456 = vmatpush.bf16.msra.mxu1 %v5986_v55 }
 0x195   :  { %1518 = vmatpush.bf16.msra.mxu0 %v5635_v18  ;;  %1498 = vmatpush.bf16.msra.mxu2 %v5891_v59 }
 0x196   :  { %4739 = vmatmul.msk.bf16.vlgmr.msrb.gmra.mxu0 %vm293_vm1, %v6444_v21  ;;  %v2118_v21 = vpack.c.b16 %v2116_v30, %v2116_v30  ;;  %v6582_v30 = vpack.c.b16 %v1484_v51, %v1484_v51 }
 0x197   :  { %v1121_v50 = vpop.f32.mrf.mxu0 }
 0x198   :  { %1431 = vmatpush.bf16.msra.mxu3 %v5959_v37  ;;  %1457 = vmatpush.bf16.msra.mxu1 %v5998_v5  ;;  %v1106_v38 = vpop.f32.mrf.mxu1 }
 0x199   :  { %1519 = vmatpush.bf16.msra.mxu0 %v5683_v34  ;;  %1561 = vmatpush.bf16.msrb.mxu2 %v5748_v57  ;;  %v1107_v52 = vadd.f32 %v1106_v38, %v1068_v12 }
 0x19a   :  { %1499 = vmatmul.bf16.vlgmr.msra.gmra.mxu2 %v6558_v23  ;;  %2121 = vrot.lane.b32.xlu2 %v2118_v21, %s5527_s3 }
 0x19b   :  { %v1120_v44 = vadd.f32 %v1119_v9, %v1107_v52 }
 0x19c   :  { %1432 = vmatpush.bf16.msra.mxu3 %v5982_v54  ;;  %1458 = vmatpush.bf16.msra.mxu1 %v6010_v10 }
 0x19d   :  { %1520 = vmatpush.bf16.msra.mxu0 %v5725_v48  ;;  %1562 = vmatpush.bf16.msrb.mxu2 %v5776_v2  ;;  %v1124_v12 = vadd.f32 %v1120_v44, %v6247_v43 }
 0x19e   :  { %v1080_v21 = vpop.f32.mrf.mxu3 }
 0x19f   :  { %1433 = vmatmul.bf16.vlgmr.msra.gmra.mxu3 %v6416_v56  ;;  %1459 = vmatmul.bf16.vlgmr.msra.gmra.mxu1 %v6416_v56  ;;  %v1095_v56 = vpop.f32.mrf.mxu2  ;;  %v1081_v58 = vadd.f32 %v1080_v21, %v1042_v11  ;;  %v1126_v51 = vmax.f32 %v1124_v12, 0.0 }
 0x1a0   :  { %1509 = vmatpush.bf16.msrb.mxu3 %v5656_v25  ;;  %1535 = vmatpush.bf16.msrb.mxu1 %v5659_v26  ;;  %v1108_v56 = vpop.f32.mrf.mxu1 }
 0x1a1   :  { %1521 = vmatpush.bf16.msra.mxu0 %v5764_v62  ;;  %1563 = vmatpush.bf16.msrb.mxu2 %v5819_v19  ;;  %v1094_v9 = vadd.f32 %v1093_v40, %v1081_v58  ;;  %v4540_v58 = vld [vmem:[%s8552_s0 + $0x58] sm:$0xff] }
 0x1a2   :  { %v1601_v12 = vunpack.c.l.b16 %v4540_v58 }
 0x1a3   :  { %v1123_v11 = vadd.f32 %v1094_v9, %v6242_v27 }
 0x1a4   :  { %1510 = vmatpush.bf16.msrb.mxu3 %v5666_v28  ;;  %1536 = vmatpush.bf16.msrb.mxu1 %v5668_v29 }
 0x1a5   :  { %1609 = vmatpush.bf16.msra.mxu2 %v5603_v3  ;;  %1522 = vmatpush.bf16.msra.mxu0 %v5810_v14  ;;  %v1125_v38 = vmax.f32 %v1123_v11, 0.0 }
 0x1a6   :  { %v1082_v40 = vpop.f32.mrf.mxu3 }
 0x1a7   :  { %v6587_v31 = vpop.f32.mrf.mxu2  ;;  %v6608_v50 = vpack.c.bf16 %v1126_v51, %v1125_v38  ;;  %v6627_v51 = vpack.c.b16 %v1601_v12, %v1601_v12  ;;  %v1602_v12 = vunpack.c.h.b16 %v4540_v58 }
 0x1a8   :  { %1511 = vmatpush.bf16.msrb.mxu3 %v5717_v45  ;;  %1537 = vmatpush.bf16.msrb.mxu1 %v5719_v46  ;;  %v1185_v21 = vpop.f32.mrf.mxu1 }
 0x1a9   :  { %1610 = vmatpush.bf16.msra.mxu2 %v5633_v17  ;;  %1523 = vmatpush.bf16.msra.mxu0 %v5849_v36  ;;  %8748 = vst [vmem:[#allocation4_spill] sm:$0xff] %v6608_v50 }
 0x1aa   :  { %4742 = vmatmul.msk.bf16.vlgmr.msrb.gmra.mxu2 %vm293_vm1, %v6515_v32 }
 0x1ab   :  { %v1172_v44 = vpop.f32.mrf.mxu0 }
 0x1ac   :  { %1543 = vmatpush.bf16.msra.mxu3 %v5736_v53  ;;  %1569 = vmatpush.bf16.msra.mxu1 %v5831_v24 }
 0x1ad   :  { %1611 = vmatpush.bf16.msra.mxu2 %v5681_v33  ;;  %1524 = vmatpush.bf16.msra.mxu0 %v5893_v60 }
 0x1ae   :  { %v1159_v9 = vpop.f32.mrf.mxu3 }
 0x1af   :  { %4740 = vmatmul.msk.bf16.vlgmr.msrb.gmra.mxu3 %vm293_vm1, %v6582_v30  ;;  %4741 = vmatmul.msk.bf16.vlgmr.msrb.gmra.mxu1 %vm293_vm1, %v6582_v30  ;;  %v1148_v52 = vpop.f32.mrf.mxu2 }
 0x1b0   :  { %1544 = vmatpush.bf16.msra.mxu3 %v5774_v1  ;;  %1570 = vmatpush.bf16.msra.mxu1 %v5873_v49  ;;  %v1187_v38 = vpop.f32.mrf.mxu1 }
 0x1b1   :  { %1587 = vmatpush.bf16.msrb.mxu0 %v5899_v0  ;;  %1612 = vmatpush.bf16.msra.mxu2 %v5723_v47 }
 0x1b2   :  { %1525 = vmatmul.bf16.vlgmr.msra.gmra.mxu0 %v6558_v23 }
 0x1b3   :  { %v1174_v56 = vpop.f32.mrf.mxu0 }
 0x1b4   :  { %1545 = vmatpush.bf16.msra.mxu3 %v5817_v16  ;;  %1571 = vmatpush.bf16.msra.mxu1 %v5905_v4 }
 0x1b5   :  { %1588 = vmatpush.bf16.msrb.mxu0 %v5930_v20  ;;  %1613 = vmatpush.bf16.msra.mxu2 %v5762_v61 }
 0x1b7   :  { %v1211_v11 = vpop.f32.mrf.mxu2 }
 0x1b8   :  { %1546 = vmatpush.bf16.msra.mxu3 %v5861_v39  ;;  %1572 = vmatpush.bf16.msra.mxu1 %v5937_v22 }
 0x1b9   :  { %1589 = vmatpush.bf16.msrb.mxu0 %v5961_v41  ;;  %1614 = vmatpush.bf16.msra.mxu2 %v5808_v13 }
 0x1bb   :  { %v1237_v40 = vpop.f32.mrf.mxu0 }
 0x1bc   :  { %1547 = vmatpush.bf16.msra.mxu3 %v5896_v63  ;;  %1573 = vmatpush.bf16.msra.mxu1 %v5965_v42 }
 0x1bd   :  { %1635 = vmatpush.bf16.msra.mxu0 %v5614_v7  ;;  %1615 = vmatpush.bf16.msra.mxu2 %v5847_v35 }
 0x1bf   :  { %v1213_v52 = vpop.f32.mrf.mxu2 }
 0x1c0   :  { %1548 = vmatpush.bf16.msra.mxu3 %v5928_v15  ;;  %1574 = vmatpush.bf16.msra.mxu1 %v5986_v55  ;;  %v6652_v52 = vpack.c.b16 %v1602_v12, %v1602_v12 }
 0x1c1   :  { %1636 = vmatpush.bf16.msra.mxu0 %v5635_v18  ;;  %1616 = vmatpush.bf16.msra.mxu2 %v5891_v59 }
 0x1c2   :  { %4743 = vmatmul.msk.bf16.vlgmr.msrb.gmra.mxu0 %vm293_vm1, %v6515_v32  ;;  %v1161_v32 = vpop.f32.mrf.mxu3 }
 0x1c3   :  { %v1239_v32 = vpop.f32.mrf.mxu0 }
 0x1c4   :  { %1549 = vmatpush.bf16.msra.mxu3 %v5959_v37  ;;  %1575 = vmatpush.bf16.msra.mxu1 %v5998_v5  ;;  %v1224_v56 = vpop.f32.mrf.mxu1 }
 0x1c5   :  { %1637 = vmatpush.bf16.msra.mxu0 %v5683_v34  ;;  %1679 = vmatpush.bf16.msrb.mxu2 %v5748_v57 }
 0x1c6   :  { %1617 = vmatmul.bf16.vlgmr.msra.gmra.mxu2 %v6627_v51 }
 0x1c7   :  { %v1264_v50 = vpop.f32.mrf.mxu2 }
 0x1c8   :  { %1550 = vmatpush.bf16.msra.mxu3 %v5982_v54  ;;  %1576 = vmatpush.bf16.msra.mxu1 %v6010_v10 }
 0x1c9   :  { %1638 = vmatpush.bf16.msra.mxu0 %v5725_v48  ;;  %1680 = vmatpush.bf16.msrb.mxu2 %v5776_v2 }
 0x1ca   :  { %v1198_v58 = vpop.f32.mrf.mxu3 }
 0x1cb   :  { %1551 = vmatmul.bf16.vlgmr.msra.gmra.mxu3 %v6490_v6  ;;  %1577 = vmatmul.bf16.vlgmr.msra.gmra.mxu1 %v6490_v6  ;;  %v1186_v6 = vadd.f32 %v1185_v21, %v1172_v44  ;;  %v1160_v21 = vadd.f32 %v1159_v9, %v6587_v31 }
 0x1cc   :  { %1627 = vmatpush.bf16.msrb.mxu3 %v5656_v25  ;;  %1653 = vmatpush.bf16.msrb.mxu1 %v5659_v26  ;;  %v1226_v9 = vpop.f32.mrf.mxu1 }
 0x1cd   :  { %1639 = vmatpush.bf16.msra.mxu0 %v5764_v62  ;;  %1681 = vmatpush.bf16.msrb.mxu2 %v5819_v19  ;;  %v1225_v38 = vadd.f32 %v1224_v56, %v1186_v6  ;;  %v1199_v8 = vadd.f32 %v1198_v58, %v1160_v21 }
 0x1cf   :  { %v1238_v44 = vadd.f32 %v1237_v40, %v1225_v38  ;;  %v1212_v31 = vadd.f32 %v1211_v11, %v1199_v8  ;;  %v1266_v8 = vpop.f32.mrf.mxu2 }
 0x1d0   :  { %1628 = vmatpush.bf16.msrb.mxu3 %v5666_v28  ;;  %1654 = vmatpush.bf16.msrb.mxu1 %v5668_v29 }
 0x1d1   :  { %1727 = vmatpush.bf16.msra.mxu2 %v5603_v3  ;;  %1640 = vmatpush.bf16.msra.mxu0 %v5810_v14  ;;  %v1242_v6 = vadd.f32 %v1238_v44, %v6247_v43  ;;  %v1241_v40 = vadd.f32 %v1212_v31, %v6242_v27 }
 0x1d2   :  { %v1200_v11 = vpop.f32.mrf.mxu3 }
 0x1d3   :  { %v1244_v12 = vmax.f32 %v1242_v6, 0.0  ;;  %v1243_v56 = vmax.f32 %v1241_v40, 0.0  ;;  %v4541_v40 = vld [vmem:[%s8552_s0 + $0x60] sm:$0xff] }
 0x1d4   :  { %1629 = vmatpush.bf16.msrb.mxu3 %v5717_v45  ;;  %1655 = vmatpush.bf16.msrb.mxu1 %v5719_v46  ;;  %v1303_v58 = vpop.f32.mrf.mxu1 }
 0x1d5   :  { %1728 = vmatpush.bf16.msra.mxu2 %v5633_v17  ;;  %1641 = vmatpush.bf16.msra.mxu0 %v5849_v36  ;;  %v1245_v38 = vpack.c.bf16 %v1244_v12, %v1243_v56  ;;  %v1719_v56 = vunpack.c.l.b16 %v4541_v40 }
 0x1d6   :  { %4746 = vmatmul.msk.bf16.vlgmr.msrb.gmra.mxu2 %vm293_vm1, %v6582_v30 }
 0x1d7   :  { %v2135_v32 = vunpack.c.l.b16 %v1245_v38  ;;  %v2136_v44 = vunpack.c.h.b16 %v1245_v38  ;;  %v1290_v21 = vpop.f32.mrf.mxu0  ;;  %v1329_v11 = vpop.f32.mrf.mxu2 }
 0x1d8   :  { %1661 = vmatpush.bf16.msra.mxu3 %v5736_v53  ;;  %1687 = vmatpush.bf16.msra.mxu1 %v5831_v24  ;;  %v1304_v9 = vadd.f32 %v1303_v58, %v1290_v21 }
 0x1d9   :  { %1729 = vmatpush.bf16.msra.mxu2 %v5681_v33  ;;  %1642 = vmatpush.bf16.msra.mxu0 %v5893_v60  ;;  %v2137_v6 = vpack.c.b16 %v2135_v32, %v2135_v32  ;;  %v2138_v31 = vpack.c.b16 %v2136_v44, %v2136_v44  ;;  %v6696_v32 = vpack.c.b16 %v1719_v56, %v1719_v56 }
 0x1da   :  { %v1277_v12 = vpop.f32.mrf.mxu3 }
 0x1db   :  { %4744 = vmatmul.msk.bf16.vlgmr.msrb.gmra.mxu3 %vm293_vm1, %v6652_v52  ;;  %4745 = vmatmul.msk.bf16.vlgmr.msrb.gmra.mxu1 %vm293_vm1, %v6652_v52  ;;  %v1278_v8 = vadd.f32 %v1277_v12, %v1264_v50 }
 0x1dc   :  { %1662 = vmatpush.bf16.msra.mxu3 %v5774_v1  ;;  %1688 = vmatpush.bf16.msra.mxu1 %v5873_v49  ;;  %v1305_v44 = vpop.f32.mrf.mxu1 }
 0x1dd   :  { %1705 = vmatpush.bf16.msrb.mxu0 %v5899_v0  ;;  %1730 = vmatpush.bf16.msra.mxu2 %v5723_v47 }
 0x1de   :  { %1643 = vmatmul.bf16.vlgmr.msra.gmra.mxu0 %v6627_v51  ;;  %2139 = vrot.lane.b32.xlu0 %v2137_v6, %s5527_s3 }
 0x1df   :  { %2141 = vrot.lane.b32.xlu1 %v2138_v31, %s5527_s3  ;;  %v1292_v38 = vpop.f32.mrf.mxu0  ;;  %v1331_v50 = vpop.f32.mrf.mxu2 }
 0x1e0   :  { %1663 = vmatpush.bf16.msra.mxu3 %v5817_v16  ;;  %1689 = vmatpush.bf16.msra.mxu1 %v5905_v4 }
 0x1e1   :  { %1706 = vmatpush.bf16.msrb.mxu0 %v5930_v20  ;;  %1731 = vmatpush.bf16.msra.mxu2 %v5762_v61 }
 0x1e4   :  { %1664 = vmatpush.bf16.msra.mxu3 %v5861_v39  ;;  %1690 = vmatpush.bf16.msra.mxu1 %v5937_v22 }
 0x1e5   :  { %1707 = vmatpush.bf16.msrb.mxu0 %v5961_v41  ;;  %1732 = vmatpush.bf16.msra.mxu2 %v5808_v13 }
 0x1e7   :  { %v1355_v21 = vpop.f32.mrf.mxu0 }
 0x1e8   :  { %1665 = vmatpush.bf16.msra.mxu3 %v5896_v63  ;;  %1691 = vmatpush.bf16.msra.mxu1 %v5965_v42 }
 0x1e9   :  { %1753 = vmatpush.bf16.msra.mxu0 %v5614_v7  ;;  %1733 = vmatpush.bf16.msra.mxu2 %v5847_v35 }
 0x1ec   :  { %1666 = vmatpush.bf16.msra.mxu3 %v5928_v15  ;;  %1692 = vmatpush.bf16.msra.mxu1 %v5986_v55 }
 0x1ed   :  { %1754 = vmatpush.bf16.msra.mxu0 %v5635_v18  ;;  %1734 = vmatpush.bf16.msra.mxu2 %v5891_v59 }
 0x1ee   :  { %4747 = vmatmul.msk.bf16.vlgmr.msrb.gmra.mxu0 %vm293_vm1, %v6582_v30  ;;  %v1279_v30 = vpop.f32.mrf.mxu3 }
 0x1ef   :  { %v1357_v31 = vpop.f32.mrf.mxu0 }
 0x1f0   :  { %1667 = vmatpush.bf16.msra.mxu3 %v5959_v37  ;;  %1693 = vmatpush.bf16.msra.mxu1 %v5998_v5  ;;  %v1342_v58 = vpop.f32.mrf.mxu1 }
 0x1f1   :  { %1755 = vmatpush.bf16.msra.mxu0 %v5683_v34  ;;  %1797 = vmatpush.bf16.msrb.mxu2 %v5748_v57  ;;  %v1343_v6 = vadd.f32 %v1342_v58, %v1304_v9  ;;  %v6727_v44 = vpop.f32.mrf.mxu2 }
 0x1f2   :  { %1735 = vmatmul.bf16.vlgmr.msra.gmra.mxu2 %v6696_v32 }
 0x1f3   :  { %v1356_v56 = vadd.f32 %v1355_v21, %v1343_v6 }
 0x1f4   :  { %1668 = vmatpush.bf16.msra.mxu3 %v5982_v54  ;;  %1694 = vmatpush.bf16.msra.mxu1 %v6010_v10 }
 0x1f5   :  { %1756 = vmatpush.bf16.msra.mxu0 %v5725_v48  ;;  %1798 = vmatpush.bf16.msrb.mxu2 %v5776_v2  ;;  %v1360_v9 = vadd.f32 %v1356_v56, %v6247_v43 }
 0x1f6   :  { %v1316_v38 = vpop.f32.mrf.mxu3 }
 0x1f7   :  { %1669 = vmatmul.bf16.vlgmr.msra.gmra.mxu3 %v6558_v23  ;;  %1695 = vmatmul.bf16.vlgmr.msra.gmra.mxu1 %v6558_v23  ;;  %v1720_v23 = vunpack.c.h.b16 %v4541_v40  ;;  %v1317_v40 = vadd.f32 %v1316_v38, %v1278_v8  ;;  %v1362_v21 = vmax.f32 %v1360_v9, 0.0  ;;  %v4542_v38 = vld [vmem:[%s8552_s0 + $0x68] sm:$0xff] }
 0x1f8   :  { %1745 = vmatpush.bf16.msrb.mxu3 %v5656_v25  ;;  %1771 = vmatpush.bf16.msrb.mxu1 %v5659_v26  ;;  %v1344_v50 = vpop.f32.mrf.mxu1 }
 0x1f9   :  { %1757 = vmatpush.bf16.msra.mxu0 %v5764_v62  ;;  %1799 = vmatpush.bf16.msrb.mxu2 %v5819_v19  ;;  %v6720_v12 = vpack.c.b16 %v1720_v23, %v1720_v23  ;;  %v1330_v30 = vadd.f32 %v1329_v11, %v1317_v40  ;;  %v1384_v6 = vpop.f32.mrf.mxu2  ;;  %v1837_v40 = vunpack.c.l.b16 %v4542_v38 }
 0x1fb   :  { %v1359_v8 = vadd.f32 %v1330_v30, %v6242_v27  ;;  %v6764_v50 = vpack.c.b16 %v1837_v40, %v1837_v40 }
 0x1fc   :  { %1746 = vmatpush.bf16.msrb.mxu3 %v5666_v28  ;;  %1772 = vmatpush.bf16.msrb.mxu1 %v5668_v29 }
 0x1fd   :  { %1845 = vmatpush.bf16.msra.mxu2 %v5603_v3  ;;  %1758 = vmatpush.bf16.msra.mxu0 %v5810_v14  ;;  %v1361_v11 = vmax.f32 %v1359_v8, 0.0 }
 0x1fe   :  { %v1318_v23 = vpop.f32.mrf.mxu3 }
 0x1ff   :  { %v6743_v58 = vpack.c.bf16 %v1362_v21, %v1361_v11 }
 0x200   :  { %1747 = vmatpush.bf16.msrb.mxu3 %v5717_v45  ;;  %1773 = vmatpush.bf16.msrb.mxu1 %v5719_v46  ;;  %v1421_v56 = vpop.f32.mrf.mxu1 }
 0x201   :  { %1846 = vmatpush.bf16.msra.mxu2 %v5633_v17  ;;  %1759 = vmatpush.bf16.msra.mxu0 %v5849_v36  ;;  %8749 = vst [vmem:[#allocation5_spill] sm:$0xff] %v6743_v58  ;;  %v1447_v30 = vpop.f32.mrf.mxu2 }
 0x202   :  { %4750 = vmatmul.msk.bf16.vlgmr.msrb.gmra.mxu2 %vm293_vm1, %v6652_v52 }
 0x203   :  { %v1408_v31 = vpop.f32.mrf.mxu0 }
 0x204   :  { %1779 = vmatpush.bf16.msra.mxu3 %v5736_v53  ;;  %1805 = vmatpush.bf16.msra.mxu1 %v5831_v24  ;;  %v1422_v6 = vadd.f32 %v1421_v56, %v1408_v31 }
 0x205   :  { %1847 = vmatpush.bf16.msra.mxu2 %v5681_v33  ;;  %1760 = vmatpush.bf16.msra.mxu0 %v5893_v60 }
 0x206   :  { %v1395_v9 = vpop.f32.mrf.mxu3 }
 0x207   :  { %4748 = vmatmul.msk.bf16.vlgmr.msrb.gmra.mxu3 %vm293_vm1, %v6720_v12  ;;  %4749 = vmatmul.msk.bf16.vlgmr.msrb.gmra.mxu1 %vm293_vm1, %v6720_v12 }
 0x208   :  { %1780 = vmatpush.bf16.msra.mxu3 %v5774_v1  ;;  %1806 = vmatpush.bf16.msra.mxu1 %v5873_v49  ;;  %v1423_v21 = vpop.f32.mrf.mxu1 }
 0x209   :  { %1823 = vmatpush.bf16.msrb.mxu0 %v5899_v0  ;;  %1848 = vmatpush.bf16.msra.mxu2 %v5723_v47  ;;  %v1449_v11 = vpop.f32.mrf.mxu2  ;;  %v1396_v21 = vadd.f32 %v1395_v9, %v6727_v44 }
 0x20a   :  { %1761 = vmatmul.bf16.vlgmr.msra.gmra.mxu0 %v6696_v32 }
 0x20b   :  { %v1410_v8 = vpop.f32.mrf.mxu0 }
 0x20c   :  { %1781 = vmatpush.bf16.msra.mxu3 %v5817_v16  ;;  %1807 = vmatpush.bf16.msra.mxu1 %v5905_v4 }
 0x20d   :  { %1824 = vmatpush.bf16.msrb.mxu0 %v5930_v20  ;;  %1849 = vmatpush.bf16.msra.mxu2 %v5762_v61 }
 0x210   :  { %1782 = vmatpush.bf16.msra.mxu3 %v5861_v39  ;;  %1808 = vmatpush.bf16.msra.mxu1 %v5937_v22 }
 0x211   :  { %1825 = vmatpush.bf16.msrb.mxu0 %v5961_v41  ;;  %1850 = vmatpush.bf16.msra.mxu2 %v5808_v13 }
 0x213   :  { %v1473_v23 = vpop.f32.mrf.mxu0 }
 0x214   :  { %1783 = vmatpush.bf16.msra.mxu3 %v5896_v63  ;;  %1809 = vmatpush.bf16.msra.mxu1 %v5965_v42 }
 0x215   :  { %1871 = vmatpush.bf16.msra.mxu0 %v5614_v7  ;;  %1851 = vmatpush.bf16.msra.mxu2 %v5847_v35 }
 0x218   :  { %1784 = vmatpush.bf16.msra.mxu3 %v5928_v15  ;;  %1810 = vmatpush.bf16.msra.mxu1 %v5986_v55 }
 0x219   :  { %1872 = vmatpush.bf16.msra.mxu0 %v5635_v18  ;;  %1852 = vmatpush.bf16.msra.mxu2 %v5891_v59 }
 0x21a   :  { %4751 = vmatmul.msk.bf16.vlgmr.msrb.gmra.mxu0 %vm293_vm1, %v6652_v52  ;;  %v1397_v52 = vpop.f32.mrf.mxu3 }
 0x21b   :  { %v1475_v56 = vpop.f32.mrf.mxu0 }
 0x21c   :  { %1785 = vmatpush.bf16.msra.mxu3 %v5959_v37  ;;  %1811 = vmatpush.bf16.msra.mxu1 %v5998_v5  ;;  %v1460_v40 = vpop.f32.mrf.mxu1  ;;  %v6820_v56 = vld [vmem:[%s8552_s0 + $0x70] sm:$0xff] }
 0x21d   :  { %1873 = vmatpush.bf16.msra.mxu0 %v5683_v34  ;;  %1915 = vmatpush.bf16.msrb.mxu2 %v5748_v57  ;;  %v1461_v8 = vadd.f32 %v1460_v40, %v1422_v6  ;;  %v1500_v52 = vpop.f32.mrf.mxu2 }
 0x21e   :  { %1853 = vmatmul.bf16.vlgmr.msra.gmra.mxu2 %v6764_v50 }
 0x220   :  { %1786 = vmatpush.bf16.msra.mxu3 %v5982_v54  ;;  %1812 = vmatpush.bf16.msra.mxu1 %v6010_v10 }
 0x221   :  { %1874 = vmatpush.bf16.msra.mxu0 %v5725_v48  ;;  %1916 = vmatpush.bf16.msrb.mxu2 %v5776_v2 }
 0x223   :  { %1787 = vmatmul.bf16.vlgmr.msra.gmra.mxu3 %v6627_v51  ;;  %1813 = vmatmul.bf16.vlgmr.msra.gmra.mxu1 %v6627_v51  ;;  %v1838_v51 = vunpack.c.h.b16 %v4542_v38 }
 0x224   :  { %1863 = vmatpush.bf16.msrb.mxu3 %v5656_v25  ;;  %1889 = vmatpush.bf16.msrb.mxu1 %v5659_v26  ;;  %v1462_v44 = vpop.f32.mrf.mxu1 }
 0x225   :  { %1875 = vmatpush.bf16.msra.mxu0 %v5764_v62  ;;  %1917 = vmatpush.bf16.msrb.mxu2 %v5819_v19  ;;  %v6789_v31 = vpack.c.b16 %v1838_v51, %v1838_v51  ;;  %v1502_v51 = vpop.f32.mrf.mxu2  ;;  %v4810_v44 = vld [vmem:[%s8554_s5 + $0x60] sm:$0xf] }
 0x228   :  { %1864 = vmatpush.bf16.msrb.mxu3 %v5666_v28  ;;  %1890 = vmatpush.bf16.msrb.mxu1 %v5668_v29 }
 0x229   :  { %1963 = vmatpush.bf16.msra.mxu2 %v5603_v3  ;;  %1876 = vmatpush.bf16.msra.mxu0 %v5810_v14  ;;  %v1474_v3 = vadd.f32 %v1473_v23, %v1461_v8 }
 0x22c   :  { %1865 = vmatpush.bf16.msrb.mxu3 %v5717_v45  ;;  %1891 = vmatpush.bf16.msrb.mxu1 %v5719_v46 }
 0x22d   :  { %1964 = vmatpush.bf16.msra.mxu2 %v5633_v17  ;;  %1877 = vmatpush.bf16.msra.mxu0 %v5849_v36  ;;  %v1434_v17 = vpop.f32.mrf.mxu3 }
 0x22e   :  { %v1435_v38 = vadd.f32 %v1434_v17, %v1396_v21  ;;  %4754 = vmatmul.msk.bf16.vlgmr.msrb.gmra.mxu2 %vm293_vm1, %v6720_v12 }
 0x230   :  { %1897 = vmatpush.bf16.msra.mxu3 %v5736_v53  ;;  %1923 = vmatpush.bf16.msra.mxu1 %v5831_v24  ;;  %v1448_v9 = vadd.f32 %v1447_v30, %v1435_v38 }
 0x231   :  { %1965 = vmatpush.bf16.msra.mxu2 %v5681_v33  ;;  %1878 = vmatpush.bf16.msra.mxu0 %v5893_v60  ;;  %v1478_v33 = vadd.f32 %v1474_v3, %v6247_v43  ;;  %v1526_v3 = vpop.f32.mrf.mxu0 }
 0x233   :  { %4752 = vmatmul.msk.bf16.vlgmr.msrb.gmra.mxu3 %vm293_vm1, %v6789_v31  ;;  %4753 = vmatmul.msk.bf16.vlgmr.msrb.gmra.mxu1 %vm293_vm1, %v6789_v31  ;;  %v1480_v11 = vmax.f32 %v1478_v33, 0.0  ;;  %v6836_v33 = vpop.f32.mrf.mxu2 }
 0x234   :  { %1898 = vmatpush.bf16.msra.mxu3 %v5774_v1  ;;  %1924 = vmatpush.bf16.msra.mxu1 %v5873_v49 }
 0x235   :  { %1941 = vmatpush.bf16.msrb.mxu0 %v5899_v0  ;;  %1966 = vmatpush.bf16.msra.mxu2 %v5723_v47  ;;  %v1477_v47 = vadd.f32 %v1448_v9, %v6242_v27  ;;  %v1436_v30 = vpop.f32.mrf.mxu3 }
 0x236   :  { %1879 = vmatmul.bf16.vlgmr.msra.gmra.mxu0 %v6764_v50 }
 0x237   :  { %v1479_v23 = vmax.f32 %v1477_v47, 0.0 }
 0x238   :  { %1899 = vmatpush.bf16.msra.mxu3 %v5817_v16  ;;  %1925 = vmatpush.bf16.msra.mxu1 %v5905_v4 }
 0x239   :  { %1942 = vmatpush.bf16.msrb.mxu0 %v5930_v20  ;;  %1967 = vmatpush.bf16.msra.mxu2 %v5762_v61  ;;  %v1481_v6 = vpack.c.bf16 %v1480_v11, %v1479_v23  ;;  %v1539_v61 = vpop.f32.mrf.mxu1  ;;  %v4786_v11 = vld [vmem:[%s8554_s5 + $0x30] sm:$0xf] }
 0x23a   :  { %v1540_v17 = vadd.f32 %v1539_v61, %v1526_v3 }
 0x23b   :  { %v2155_v40 = vunpack.c.l.b16 %v1481_v6  ;;  %v2156_v8 = vunpack.c.h.b16 %v1481_v6 }
 0x23c   :  { %1900 = vmatpush.bf16.msra.mxu3 %v5861_v39  ;;  %1926 = vmatpush.bf16.msra.mxu1 %v5937_v22 }
 0x23d   :  { %1943 = vmatpush.bf16.msrb.mxu0 %v5961_v41  ;;  %1968 = vmatpush.bf16.msra.mxu2 %v5808_v13  ;;  %v2157_v21 = vpack.c.b16 %v2155_v40, %v2155_v40  ;;  %v2158_v13 = vpack.c.b16 %v2156_v8, %v2156_v8  ;;  %v1513_v38 = vpop.f32.mrf.mxu3 }
 0x23f   :  { %2159 = vrot.lane.b32.xlu2 %v2157_v21, %s5527_s3  ;;  %2161 = vrot.lane.b32.xlu0 %v2158_v13, %s5527_s3  ;;  %v4770_v13 = vld [vmem:[%s8554_s5 + $0x10] sm:$0xf] }
 0x240   :  { %1901 = vmatpush.bf16.msra.mxu3 %v5896_v63  ;;  %1927 = vmatpush.bf16.msra.mxu1 %v5965_v42 }
 0x241   :  { %1989 = vmatpush.bf16.msra.mxu0 %v5614_v7  ;;  %1969 = vmatpush.bf16.msra.mxu2 %v5847_v35  ;;  %v1955_v7 = vunpack.c.l.b16 %v6820_v56  ;;  %v1514_v35 = vadd.f32 %v1513_v38, %v1500_v52  ;;  %v1528_v52 = vpop.f32.mrf.mxu0 }
 0x244   :  { %1902 = vmatpush.bf16.msra.mxu3 %v5928_v15  ;;  %1928 = vmatpush.bf16.msra.mxu1 %v5986_v55 }
 0x245   :  { %1990 = vmatpush.bf16.msra.mxu0 %v5635_v18  ;;  %1970 = vmatpush.bf16.msra.mxu2 %v5891_v59  ;;  %v6834_v18 = vpack.c.b16 %v1955_v7, %v1955_v7  ;;  %v4818_v59 = vld [vmem:[%s8554_s5 + $0x70] sm:$0xf] }
 0x246   :  { %4755 = vmatmul.msk.bf16.vlgmr.msrb.gmra.mxu0 %vm293_vm1, %v6720_v12 }
 0x248   :  { %1903 = vmatpush.bf16.msra.mxu3 %v5959_v37  ;;  %1929 = vmatpush.bf16.msra.mxu1 %v5998_v5 }
 0x249   :  { %1991 = vmatpush.bf16.msra.mxu0 %v5683_v34  ;;  %2033 = vmatpush.bf16.msrb.mxu2 %v5748_v57  ;;  %v5430_v34 = vld [vmem:[%s8554_s5 + $0x74] sm:$0xf0]  ;;  %v1541_v57 = vpop.f32.mrf.mxu1  ;;  %v1591_v9 = vpop.f32.mrf.mxu0 }
 0x24a   :  { %1971 = vmatmul.bf16.vlgmr.msra.gmra.mxu2 %v6834_v18  ;;  %v6852_v12 = vor.u32 %v5430_v34, %v4818_v59  ;;  %v4762_v59 = vld [vmem:[%s8554_s5] sm:$0xf]  ;;  %v5416_v34 = vld [vmem:[%s8554_s5 + $0x4] sm:$0xf0] }
 0x24c   :  { %1904 = vmatpush.bf16.msra.mxu3 %v5982_v54  ;;  %1930 = vmatpush.bf16.msra.mxu1 %v6010_v10  ;;  %8750 = vst [vmem:[#allocation6_spill] sm:$0xff] %v6852_v12 }
 0x24d   :  { %1992 = vmatpush.bf16.msra.mxu0 %v5725_v48  ;;  %2034 = vmatpush.bf16.msrb.mxu2 %v5776_v2  ;;  %v1567_v2 = vpop.f32.mrf.mxu2 }
 0x24f   :  { %1905 = vmatmul.bf16.vlgmr.msra.gmra.mxu3 %v6696_v32  ;;  %1931 = vmatmul.bf16.vlgmr.msra.gmra.mxu1 %v6696_v32  ;;  %v4802_v32 = vld [vmem:[%s8554_s5 + $0x50] sm:$0xf] }
 0x250   :  { %1981 = vmatpush.bf16.msrb.mxu3 %v5656_v25  ;;  %2007 = vmatpush.bf16.msrb.mxu1 %v5659_v26  ;;  %v5428_v25 = vld [vmem:[%s8554_s5 + $0x64] sm:$0xf0]  ;;  %v1515_v26 = vpop.f32.mrf.mxu3 }
 0x251   :  { %1993 = vmatpush.bf16.msra.mxu0 %v5764_v62  ;;  %2035 = vmatpush.bf16.msrb.mxu2 %v5819_v19  ;;  %v6866_v48 = vor.u32 %v5428_v25, %v4810_v44  ;;  %v4794_v62 = vld [vmem:[%s8554_s5 + $0x40] sm:$0xf]  ;;  %v1578_v19 = vpop.f32.mrf.mxu1  ;;  %v4884_v44 = vld [vmem:[%s8554_s5 + $0xf8] sm:$0xf0]  ;;  %v6976_v25 = vor.u32 %v5416_v34, %v4762_v59  ;;  %v5439_v34 = vld [vmem:[%s8554_s5 + $0xc4] sm:$0xf] }
 0x253   :  { %8751 = vst [vmem:[#allocation7_spill] sm:$0xff] %v6866_v48 }
 0x254   :  { %1982 = vmatpush.bf16.msrb.mxu3 %v5666_v28  ;;  %2008 = vmatpush.bf16.msrb.mxu1 %v5668_v29  ;;  %v5426_v28 = vld [vmem:[%s8554_s5 + $0x54] sm:$0xf0]  ;;  %8760 = vst [vmem:[#allocation16_spill] sm:$0xff] %v6976_v25 }
 0x255   :  { %2402 = vmatpush.bf16.msra.mxu2 %v6852_v12  ;;  %1994 = vmatpush.bf16.msra.mxu0 %v5810_v14  ;;  %v6880_v29 = vor.u32 %v5426_v28, %v4802_v32  ;;  %v6911_v8 = vpop.f32.mrf.mxu2  ;;  %v5429_v32 = vld [vmem:[%s8554_s5 + $0x74] sm:$0xf]  ;;  %v4820_v28 = vld [vmem:[%s8554_s5 + $0x78] sm:$0xf0] }
 0x257   :  { %8752 = vst [vmem:[#allocation8_spill] sm:$0xff] %v6880_v29 }
 0x258   :  { %1983 = vmatpush.bf16.msrb.mxu3 %v5717_v45  ;;  %2009 = vmatpush.bf16.msrb.mxu1 %v5719_v46  ;;  %v5424_v45 = vld [vmem:[%s8554_s5 + $0x44] sm:$0xf0]  ;;  %v1956_v46 = vunpack.c.h.b16 %v6820_v56 }
 0x259   :  { %2403 = vmatpush.bf16.msra.mxu2 %v6866_v48  ;;  %1995 = vmatpush.bf16.msra.mxu0 %v5849_v36  ;;  %v6893_v14 = vor.u32 %v5424_v45, %v4794_v62  ;;  %v1593_v36 = vpop.f32.mrf.mxu0  ;;  %v1580_v61 = vpop.f32.mrf.mxu1 }
 0x25a   :  { %v1958_v23 = vpack.c.b16 %v1956_v46, %v1956_v46  ;;  %4758 = vmatmul.msk.bf16.vlgmr.msrb.gmra.mxu2 %vm293_vm1, %v6789_v31  ;;  %v5447_v46 = vld [vmem:[%s8554_s5 + $0x104] sm:$0xf]  ;;  %v5020_v36 = vld [vmem:[%s8555_s4 + $0xf0] sm:$0xf] }
 0x25b   :  { %8753 = vst [vmem:[#allocation9_spill] sm:$0xff] %v6893_v14 }
 0x25c   :  { %2015 = vmatpush.bf16.msra.mxu3 %v5736_v53  ;;  %2041 = vmatpush.bf16.msra.mxu1 %v5831_v24  ;;  %v1579_v53 = vadd.f32 %v1578_v19, %v1540_v17  ;;  %v150_v24 = vld [vmem:[%s8554_s5 + $0x110] sm:$0xff]  ;;  %v4892_v19 = vld [vmem:[%s8554_s5 + $0x108] sm:$0xf0] }
 0x25d   :  { %2404 = vmatpush.bf16.msra.mxu2 %v6880_v29  ;;  %1996 = vmatpush.bf16.msra.mxu0 %v5893_v60  ;;  %v2320_v30 = vunpack.c.l.b16 %v150_v24  ;;  %v5420_v60 = vld [vmem:[%s8554_s5 + $0x24] sm:$0xf0]  ;;  %v2321_v7 = vunpack.c.h.b16 %v150_v24  ;;  %v4876_v24 = vld [vmem:[%s8554_s5 + $0xe8] sm:$0xf0] }
 0x25e   :  { %v1592_v47 = vadd.f32 %v1591_v9, %v1579_v53  ;;  %v8762_v9 = vld [vmem:[#allocation2_spill] sm:$0xff] }
 0x25f   :  { %4756 = vmatmul.msk.bf16.vlgmr.msrb.gmra.mxu3 %vm293_vm1, %v1958_v23  ;;  %4757 = vmatmul.msk.bf16.vlgmr.msrb.gmra.mxu1 %vm293_vm1, %v1958_v23  ;;  %v2089_v62 = vunpack.c.l.b16 %v8762_v9  ;;  %v5412_v23 = vld [vmem:[%s8555_s4 + $0xf4] sm:$0xf0] }
 0x260   :  { %2016 = vmatpush.bf16.msra.mxu3 %v5774_v1  ;;  %2042 = vmatpush.bf16.msra.mxu1 %v5873_v49  ;;  %v5422_v1 = vld [vmem:[%s8554_s5 + $0x34] sm:$0xf0]  ;;  %v1552_v49 = vpop.f32.mrf.mxu3  ;;  %v1596_v51 = vadd.f32 %v1592_v47, %v6247_v43  ;;  %v4874_v47 = vld [vmem:[%s8554_s5 + $0xe0] sm:$0xf] }
 0x261   :  { %v1553_v6 = vadd.f32 %v1552_v49, %v1514_v35  ;;  %2405 = vmatpush.bf16.msra.mxu2 %v6893_v14  ;;  %v6909_v40 = vor.u32 %v5422_v1, %v4786_v11  ;;  %2059 = vmatpush.bf16.msrb.mxu0 %v5899_v0  ;;  %v2356_v0 = vpack.c.b16 %v2320_v30, %v2320_v30  ;;  %v5448_v35 = vld [vmem:[%s8554_s5 + $0x104] sm:$0xf0]  ;;  %v6966_v52 = vpop.f32.mrf.mxu0  ;;  %v6978_v26 = vpop.f32.mrf.mxu1  ;;  %v5427_v30 = vld [vmem:[%s8554_s5 + $0x64] sm:$0xf] }
 0x262   :  { %1997 = vmatmul.bf16.vlgmr.msra.gmra.mxu0 %v6834_v18  ;;  %v1598_v56 = vmax.f32 %v1596_v51, 0.0  ;;  %v7020_v11 = vor.u32 %v5429_v32, %v4820_v28  ;;  %v5444_v1 = vld [vmem:[%s8554_s5 + $0xe4] sm:$0xf0]  ;;  %v7035_v49 = vor.u32 %v5447_v46, %v4892_v19  ;;  %v5408_v32 = vld [vmem:[%s8555_s4 + $0xd4] sm:$0xf0] }
 0x263   :  { %8754 = vst [vmem:[#allocation10_spill] sm:$0xff] %v6909_v40  ;;  %v7055_v61 = vor.u32 %v5444_v1, %v4874_v47  ;;  %v5423_v28 = vld [vmem:[%s8554_s5 + $0x44] sm:$0xf]  ;;  %v5437_v47 = vld [vmem:[%s8554_s5 + $0xb4] sm:$0xf] }
 0x264   :  { %2017 = vmatpush.bf16.msra.mxu3 %v5817_v16  ;;  %2043 = vmatpush.bf16.msra.mxu1 %v5905_v4  ;;  %v4778_v16 = vld [vmem:[%s8554_s5 + $0x20] sm:$0xf]  ;;  %v1566_v4 = vadd.f32 %v6836_v33, %v1553_v6  ;;  %8764 = vst [vmem:[#allocation18_spill] sm:$0xff] %v7020_v11  ;;  %v4812_v6 = vld [vmem:[%s8554_s5 + $0x68] sm:$0xf0] }
 0x265   :  { %2406 = vmatpush.bf16.msra.mxu2 %v6909_v40  ;;  %v6930_v21 = vor.u32 %v5420_v60, %v4778_v16  ;;  %2060 = vmatpush.bf16.msrb.mxu0 %v5930_v20  ;;  %v4890_v20 = vld [vmem:[%s8554_s5 + $0x100] sm:$0xf]  ;;  %v7045_v16 = vpack.c.b16 %v2089_v62, %v2089_v62  ;;  %v4796_v62 = vld [vmem:[%s8554_s5 + $0x48] sm:$0xf0]  ;;  %v4852_v1 = vld [vmem:[%s8554_s5 + $0xb8] sm:$0xf0] }
 0x266   :  { %v1595_v3 = vadd.f32 %v1566_v4, %v6242_v27  ;;  %v6963_v57 = vor.u32 %v5448_v35, %v4890_v20  ;;  %v7051_v4 = vpop.permute.xlu0 %2099  ;;  %v4804_v20 = vld [vmem:[%s8554_s5 + $0x58] sm:$0xf0] }
 0x267   :  { %8755 = vst [vmem:[#allocation11_spill] sm:$0xff] %v6930_v21 }
 0x268   :  { %2018 = vmatpush.bf16.msra.mxu3 %v5861_v39  ;;  %2044 = vmatpush.bf16.msra.mxu1 %v5937_v22  ;;  %v5418_v39 = vld [vmem:[%s8554_s5 + $0x14] sm:$0xf0]  ;;  %v1597_v17 = vmax.f32 %v1595_v3, 0.0  ;;  %v1554_v38 = vpop.f32.mrf.mxu3  ;;  %v6941_v22 = vsel %vm297_vm0, %v2356_v0, 0  ;;  %8759 = vst [vmem:[#allocation15_spill] sm:$0xff] %v6963_v57  ;;  %v7057_v0 = vor.u32 %v5412_v23, %v5020_v36 }
 0x269   :  { %8756 = vst [vmem:[#allocation12_spill] sm:$0xff] %v6941_v22  ;;  %2407 = vmatpush.bf16.msra.mxu2 %v6930_v21  ;;  %v6953_v33 = vor.u32 %v5418_v39, %v4770_v13  ;;  %2061 = vmatpush.bf16.msrb.mxu0 %v5961_v41  ;;  %v5445_v41 = vld [vmem:[%s8554_s5 + $0xf4] sm:$0xf]  ;;  %v1659_v13 = vpop.f32.mrf.mxu1  ;;  %v5442_v39 = vld [vmem:[%s8554_s5 + $0xd4] sm:$0xf0] }
 0x26a   :  { %v6949_v18 = vpack.c.bf16 %v1598_v56, %v1597_v17  ;;  %v6998_v45 = vor.u32 %v5445_v41, %v4884_v44  ;;  %8765 = vst [vmem:[#allocation19_spill] sm:$0xff] %v7045_v16  ;;  %v5441_v3 = vld [vmem:[%s8554_s5 + $0xd4] sm:$0xf]  ;;  %v4866_v56 = vld [vmem:[%s8554_s5 + $0xd0] sm:$0xf]  ;;  %v7165_v13 = vor.u32 %v5437_v47, %v4852_v1 }
 0x26b   :  { %8758 = vst [vmem:[#allocation14_spill] sm:$0xff] %v6953_v33  ;;  %v5012_v17 = vld [vmem:[%s8555_s4 + $0xe0] sm:$0xf]  ;;  %v5425_v38 = vld [vmem:[%s8554_s5 + $0x54] sm:$0xf] }
 0x26c   :  { %2019 = vmatpush.bf16.msra.mxu3 %v5896_v63  ;;  %8757 = vst [vmem:[#allocation13_spill] sm:$0xff] %v6949_v18  ;;  %2045 = vmatpush.bf16.msra.mxu1 %v5965_v42  ;;  %v1620_v63 = vpop.f32.mrf.mxu2  ;;  %v2357_v42 = vpack.c.b16 %v2321_v7, %v2321_v7  ;;  %v5410_v7 = vld [vmem:[%s8555_s4 + $0xe4] sm:$0xf0]  ;;  %v7109_v41 = vor.u32 %v5425_v38, %v4804_v20  ;;  %v4850_v36 = vld [vmem:[%s8554_s5 + $0xb0] sm:$0xf] }
 0x26d   :  { %2434 = vmatpush.bf16.msra.mxu0 %v6941_v22  ;;  %2408 = vmatpush.bf16.msra.mxu2 %v6953_v33  ;;  %8767 = vst [vmem:[#allocation21_spill] sm:$0xff] %v7057_v0  ;;  %v7095_v63 = vor.u32 %v5442_v39, %v4866_v56  ;;  %v7097_v59 = vor.u32 %v5410_v7, %v5012_v17  ;;  %v5435_v7 = vld [vmem:[%s8554_s5 + $0xa4] sm:$0xf]  ;;  %v4844_v38 = vld [vmem:[%s8554_s5 + $0xa8] sm:$0xf0] }
 0x26e   :  { %v6988_v2 = vsel %vm297_vm0, %v2357_v42, 0  ;;  %v4860_v42 = vld [vmem:[%s8554_s5 + $0xc8] sm:$0xf0]  ;;  %v2102_v56 = vpop.permute.xlu0 %2101  ;;  %v5433_v1 = vld [vmem:[%s8554_s5 + $0x94] sm:$0xf] }
 0x26f   :  { %8761 = vst [vmem:[#allocation17_spill] sm:$0xff] %v6988_v2  ;;  %v7127_v19 = vor.u32 %v5439_v34, %v4860_v42  ;;  %v4842_v34 = vld [vmem:[%s8554_s5 + $0xa0] sm:$0xf]  ;;  %v7184_v42 = vsel %vm2081_vm2, %v7051_v4, %v2102_v56 }
 0x270   :  { %2020 = vmatpush.bf16.msra.mxu3 %v5928_v15  ;;  %2046 = vmatpush.bf16.msra.mxu1 %v5986_v55  ;;  %v4882_v15 = vld [vmem:[%s8554_s5 + $0xf0] sm:$0xf]  ;;  %v5446_v55 = vld [vmem:[%s8554_s5 + $0xf4] sm:$0xf0]  ;;  %8768 = vst [vmem:[#allocation22_spill] sm:$0xff] %v7097_v59 }
 0x271   :  { %2435 = vmatpush.bf16.msra.mxu0 %v6963_v57  ;;  %2409 = vmatpush.bf16.msra.mxu2 %v6976_v25  ;;  %v7008_v53 = vor.u32 %v5446_v55, %v4882_v15  ;;  %v5440_v15 = vld [vmem:[%s8554_s5 + $0xc4] sm:$0xf0]  ;;  %v5004_v55 = vld [vmem:[%s8555_s4 + $0xd0] sm:$0xf]  ;;  %8769 = vst [vmem:[#allocation23_spill] sm:$0xff] %v7127_v19 }
 0x272   :  { %4759 = vmatmul.msk.bf16.vlgmr.msrb.gmra.mxu0 %vm293_vm1, %v6789_v31  ;;  %v1646_v31 = vpop.f32.mrf.mxu0  ;;  %8772 = vst [vmem:[#allocation26_spill] sm:$0xff] %v7184_v42 }
 0x273   :  { %8763 = vst [vmem:[#allocation2_spill] sm:$0xff] %v7008_v53  ;;  %v5438_v31 = vld [vmem:[%s8554_s5 + $0xb4] sm:$0xf0] }
 0x274   :  { %2021 = vmatpush.bf16.msra.mxu3 %v5959_v37  ;;  %2047 = vmatpush.bf16.msra.mxu1 %v5998_v5  ;;  %v5443_v37 = vld [vmem:[%s8554_s5 + $0xe4] sm:$0xf]  ;;  %v7022_v5 = vpop.f32.mrf.mxu3  ;;  %v7043_v51 = vpop.f32.mrf.mxu2  ;;  %v7169_v39 = vor.u32 %v5438_v31, %v4850_v36  ;;  %v4836_v31 = vld [vmem:[%s8554_s5 + $0x98] sm:$0xf0] }
 0x275   :  { %2473 = vmatpush.bf16.msrb.mxu2 %v6988_v2  ;;  %2454 = vmatpush.bf16.msrb.mxu0 %v6998_v45  ;;  %v7049_v60 = vor.u32 %v5443_v37, %v4876_v24  ;;  %v7133_v24 = vor.u32 %v5408_v32, %v5004_v55  ;;  %v1696_v20 = vpop.f32.mrf.mxu1  ;;  %v4988_v55 = vld [vmem:[%s8555_s4 + $0xb0] sm:$0xf]  ;;  %v5404_v32 = vld [vmem:[%s8555_s4 + $0xb4] sm:$0xf0]  ;;  %v1632_v56 = vadd.f32 %v7022_v5, %v6911_v8  ;;  %v5417_v5 = vld [vmem:[%s8554_s5 + $0x14] sm:$0xf] }
 0x276   :  { %2410 = vmatmul.bf16.vlgmr.msra.gmra.mxu2 %v7045_v16  ;;  %8771 = vst [vmem:[#allocation25_spill] sm:$0xff] %v7169_v39 }
 0x277   :  { %8766 = vst [vmem:[#allocation20_spill] sm:$0xff] %v7049_v60 }
 0x278   :  { %2022 = vmatpush.bf16.msra.mxu3 %v5982_v54  ;;  %2048 = vmatpush.bf16.msra.mxu1 %v6010_v10  ;;  %v4868_v54 = vld [vmem:[%s8554_s5 + $0xd8] sm:$0xf0]  ;;  %v7070_v10 = vor.u32 %v5427_v30, %v4812_v6  ;;  %v1658_v30 = vadd.f32 %v6978_v26, %v6966_v52  ;;  %v7147_v6 = vor.u32 %v5423_v28, %v4796_v62  ;;  %v5421_v52 = vld [vmem:[%s8554_s5 + $0x34] sm:$0xf]  ;;  %v5419_v28 = vld [vmem:[%s8554_s5 + $0x24] sm:$0xf] }
 0x279   :  { %2474 = vmatpush.bf16.msrb.mxu2 %v7035_v49  ;;  %2455 = vmatpush.bf16.msrb.mxu0 %v7049_v60  ;;  %v7091_v35 = vor.u32 %v5441_v3, %v4868_v54  ;;  %v4996_v3 = vld [vmem:[%s8555_s4 + $0xc0] sm:$0xf]  ;;  %v5406_v54 = vld [vmem:[%s8555_s4 + $0xc4] sm:$0xf0]  ;;  %v4788_v26 = vld [vmem:[%s8554_s5 + $0x38] sm:$0xf0] }
 0x27a   :  { %v1709_v23 = vpop.f32.mrf.mxu0  ;;  %8770 = vst [vmem:[#allocation24_spill] sm:$0xff] %v7147_v6  ;;  %v7171_v17 = vor.u32 %v5406_v54, %v4996_v3  ;;  %v4780_v62 = vld [vmem:[%s8554_s5 + $0x28] sm:$0xf0]  ;;  %v5434_v3 = vld [vmem:[%s8554_s5 + $0x94] sm:$0xf0] }
 0x27b   :  { %2023 = vmatmul.bf16.vlgmr.msra.gmra.mxu3 %v6764_v50  ;;  %2049 = vmatmul.bf16.vlgmr.msra.gmra.mxu1 %v6764_v50  ;;  %v4858_v50 = vld [vmem:[%s8554_s5 + $0xc0] sm:$0xf] }
 0x27c   :  { %2415 = vmatpush.bf16.msrb.mxu3 %v7008_v53  ;;  %2441 = vmatpush.bf16.msrb.mxu1 %v7020_v11  ;;  %v1633_v44 = vpop.f32.mrf.mxu3  ;;  %v1685_v46 = vpop.f32.mrf.mxu2  ;;  %v7131_v37 = vor.u32 %v5440_v15, %v4858_v50  ;;  %v7187_v50 = vor.u32 %v5421_v52, %v4788_v26  ;;  %v5436_v15 = vld [vmem:[%s8554_s5 + $0xa4] sm:$0xf0]  ;;  %v7232_v52 = vor.u32 %v5419_v28, %v4780_v62  ;;  %v4980_v26 = vld [vmem:[%s8555_s4 + $0xa0] sm:$0xf] }
 0x27d   :  { %2677 = vmatpush.bf16.msra.mxu2 %v7057_v0  ;;  %2456 = vmatpush.bf16.msrb.mxu0 %v7091_v35  ;;  %v1697_v44 = vadd.f32 %v1696_v20, %v1658_v30  ;;  %v7207_v46 = vor.u32 %v5435_v7, %v4844_v38  ;;  %v7214_v36 = vor.u32 %v5436_v15, %v4842_v34  ;;  %v5402_v7 = vld [vmem:[%s8555_s4 + $0xa4] sm:$0xf0]  ;;  %v7243_v38 = vld [vmem:[%s8555_s4 + $0x110] sm:$0xff]  ;;  %v4772_v20 = vld [vmem:[%s8554_s5 + $0x18] sm:$0xf0] }
 0x27e   :  { %v7216_v30 = vor.u32 %v5404_v32, %v4988_v55  ;;  %8774 = vst [vmem:[#allocation28_spill] sm:$0xff] %v7232_v52  ;;  %v7253_v15 = vor.u32 %v5433_v1, %v4836_v31  ;;  %v5431_v55 = vld [vmem:[%s8554_s5 + $0x84] sm:$0xf]  ;;  %v7264_v62 = vor.u32 %v5402_v7, %v4980_v26  ;;  %v5395_v1 = vld [vmem:[%s8555_s4 + $0x74] sm:$0xf] }
 0x27f   :  { %v1710_v47 = vadd.f32 %v1709_v23, %v1697_v44  ;;  %v4834_v23 = vld [vmem:[%s8554_s5 + $0x90] sm:$0xf]  ;;  %v4958_v31 = vld [vmem:[%s8555_s4 + $0x78] sm:$0xf0]  ;;  %v4826_v26 = vld [vmem:[%s8554_s5 + $0x80] sm:$0xf] }
 0x280   :  { %2416 = vmatpush.bf16.msrb.mxu3 %v7055_v61  ;;  %2442 = vmatpush.bf16.msrb.mxu1 %v7070_v10  ;;  %8773 = vst [vmem:[#allocation27_spill] sm:$0xff] %v7216_v30  ;;  %v7262_v28 = vor.u32 %v5434_v3, %v4834_v23  ;;  %v7278_v3 = vor.u32 %v5417_v5, %v4772_v20  ;;  %v5432_v7 = vld [vmem:[%s8554_s5 + $0x84] sm:$0xf0]  ;;  %v4972_v5 = vld [vmem:[%s8555_s4 + $0x90] sm:$0xf] }
 0x281   :  { %2678 = vmatpush.bf16.msra.mxu2 %v7097_v59  ;;  %2457 = vmatpush.bf16.msrb.mxu0 %v7127_v19  ;;  %v1714_v44 = vadd.f32 %v1710_v47, %v6247_v43  ;;  %8775 = vst [vmem:[#allocation29_spill] sm:$0xff] %v7253_v15  ;;  %v4828_v47 = vld [vmem:[%s8554_s5 + $0x88] sm:$0xf0]  ;;  %v5400_v20 = vld [vmem:[%s8555_s4 + $0x94] sm:$0xf0] }
 0x282   :  { %4896 = vmatmul.msk.bf16.vlgmr.msra.gmra.mxu0 %vm2392_vm3, %v7184_v42  ;;  %v1711_v54 = vpop.f32.mrf.mxu0  ;;  %8776 = vst [vmem:[#allocation30_spill] sm:$0xff] %v7264_v62  ;;  %v7301_v58 = vor.u32 %v5431_v55, %v4828_v47  ;;  %v7318_v47 = vor.u32 %v5400_v20, %v4972_v5  ;;  %v5414_v5 = vld [vmem:[%s8555_s4 + $0x104] sm:$0xf0] }
 0x283   :  { %v2583_v54 = vunpack.c.l.b16 %v7243_v38  ;;  %8777 = vst [vmem:[#allocation31_spill] sm:$0xff] %v7278_v3  ;;  %v1716_v18 = vmax.f32 %v1714_v44, 0.0 }
 0x284   :  { %2417 = vmatpush.bf16.msrb.mxu3 %v7095_v63  ;;  %2443 = vmatpush.bf16.msrb.mxu1 %v7109_v41  ;;  %v1670_v8 = vpop.f32.mrf.mxu3  ;;  %v7258_v32 = vpop.f32.mrf.mxu2  ;;  %8778 = vst [vmem:[#allocation32_spill] sm:$0xff] %v7301_v58 }
 0x285   :  { %2679 = vmatpush.bf16.msra.mxu2 %v7133_v24  ;;  %2458 = vmatpush.bf16.msrb.mxu0 %v7165_v13  ;;  %v1671_v34 = vadd.f32 %v1670_v8, %v1632_v56  ;;  %v1698_v56 = vpop.f32.mrf.mxu1  ;;  %v5415_v8 = vld [vmem:[%s8554_s5 + $0x4] sm:$0xf]  ;;  %v2619_v44 = vpack.c.b16 %v2583_v54, %v2583_v54  ;;  %8781 = vst [vmem:[#allocation35_spill] sm:$0xff] %v7318_v47  ;;  %v4964_v54 = vld [vmem:[%s8555_s4 + $0x80] sm:$0xf] }
 0x286   :  { %4897 = vmatmul.msk.bf16.vlgmr.msrb.gmra.mxu2 %vm2392_vm3, %v7184_v42  ;;  %v4956_v42 = vld [vmem:[%s8555_s4 + $0x70] sm:$0xf] }
 0x287   :  { %v1684_v23 = vadd.f32 %v7043_v51, %v1671_v34  ;;  %v4764_v51 = vld [vmem:[%s8554_s5 + $0x8] sm:$0xf0]  ;;  %v2090_v34 = vunpack.c.h.b16 %v8762_v9  ;;  %v7311_v9 = vor.u32 %v5395_v1, %v4958_v31 }
 0x288   :  { %2418 = vmatpush.bf16.msrb.mxu3 %v7131_v37  ;;  %2444 = vmatpush.bf16.msrb.mxu1 %v7147_v6  ;;  %v7316_v55 = vor.u32 %v5415_v8, %v4764_v51 }
 0x289   :  { %2680 = vmatpush.bf16.msra.mxu2 %v7171_v17  ;;  %2459 = vmatpush.bf16.msrb.mxu0 %v7207_v46  ;;  %v1713_v56 = vadd.f32 %v1684_v23, %v6242_v27  ;;  %v7313_v23 = vor.u32 %v5432_v7, %v4826_v26  ;;  %v5398_v26 = vld [vmem:[%s8555_s4 + $0x84] sm:$0xf0]  ;;  %v4948_v7 = vld [vmem:[%s8555_s4 + $0x60] sm:$0xf]  ;;  %v2092_v8 = vpack.c.b16 %v2090_v34, %v2090_v34  ;;  %v5391_v34 = vld [vmem:[%s8555_s4 + $0x54] sm:$0xf] }
 0x28a   :  { %8780 = vst [vmem:[#allocation34_spill] sm:$0xff] %v7316_v55 }
 0x28b   :  { %8779 = vst [vmem:[#allocation33_spill] sm:$0xff] %v7313_v23 }
 0x28c   :  { %2419 = vmatpush.bf16.msrb.mxu3 %v7169_v39  ;;  %2445 = vmatpush.bf16.msrb.mxu1 %v7187_v50  ;;  %v1672_v1 = vpop.f32.mrf.mxu3  ;;  %v1738_v20 = vpop.f32.mrf.mxu2 }
 0x28d   :  { %2681 = vmatpush.bf16.msra.mxu2 %v7216_v30  ;;  %2460 = vmatpush.bf16.msrb.mxu0 %v7253_v15  ;;  %v1715_v15 = vmax.f32 %v1713_v56, 0.0  ;;  %v5393_v30 = vld [vmem:[%s8555_s4 + $0x64] sm:$0xf]  ;;  %v7359_v56 = vsel %vm2081_vm2, %v2092_v8, %v7051_v4  ;;  %v7363_v1 = vor.u32 %v5398_v26, %v4964_v54  ;;  %v5022_v4 = vld [vmem:[%s8555_s4 + $0xf8] sm:$0xf0]  ;;  %v1775_v8 = vpop.f32.mrf.mxu1 }
 0x28e   :  { %8785 = vst [vmem:[#allocation39_spill] sm:$0xff] %v7359_v56 }
 0x28f   :  { %v1717_v51 = vpack.c.bf16 %v1716_v18, %v1715_v15  ;;  %v7350_v18 = vsel %vm297_vm0, %v2619_v44, 0  ;;  %8786 = vst [vmem:[#allocation40_spill] sm:$0xff] %v7363_v1 }
 0x290   :  { %2420 = vmatpush.bf16.msrb.mxu3 %v7214_v36  ;;  %2446 = vmatpush.bf16.msrb.mxu1 %v7232_v52  ;;  %v5396_v52 = vld [vmem:[%s8555_s4 + $0x74] sm:$0xf0]  ;;  %8783 = vst [vmem:[#allocation37_spill] sm:$0xff] %v7350_v18 }
 0x291   :  { %2682 = vmatpush.bf16.msra.mxu2 %v7264_v62  ;;  %v4950_v62 = vld [vmem:[%s8555_s4 + $0x68] sm:$0xf0]  ;;  %v7326_v31 = vor.u32 %v5396_v52, %v4956_v42  ;;  %2461 = vmatpush.bf16.msrb.mxu0 %v7301_v58  ;;  %v5394_v42 = vld [vmem:[%s8555_s4 + $0x64] sm:$0xf0]  ;;  %v5028_v52 = vld [vmem:[%s8555_s4 + $0x100] sm:$0xf]  ;;  %v2176_v20 = vunpack.c.h.b16 %v1717_v51  ;;  %v2175_v44 = vunpack.c.l.b16 %v1717_v51 }
 0x292   :  { %v7352_v15 = vor.u32 %v5393_v30, %v4950_v62  ;;  %v4942_v30 = vld [vmem:[%s8555_s4 + $0x58] sm:$0xf0]  ;;  %v5411_v62 = vld [vmem:[%s8555_s4 + $0xf4] sm:$0xf]  ;;  %v7376_v54 = vor.u32 %v5394_v42, %v4948_v7  ;;  %v7378_v26 = vor.u32 %v5414_v5, %v5028_v52  ;;  %v4940_v51 = vld [vmem:[%s8555_s4 + $0x50] sm:$0xf] }
 0x293   :  { %8782 = vst [vmem:[#allocation36_spill] sm:$0xff] %v7326_v31  ;;  %v7392_v42 = vor.u32 %v5391_v34, %v4942_v30  ;;  %v7394_v52 = vor.u32 %v5411_v62, %v5022_v4  ;;  %v5389_v5 = vld [vmem:[%s8555_s4 + $0x44] sm:$0xf]  ;;  %v5014_v34 = vld [vmem:[%s8555_s4 + $0xe8] sm:$0xf0]  ;;  %v7419_v62 = vpop.permute.xlu1 %2077 }
 0x294   :  { %2421 = vmatpush.bf16.msrb.mxu3 %v7262_v28  ;;  %2447 = vmatpush.bf16.msrb.mxu1 %v7278_v3  ;;  %8784 = vst [vmem:[#allocation38_spill] sm:$0xff] %v7352_v15  ;;  %v1749_v4 = vpop.f32.mrf.mxu3 }
 0x295   :  { %2703 = vmatpush.bf16.msra.mxu0 %v7311_v9  ;;  %2683 = vmatpush.bf16.msra.mxu2 %v7318_v47  ;;  %8787 = vst [vmem:[#allocation41_spill] sm:$0xff] %v7376_v54  ;;  %v2178_v47 = vpack.c.b16 %v2176_v20, %v2176_v20  ;;  %v5409_v20 = vld [vmem:[%s8555_s4 + $0xe4] sm:$0xf] }
 0x296   :  { %2462 = vmatmul.bf16.vlgmr.msrb.gmra.mxu0 %v7359_v56  ;;  %8788 = vst [vmem:[#allocation42_spill] sm:$0xff] %v7378_v26 }
 0x297   :  { %8789 = vst [vmem:[#allocation43_spill] sm:$0xff] %v7392_v42  ;;  %2181 = vrot.lane.b32.xlu2 %v2178_v47, %s5527_s3 }
 0x298   :  { %2422 = vmatpush.bf16.msrb.mxu3 %v7313_v23  ;;  %2448 = vmatpush.bf16.msrb.mxu1 %v7316_v55  ;;  %v1762_v55 = vpop.f32.mrf.mxu0  ;;  %v2177_v23 = vpack.c.b16 %v2175_v44, %v2175_v44  ;;  %8790 = vst [vmem:[#allocation44_spill] sm:$0xff] %v7394_v52  ;;  %v4932_v44 = vld [vmem:[%s8555_s4 + $0x40] sm:$0xf] }
 0x299   :  { %v7388_v7 = vadd.f32 %v1775_v8, %v1762_v55  ;;  %2704 = vmatpush.bf16.msra.mxu0 %v7352_v15  ;;  %2684 = vmatpush.bf16.msra.mxu2 %v7363_v1  ;;  %v4934_v55 = vld [vmem:[%s8555_s4 + $0x48] sm:$0xf0]  ;;  %v5390_v8 = vld [vmem:[%s8555_s4 + $0x44] sm:$0xf0] }
 0x29a   :  { %2179 = vrot.lane.b32.xlu1 %v2177_v23, %s5527_s3  ;;  %v5387_v23 = vld [vmem:[%s8555_s4 + $0x34] sm:$0xf] }
 0x29b   :  { %2423 = vmatmul.bf16.vlgmr.msrb.gmra.mxu3 %v7359_v56  ;;  %2449 = vmatmul.bf16.vlgmr.msrb.gmra.mxu1 %v7045_v16  ;;  %v7436_v16 = vadd.f32 %v1749_v4, %v7258_v32  ;;  %v4926_v56 = vld [vmem:[%s8555_s4 + $0x38] sm:$0xf0] }
 0x29c   :  { %2664 = vmatpush.bf16.msra.mxu3 %v7326_v31  ;;  %2696 = vmatpush.bf16.msra.mxu1 %v7350_v18  ;;  %v5392_v31 = vld [vmem:[%s8555_s4 + $0x54] sm:$0xf0]  ;;  %v5006_v32 = vld [vmem:[%s8555_s4 + $0xd8] sm:$0xf0] }
 0x29d   :  { %2755 = vmatpush.bf16.msrb.mxu2 %v6852_v12  ;;  %v7417_v47 = vor.u32 %v5392_v31, %v4940_v51  ;;  %2705 = vmatpush.bf16.msra.mxu0 %v7392_v42  ;;  %v7431_v31 = vor.u32 %v5389_v5, %v4934_v55  ;;  %v7433_v51 = vor.u32 %v5409_v20, %v5014_v34  ;;  %v5407_v5 = vld [vmem:[%s8555_s4 + $0xd4] sm:$0xf]  ;;  %v7453_v55 = vpop.f32.mrf.mxu2  ;;  %v1777_v34 = vpop.f32.mrf.mxu1  ;;  %v5388_v42 = vld [vmem:[%s8555_s4 + $0x34] sm:$0xf0] }
 0x29e   :  { %5035 = vmatmul.msk.bf16.vlgmr.msra.gmra.mxu2 %vm7413_vm4, %v7419_v62  ;;  %v7457_v20 = vor.u32 %v5390_v8, %v4932_v44  ;;  %v5385_v44 = vld [vmem:[%s8555_s4 + $0x24] sm:$0xf]  ;;  %v4918_v8 = vld [vmem:[%s8555_s4 + $0x28] sm:$0xf0] }
 0x29f   :  { %8793 = vst [vmem:[#allocation45_spill] sm:$0xff] %v7417_v47  ;;  %v5405_v34 = vld [vmem:[%s8555_s4 + $0xc4] sm:$0xf] }
 0x2a0   :  { %2665 = vmatpush.bf16.msra.mxu3 %v7376_v54  ;;  %2697 = vmatpush.bf16.msra.mxu1 %v7378_v26  ;;  %8794 = vst [vmem:[#allocation46_spill] sm:$0xff] %v7431_v31  ;;  %v1764_v4 = vpop.f32.mrf.mxu0  ;;  %v7467_v26 = vor.u32 %v5387_v23, %v4926_v56  ;;  %v1751_v23 = vpop.f32.mrf.mxu3 }
 0x2a1   :  { %8795 = vst [vmem:[#allocation47_spill] sm:$0xff] %v7433_v51  ;;  %2756 = vmatpush.bf16.msrb.mxu2 %v6866_v48  ;;  %2706 = vmatpush.bf16.msra.mxu0 %v7431_v31  ;;  %v4998_v4 = vld [vmem:[%s8555_s4 + $0xc8] sm:$0xf0]  ;;  %v4910_v23 = vld [vmem:[%s8555_s4 + $0x18] sm:$0xf0] }
 0x2a2   :  { %8796 = vst [vmem:[#allocation48_spill] sm:$0xff] %v7457_v20 }
 0x2a3   :  { %8797 = vst [vmem:[#allocation49_spill] sm:$0xff] %v7467_v26 }
 0x2a4   :  { %2716 = vmatpush.bf16.msrb.mxu1 %v7394_v52  ;;  %2666 = vmatpush.bf16.msra.mxu3 %v7417_v47  ;;  %v4924_v52 = vld [vmem:[%s8555_s4 + $0x30] sm:$0xf]  ;;  %v7469_v47 = vor.u32 %v5407_v5, %v5006_v32  ;;  %v4916_v5 = vld [vmem:[%s8555_s4 + $0x20] sm:$0xf]  ;;  %v5386_v32 = vld [vmem:[%s8555_s4 + $0x24] sm:$0xf0] }
 0x2a5   :  { %2757 = vmatpush.bf16.msrb.mxu2 %v6880_v29  ;;  %v7485_v56 = vor.u32 %v5388_v42, %v4924_v52  ;;  %2707 = vmatpush.bf16.msra.mxu0 %v7467_v26  ;;  %v5383_v42 = vld [vmem:[%s8555_s4 + $0x14] sm:$0xf]  ;;  %v2080_v52 = vpop.permute.xlu1 %2079  ;;  %v5384_v26 = vld [vmem:[%s8555_s4 + $0x14] sm:$0xf0] }
 0x2a6   :  { %8798 = vst [vmem:[#allocation50_spill] sm:$0xff] %v7469_v47  ;;  %v5403_v29 = vld [vmem:[%s8555_s4 + $0xb4] sm:$0xf]  ;;  %v7523_v31 = vsel %vm2081_vm2, %v7419_v62, %v2080_v52 }
 0x2a7   :  { %8799 = vst [vmem:[#allocation51_spill] sm:$0xff] %v7485_v56 }
 0x2a8   :  { %2717 = vmatpush.bf16.msrb.mxu1 %v7433_v51  ;;  %2667 = vmatpush.bf16.msra.mxu3 %v7457_v20  ;;  %v7495_v51 = vor.u32 %v5385_v44, %v4918_v8  ;;  %v7497_v20 = vor.u32 %v5405_v34, %v4998_v4  ;;  %v4990_v44 = vld [vmem:[%s8555_s4 + $0xb8] sm:$0xf0]  ;;  %v1803_v8 = vpop.f32.mrf.mxu2  ;;  %v7513_v34 = vor.u32 %v5386_v32, %v4916_v5  ;;  %v1827_v4 = vpop.f32.mrf.mxu0  ;;  %v5381_v32 = vld [vmem:[%s8555_s4 + $0x4] sm:$0xf] }
 0x2a9   :  { %2758 = vmatpush.bf16.msrb.mxu2 %v6893_v14  ;;  %v7527_v8 = vor.u32 %v5383_v42, %v4910_v23  ;;  %v7529_v5 = vor.u32 %v5403_v29, %v4990_v44  ;;  %v2584_v14 = vunpack.c.h.b16 %v7243_v38  ;;  %v5401_v42 = vld [vmem:[%s8555_s4 + $0xa4] sm:$0xf]  ;;  %v4982_v29 = vld [vmem:[%s8555_s4 + $0xa8] sm:$0xf0]  ;;  %v1814_v38 = vpop.f32.mrf.mxu1  ;;  %v4900_v44 = vld [vmem:[%s8555_s4] sm:$0xf] }
 0x2aa   :  { %8800 = vst [vmem:[#allocation52_spill] sm:$0xff] %v7495_v51  ;;  %2708 = vmatpush.bf16.msra.mxu0 %v7495_v51 }
 0x2ab   :  { %8801 = vst [vmem:[#allocation53_spill] sm:$0xff] %v7497_v20  ;;  %5036 = vmatmul.msk.bf16.vlgmr.msra.gmra.mxu1 %vm2392_vm3, %v7523_v31 }
 0x2ac   :  { %2718 = vmatpush.bf16.msrb.mxu1 %v7469_v47  ;;  %2668 = vmatpush.bf16.msra.mxu3 %v7485_v56  ;;  %8802 = vst [vmem:[#allocation54_spill] sm:$0xff] %v7513_v34  ;;  %v4908_v47 = vld [vmem:[%s8555_s4 + $0x10] sm:$0xf]  ;;  %v4902_v56 = vld [vmem:[%s8555_s4 + $0x8] sm:$0xf0] }
 0x2ad   :  { %8803 = vst [vmem:[#allocation55_spill] sm:$0xff] %v7527_v8  ;;  %2759 = vmatpush.bf16.msrb.mxu2 %v6909_v40  ;;  %v7548_v52 = vor.u32 %v5384_v26, %v4908_v47  ;;  %v7550_v23 = vor.u32 %v5381_v32, %v4902_v56  ;;  %v1815_v26 = vadd.f32 %v1814_v38, %v7388_v7  ;;  %v5399_v56 = vld [vmem:[%s8555_s4 + $0x94] sm:$0xf]  ;;  %v4974_v32 = vld [vmem:[%s8555_s4 + $0x98] sm:$0xf0] }
 0x2ae   :  { %8804 = vst [vmem:[#allocation56_spill] sm:$0xff] %v7529_v5  ;;  %2709 = vmatpush.bf16.msra.mxu0 %v7527_v8  ;;  %v2620_v47 = vpack.c.b16 %v2584_v14, %v2584_v14  ;;  %v1788_v14 = vpop.f32.mrf.mxu3  ;;  %v7575_v7 = vor.u32 %v5399_v56, %v4974_v32  ;;  %v5413_v38 = vld [vmem:[%s8555_s4 + $0x104] sm:$0xf]  ;;  %v8811_v32 = vld [vmem:[#allocation3_spill] sm:$0xff] }
 0x2af   :  { %8805 = vst [vmem:[#allocation57_spill] sm:$0xff] %v7548_v52 }
 0x2b0   :  { %2719 = vmatpush.bf16.msrb.mxu1 %v7497_v20  ;;  %2669 = vmatpush.bf16.msra.mxu3 %v7513_v34  ;;  %8806 = vst [vmem:[#allocation58_spill] sm:$0xff] %v7550_v23  ;;  %v5382_v20 = vld [vmem:[%s8555_s4 + $0x4] sm:$0xf0]  ;;  %v7560_v34 = vor.u32 %v5401_v42, %v4982_v29  ;;  %v1829_v42 = vpop.f32.mrf.mxu0  ;;  %v7578_v29 = vsel %vm297_vm0, %v2620_v47, 0  ;;  %v4966_v47 = vld [vmem:[%s8555_s4 + $0x88] sm:$0xf0]  ;;  %v7595_v56 = vpop.f32.mrf.mxu2 }
 0x2b1   :  { %2760 = vmatpush.bf16.msrb.mxu2 %v6930_v21  ;;  %v7571_v8 = vor.u32 %v5382_v20, %v4900_v44  ;;  %8809 = vst [vmem:[#allocation61_spill] sm:$0xff] %v7575_v7  ;;  %v5030_v20 = vld [vmem:[%s8555_s4 + $0x108] sm:$0xf0]  ;;  %v2109_v42 = vunpack.c.l.b16 %v8811_v32 }
 0x2b2   :  { %8807 = vst [vmem:[#allocation59_spill] sm:$0xff] %v7560_v34  ;;  %2710 = vmatpush.bf16.msra.mxu0 %v7550_v23  ;;  %v7608_v23 = vpop.permute.xlu2 %2119 }
 0x2b3   :  { %8808 = vst [vmem:[#allocation60_spill] sm:$0xff] %v7571_v8 }
 0x2b4   :  { %2720 = vmatpush.bf16.msrb.mxu1 %v7529_v5  ;;  %2670 = vmatpush.bf16.msra.mxu3 %v7548_v52  ;;  %v1828_v5 = vadd.f32 %v1827_v4, %v1815_v26  ;;  %8810 = vst [vmem:[#allocation62_spill] sm:$0xff] %v7578_v29  ;;  %v1789_v4 = vadd.f32 %v1788_v14, %v7436_v16  ;;  %v5397_v26 = vld [vmem:[%s8555_s4 + $0x84] sm:$0xf]  ;;  %v8631_v14 = vmov 0  }
 0x2b5   :  { %2761 = vmatpush.bf16.msrb.mxu2 %v6953_v33  ;;  %2711 = vmatmul.bf16.vlgmr.msra.gmra.mxu0 %v8631_v14 }
 0x2b6   :  { %2787 = vmatpush.bf16.msrb.mxu0 %v6941_v22  ;;  %v1832_v44 = vadd.f32 %v1828_v5, %v6247_v43  ;;  %v1802_v16 = vadd.f32 %v7453_v55, %v1789_v4  ;;  %v7603_v5 = vor.u32 %v5413_v38, %v5030_v20  ;;  %v1816_v22 = vpop.f32.mrf.mxu1  ;;  %v7615_v55 = vpack.c.b16 %v2109_v42, %v2109_v42  ;;  %v1790_v38 = vpop.f32.mrf.mxu3 }
 0x2b7   :  { %v8817_v38 = vld [vmem:[#allocation27_spill] sm:$0xff] }
 0x2b8   :  { %2721 = vmatpush.bf16.msrb.mxu1 %v7560_v34  ;;  %2671 = vmatpush.bf16.msra.mxu3 %v7571_v8  ;;  %8812 = vst [vmem:[#allocation3_spill] sm:$0xff] %v7603_v5  ;;  %v7606_v34 = vor.u32 %v5397_v26, %v4966_v47  ;;  %v1831_v8 = vadd.f32 %v1802_v16, %v6242_v27  ;;  %v1834_v33 = vmax.f32 %v1832_v44, 0.0  ;;  %v1856_v4 = vpop.f32.mrf.mxu2 }
 0x2b9   :  { %2762 = vmatpush.bf16.msrb.mxu2 %v6976_v25  ;;  %8814 = vst [vmem:[#allocation64_spill] sm:$0xff] %v7615_v55 }
 0x2ba   :  { %8813 = vst [vmem:[#allocation63_spill] sm:$0xff] %v7606_v34  ;;  %2788 = vmatpush.bf16.msrb.mxu0 %v6963_v57  ;;  %v1833_v22 = vmax.f32 %v1831_v8, 0.0  ;;  %v1880_v8 = vpop.f32.mrf.mxu0  ;;  %v2122_v44 = vpop.permute.xlu2 %2121 }
 0x2bb   :  { %2672 = vmatmul.bf16.vlgmr.msra.gmra.mxu3 %v8631_v14  ;;  %v7639_v30 = vsel %vm2081_vm2, %v7608_v23, %v2122_v44  ;;  %v2110_v44 = vunpack.c.h.b16 %v8811_v32  ;;  %v8820_v14 = vld [vmem:[#allocation30_spill] sm:$0xff]  ;;  %v8822_v32 = vld [vmem:[#allocation33_spill] sm:$0xff] }
 0x2bc   :  { %2735 = vmatpush.bf16.msrb.mxu3 %v7578_v29  ;;  %2722 = vmatpush.bf16.msrb.mxu1 %v7575_v7  ;;  %v7621_v20 = vpack.c.bf16 %v1834_v33, %v1833_v22  ;;  %8816 = vst [vmem:[#allocation66_spill] sm:$0xff] %v7639_v30 }
 0x2bd   :  { %2826 = vmatpush.bf16.msra.mxu2 %v6988_v2 }
 0x2be   :  { %2807 = vmatpush.bf16.msra.mxu0 %v6998_v45  ;;  %8815 = vst [vmem:[#allocation65_spill] sm:$0xff] %v7621_v20  ;;  %2763 = vmatmul.bf16.vlgmr.msrb.gmra.mxu2 %v7615_v55  ;;  %v1893_v33 = vpop.f32.mrf.mxu1 }
 0x2c0   :  { %2736 = vmatpush.bf16.msrb.mxu3 %v7603_v5  ;;  %2723 = vmatpush.bf16.msrb.mxu1 %v7606_v34  ;;  %v1919_v26 = vpop.f32.mrf.mxu2 }
 0x2c1   :  { %2827 = vmatpush.bf16.msra.mxu2 %v7035_v49 }
 0x2c2   :  { %2808 = vmatpush.bf16.msra.mxu0 %v7049_v60  ;;  %v1882_v47 = vpop.f32.mrf.mxu0 }
 0x2c3   :  { %5038 = vmatmul.msk.bf16.vlgmr.msrb.gmra.mxu1 %vm7413_vm4, %v7419_v62  ;;  %v1867_v62 = vpop.f32.mrf.mxu3  ;;  %v8819_v47 = vld [vmem:[#allocation29_spill] sm:$0xff] }
 0x2c4   :  { %2768 = vmatpush.bf16.msra.mxu3 %v7008_v53  ;;  %2794 = vmatpush.bf16.msra.mxu1 %v7020_v11 }
 0x2c5   :  { %2846 = vmatpush.bf16.msrb.mxu2 %v7057_v0  ;;  %5040 = vmatmul.msk.bf16.vlgmr.msrb.gmra.mxu0 %vm2392_vm3, %v7639_v30 }
 0x2c6   :  { %2809 = vmatpush.bf16.msra.mxu0 %v7091_v35  ;;  %v1895_v42 = vpop.f32.mrf.mxu1 }
 0x2c7   :  { %v1894_v42 = vadd.f32 %v1893_v33, %v1880_v8  ;;  %v8823_v8 = vld [vmem:[#allocation35_spill] sm:$0xff]  ;;  %v8824_v33 = vld [vmem:[#allocation34_spill] sm:$0xff] }
 0x2c8   :  { %2769 = vmatpush.bf16.msra.mxu3 %v7055_v61  ;;  %2795 = vmatpush.bf16.msra.mxu1 %v7070_v10  ;;  %v1921_v22 = vpop.f32.mrf.mxu2 }
 0x2c9   :  { %2847 = vmatpush.bf16.msrb.mxu2 %v7097_v59 }
 0x2ca   :  { %2810 = vmatpush.bf16.msra.mxu0 %v7127_v19  ;;  %v1945_v4 = vpop.f32.mrf.mxu0 }
 0x2cb   :  { %5039 = vmatmul.msk.bf16.vlgmr.msrb.gmra.mxu3 %vm2392_vm3, %v7523_v31  ;;  %v1869_v16 = vpop.f32.mrf.mxu3  ;;  %v8818_v31 = vld [vmem:[#allocation28_spill] sm:$0xff] }
 0x2cc   :  { %2770 = vmatpush.bf16.msra.mxu3 %v7095_v63  ;;  %2796 = vmatpush.bf16.msra.mxu1 %v7109_v41  ;;  %v2112_v16 = vpack.c.b16 %v2110_v44, %v2110_v44 }
 0x2cd   :  { %2848 = vmatpush.bf16.msrb.mxu2 %v7133_v24 }
 0x2ce   :  { %2811 = vmatpush.bf16.msra.mxu0 %v7165_v13  ;;  %5041 = vmatmul.msk.bf16.vlgmr.msra.gmra.mxu2 %vm2392_vm3, %v7639_v30  ;;  %v1932_v22 = vpop.f32.mrf.mxu1  ;;  %v7668_v30 = vsel %vm2081_vm2, %v2112_v16, %v7608_v23 }
 0x2cf   :  { %v1933_v20 = vadd.f32 %v1932_v22, %v1894_v42  ;;  %8821 = vst [vmem:[#allocation27_spill] sm:$0xff] %v7668_v30 }
 0x2d0   :  { %2771 = vmatpush.bf16.msra.mxu3 %v7131_v37  ;;  %2797 = vmatpush.bf16.msra.mxu1 %v7147_v6  ;;  %v1972_v42 = vpop.f32.mrf.mxu2 }
 0x2d1   :  { %2849 = vmatpush.bf16.msrb.mxu2 %v7171_v17 }
 0x2d2   :  { %2812 = vmatpush.bf16.msra.mxu0 %v7207_v46  ;;  %v1947_v44 = vpop.f32.mrf.mxu0 }
 0x2d3   :  { %v1906_v23 = vpop.f32.mrf.mxu3  ;;  %v8828_v44 = vld [vmem:[#allocation44_spill] sm:$0xff] }
 0x2d4   :  { %2772 = vmatpush.bf16.msra.mxu3 %v7169_v39  ;;  %2798 = vmatpush.bf16.msra.mxu1 %v7187_v50 }
 0x2d5   :  { %2850 = vmatpush.bf16.msrb.mxu2 %v8817_v38 }
 0x2d6   :  { %2813 = vmatpush.bf16.msra.mxu0 %v8819_v47 }
 0x2d8   :  { %2773 = vmatpush.bf16.msra.mxu3 %v7214_v36  ;;  %2799 = vmatpush.bf16.msra.mxu1 %v8818_v31 }
 0x2d9   :  { %2851 = vmatpush.bf16.msrb.mxu2 %v8820_v14  ;;  %v1946_v14 = vadd.f32 %v1945_v4, %v1933_v20  ;;  %v8826_v20 = vld [vmem:[#allocation42_spill] sm:$0xff]  ;;  %v8827_v4 = vld [vmem:[#allocation43_spill] sm:$0xff] }
 0x2da   :  { %2814 = vmatpush.bf16.msra.mxu0 %v7301_v58  ;;  %v1868_v58 = vadd.f32 %v1867_v62, %v7595_v56  ;;  %v1934_v62 = vpop.f32.mrf.mxu1 }
 0x2db   :  { %v1950_v22 = vadd.f32 %v1946_v14, %v6247_v43  ;;  %v1974_v62 = vpop.f32.mrf.mxu2 }
 0x2dc   :  { %2774 = vmatpush.bf16.msra.mxu3 %v7262_v28  ;;  %2800 = vmatpush.bf16.msra.mxu1 %v7278_v3  ;;  %v8825_v3 = vld [vmem:[#allocation36_spill] sm:$0xff]  ;;  %v1907_v16 = vadd.f32 %v1906_v23, %v1868_v58  ;;  %v8829_v58 = vld [vmem:[#allocation39_spill] sm:$0xff]  ;;  %v8830_v23 = vld [vmem:[#allocation45_spill] sm:$0xff] }
 0x2dd   :  { %2852 = vmatpush.bf16.msrb.mxu2 %v8823_v8  ;;  %2815 = vmatmul.bf16.vlgmr.msra.gmra.mxu0 %v7668_v30 }
 0x2de   :  { %2872 = vmatpush.bf16.msrb.mxu0 %v7311_v9  ;;  %v1920_v56 = vadd.f32 %v1919_v26, %v1907_v16  ;;  %v8831_v26 = vld [vmem:[#allocation46_spill] sm:$0xff]  ;;  %v8832_v16 = vld [vmem:[#allocation47_spill] sm:$0xff] }
 0x2e0   :  { %2775 = vmatpush.bf16.msra.mxu3 %v8822_v32  ;;  %2801 = vmatpush.bf16.msra.mxu1 %v8824_v33 }
 0x2e1   :  { %2853 = vmatpush.bf16.msrb.mxu2 %v7363_v1  ;;  %v8836_v1 = vld [vmem:[#allocation50_spill] sm:$0xff] }
 0x2e2   :  { %2873 = vmatpush.bf16.msrb.mxu0 %v7352_v15  ;;  %v2011_v15 = vpop.f32.mrf.mxu1 }
 0x2e3   :  { %2776 = vmatmul.bf16.vlgmr.msra.gmra.mxu3 %v7668_v30  ;;  %2802 = vmatmul.bf16.vlgmr.msra.gmra.mxu1 %v7615_v55  ;;  %v1949_v30 = vadd.f32 %v1920_v56, %v6242_v27  ;;  %v1952_v55 = vmax.f32 %v1950_v22, 0.0 }
 0x2e4   :  { %2833 = vmatpush.bf16.msrb.mxu3 %v8825_v3  ;;  %2865 = vmatpush.bf16.msrb.mxu1 %v7350_v18 }
 0x2e5   :  { %2919 = vmatpush.bf16.msra.mxu2 %v6852_v12  ;;  %v1951_v14 = vmax.f32 %v1949_v30, 0.0  ;;  %v1908_v12 = vpop.f32.mrf.mxu3  ;;  %v1998_v30 = vpop.f32.mrf.mxu0 }
 0x2e6   :  { %2874 = vmatpush.bf16.msrb.mxu0 %v8827_v4  ;;  %2854 = vmatmul.bf16.vlgmr.msrb.gmra.mxu2 %v8829_v58  ;;  %v8833_v4 = vld [vmem:[#allocation8_spill] sm:$0xff]  ;;  %v8838_v12 = vld [vmem:[#allocation51_spill] sm:$0xff] }
 0x2e8   :  { %2834 = vmatpush.bf16.msrb.mxu3 %v7376_v54  ;;  %2866 = vmatpush.bf16.msrb.mxu1 %v8826_v20  ;;  %v1953_v20 = vpack.c.bf16 %v1952_v55, %v1951_v14  ;;  %v8835_v54 = vld [vmem:[#allocation49_spill] sm:$0xff]  ;;  %v2037_v14 = vpop.f32.mrf.mxu2 }
 0x2e9   :  { %2920 = vmatpush.bf16.msra.mxu2 %v6866_v48  ;;  %v8839_v55 = vld [vmem:[#allocation53_spill] sm:$0xff] }
 0x2ea   :  { %2875 = vmatpush.bf16.msrb.mxu0 %v8831_v26  ;;  %v2195_v56 = vunpack.c.l.b16 %v1953_v20  ;;  %v2196_v22 = vunpack.c.h.b16 %v1953_v20  ;;  %v8837_v26 = vld [vmem:[#allocation9_spill] sm:$0xff]  ;;  %v8840_v20 = vld [vmem:[#allocation26_spill] sm:$0xff] }
 0x2ec   :  { %2885 = vmatpush.bf16.msra.mxu1 %v8828_v44  ;;  %2835 = vmatpush.bf16.msrb.mxu3 %v8830_v23  ;;  %v8834_v44 = vld [vmem:[#allocation48_spill] sm:$0xff]  ;;  %v2197_v48 = vpack.c.b16 %v2195_v56, %v2195_v56  ;;  %v2198_v23 = vpack.c.b16 %v2196_v22, %v2196_v22  ;;  %v8841_v56 = vld [vmem:[#allocation54_spill] sm:$0xff]  ;;  %v8842_v22 = vld [vmem:[#allocation55_spill] sm:$0xff] }
 0x2ed   :  { %2921 = vmatpush.bf16.msra.mxu2 %v8833_v4  ;;  %v1985_v62 = vpop.f32.mrf.mxu3 }
 0x2ee   :  { %2876 = vmatpush.bf16.msrb.mxu0 %v8835_v54  ;;  %2199 = vrot.lane.b32.xlu0 %v2197_v48, %s5527_s3  ;;  %v2000_v48 = vpop.f32.mrf.mxu0 }
 0x2ef   :  { %2201 = vrot.lane.b32.xlu1 %v2198_v23, %s5527_s3  ;;  %v8844_v23 = vld [vmem:[#allocation58_spill] sm:$0xff]  ;;  %v8850_v48 = vld [vmem:[#allocation4_spill] sm:$0xff] }
 0x2f0   :  { %2886 = vmatpush.bf16.msra.mxu1 %v8832_v16  ;;  %2836 = vmatpush.bf16.msrb.mxu3 %v8834_v44  ;;  %v2012_v16 = vadd.f32 %v2011_v15, %v1998_v30  ;;  %v1986_v15 = vadd.f32 %v1985_v62, %v1972_v42  ;;  %v8843_v30 = vld [vmem:[#allocation56_spill] sm:$0xff] }
 0x2f1   :  { %2922 = vmatpush.bf16.msra.mxu2 %v8837_v26  ;;  %v8846_v26 = vld [vmem:[#allocation12_spill] sm:$0xff] }
 0x2f2   :  { %2877 = vmatpush.bf16.msrb.mxu0 %v7495_v51  ;;  %v2013_v51 = vpop.f32.mrf.mxu1  ;;  %v8848_v62 = vld [vmem:[#allocation60_spill] sm:$0xff] }
 0x2f3   :  { %5042 = vmatmul.msk.bf16.vlgmr.msrb.gmra.mxu1 %vm2392_vm3, %v8840_v20  ;;  %v2129_v51 = vunpack.c.l.b16 %v8850_v48 }
 0x2f4   :  { %2887 = vmatpush.bf16.msra.mxu1 %v8836_v1  ;;  %2837 = vmatpush.bf16.msrb.mxu3 %v8838_v12  ;;  %v8847_v12 = vld [vmem:[#allocation14_spill] sm:$0xff] }
 0x2f5   :  { %2923 = vmatpush.bf16.msra.mxu2 %v6909_v40  ;;  %v2039_v40 = vpop.f32.mrf.mxu2  ;;  %v1987_v42 = vpop.f32.mrf.mxu3 }
 0x2f6   :  { %2878 = vmatpush.bf16.msrb.mxu0 %v8842_v22  ;;  %v8849_v22 = vld [vmem:[#allocation19_spill] sm:$0xff]  ;;  %v7724_v40 = vpack.c.b16 %v2129_v51, %v2129_v51 }
 0x2f8   :  { %2888 = vmatpush.bf16.msra.mxu1 %v8839_v55  ;;  %2838 = vmatpush.bf16.msrb.mxu3 %v8841_v56  ;;  %v8845_v55 = vld [vmem:[#allocation59_spill] sm:$0xff]  ;;  %8851 = vst [vmem:[#allocation28_spill] sm:$0xff] %v7724_v40 }
 0x2f9   :  { %2924 = vmatpush.bf16.msra.mxu2 %v6930_v21  ;;  %v2063_v21 = vpop.f32.mrf.mxu0 }
 0x2fa   :  { %2879 = vmatpush.bf16.msrb.mxu0 %v8844_v23  ;;  %v2050_v42 = vpop.f32.mrf.mxu1 }
 0x2fc   :  { %2889 = vmatpush.bf16.msra.mxu1 %v8843_v30  ;;  %2839 = vmatpush.bf16.msrb.mxu3 %v7548_v52 }
 0x2fd   :  { %2925 = vmatpush.bf16.msra.mxu2 %v8847_v12  ;;  %2880 = vmatmul.bf16.vlgmr.msrb.gmra.mxu0 %v8849_v22 }
 0x2fe   :  { %2951 = vmatpush.bf16.msra.mxu0 %v8846_v26 }
 0x300   :  { %2890 = vmatpush.bf16.msra.mxu1 %v8845_v55  ;;  %2840 = vmatpush.bf16.msrb.mxu3 %v8848_v62 }
 0x301   :  { %2926 = vmatpush.bf16.msra.mxu2 %v6976_v25  ;;  %v2065_v25 = vpop.f32.mrf.mxu0 }
 0x302   :  { %2952 = vmatpush.bf16.msra.mxu0 %v6963_v57  ;;  %v2052_v25 = vpop.f32.mrf.mxu1 }
 0x303   :  { %2841 = vmatmul.bf16.vlgmr.msrb.gmra.mxu3 %v8849_v22  ;;  %v2051_v22 = vadd.f32 %v2050_v42, %v2012_v16  ;;  %v2140_v42 = vpop.permute.xlu0 %2139  ;;  %v8856_v25 = vld [vmem:[#allocation32_spill] sm:$0xff] }
 0x304   :  { %2891 = vmatpush.bf16.msra.mxu1 %v7575_v7  ;;  %2904 = vmatpush.bf16.msra.mxu3 %v7578_v29 }
 0x305   :  { %2990 = vmatpush.bf16.msrb.mxu2 %v6988_v2  ;;  %v2064_v51 = vadd.f32 %v2063_v21, %v2051_v22 }
 0x306   :  { %2971 = vmatpush.bf16.msrb.mxu0 %v6998_v45  ;;  %2927 = vmatmul.bf16.vlgmr.msra.gmra.mxu2 %v7724_v40 }
 0x308   :  { %2892 = vmatpush.bf16.msra.mxu1 %v7606_v34  ;;  %2905 = vmatpush.bf16.msra.mxu3 %v7603_v5  ;;  %v7736_v5 = vpop.f32.mrf.mxu2 }
 0x309   :  { %2991 = vmatpush.bf16.msrb.mxu2 %v7035_v49 }
 0x30a   :  { %2972 = vmatpush.bf16.msrb.mxu0 %v7049_v60  ;;  %v2142_v60 = vpop.permute.xlu1 %2141 }
 0x30b   :  { %2893 = vmatmul.bf16.vlgmr.msra.gmra.mxu1 %v8829_v58  ;;  %v2068_v58 = vadd.f32 %v2064_v51, %v6247_v43  ;;  %v7746_v22 = vsel %vm2081_vm2, %v2140_v42, %v2142_v60 }
 0x30c   :  { %2932 = vmatpush.bf16.msrb.mxu3 %v7008_v53  ;;  %2958 = vmatpush.bf16.msrb.mxu1 %v7020_v11  ;;  %v2024_v11 = vpop.f32.mrf.mxu3  ;;  %8852 = vst [vmem:[#allocation29_spill] sm:$0xff] %v7746_v22 }
 0x30d   :  { %3010 = vmatpush.bf16.msra.mxu2 %v7057_v0  ;;  %v2025_v16 = vadd.f32 %v2024_v11, %v1986_v15  ;;  %5044 = vmatmul.msk.bf16.vlgmr.msra.gmra.mxu0 %vm2392_vm3, %v7746_v22  ;;  %v2437_v11 = vpop.f32.mrf.mxu0  ;;  %v2070_v43 = vmax.f32 %v2068_v58, 0.0  ;;  %v8855_v58 = vld [vmem:[#allocation30_spill] sm:$0xff] }
 0x30e   :  { %2973 = vmatpush.bf16.msrb.mxu0 %v7091_v35 }
 0x30f   :  { %v2038_v21 = vadd.f32 %v2037_v14, %v2025_v16  ;;  %v8854_v16 = vld [vmem:[#allocation31_spill] sm:$0xff] }
 0x310   :  { %2933 = vmatpush.bf16.msrb.mxu3 %v7055_v61  ;;  %2959 = vmatpush.bf16.msrb.mxu1 %v7070_v10  ;;  %v2413_v15 = vpop.f32.mrf.mxu2 }
 0x311   :  { %3011 = vmatpush.bf16.msra.mxu2 %v7097_v59  ;;  %v2067_v0 = vadd.f32 %v2038_v21, %v6242_v27 }
 0x312   :  { %2974 = vmatpush.bf16.msrb.mxu0 %v7127_v19 }
 0x313   :  { %v2069_v14 = vmax.f32 %v2067_v0, 0.0  ;;  %5043 = vmatmul.msk.bf16.vlgmr.msra.gmra.mxu3 %vm2392_vm3, %v8840_v20  ;;  %v2130_v20 = vunpack.c.h.b16 %v8850_v48 }
 0x314   :  { %2934 = vmatpush.bf16.msrb.mxu3 %v7095_v63  ;;  %2960 = vmatpush.bf16.msrb.mxu1 %v7109_v41  ;;  %v2026_v51 = vpop.f32.mrf.mxu3 }
 0x315   :  { %3012 = vmatpush.bf16.msra.mxu2 %v7133_v24  ;;  %v7755_v60 = vpack.c.bf16 %v2070_v43, %v2069_v14  ;;  %v2439_v27 = vpop.f32.mrf.mxu0  ;;  %v2132_v21 = vpack.c.b16 %v2130_v20, %v2130_v20  ;;  %v8859_v20 = vld [vmem:[#allocation40_spill] sm:$0xff] }
 0x316   :  { %2975 = vmatpush.bf16.msrb.mxu0 %v7165_v13  ;;  %5045 = vmatmul.msk.bf16.vlgmr.msrb.gmra.mxu2 %vm2392_vm3, %v7746_v22  ;;  %v8858_v27 = vld [vmem:[#allocation38_spill] sm:$0xff] }
 0x317   :  { %8853 = vst [vmem:[#allocation33_spill] sm:$0xff] %v7755_v60  ;;  %v7777_v14 = vsel %vm2081_vm2, %v2132_v21, %v2140_v42  ;;  %v8860_v21 = vld [vmem:[#allocation41_spill] sm:$0xff]  ;;  %v8861_v60 = vld [vmem:[#allocation42_spill] sm:$0xff] }
 0x318   :  { %2935 = vmatpush.bf16.msrb.mxu3 %v7131_v37  ;;  %2961 = vmatpush.bf16.msrb.mxu1 %v7147_v6  ;;  %v2476_v0 = vpop.f32.mrf.mxu2  ;;  %8857 = vst [vmem:[#allocation35_spill] sm:$0xff] %v7777_v14  ;;  %v2450_v15 = vpop.f32.mrf.mxu1  ;;  %v8862_v22 = vld [vmem:[#allocation6_spill] sm:$0xff] }
 0x319   :  { %3013 = vmatpush.bf16.msra.mxu2 %v7171_v17 }
 0x31a   :  { %2976 = vmatpush.bf16.msrb.mxu0 %v7207_v46 }
 0x31c   :  { %2936 = vmatpush.bf16.msrb.mxu3 %v7169_v39  ;;  %2962 = vmatpush.bf16.msrb.mxu1 %v7187_v50 }
 0x31d   :  { %3014 = vmatpush.bf16.msra.mxu2 %v8817_v38  ;;  %v2463_v43 = vpop.f32.mrf.mxu0 }
 0x31e   :  { %2977 = vmatpush.bf16.msrb.mxu0 %v8819_v47  ;;  %v2464_v51 = vadd.f32 %v2463_v43, %v2450_v15 }
 0x320   :  { %2937 = vmatpush.bf16.msrb.mxu3 %v7214_v36  ;;  %2963 = vmatpush.bf16.msrb.mxu1 %v8818_v31  ;;  %v2478_v48 = vpop.f32.mrf.mxu2  ;;  %v2477_v42 = vadd.f32 %v2476_v0, %v2464_v51  ;;  %v8866_v51 = vld [vmem:[#allocation45_spill] sm:$0xff] }
 0x321   :  { %3015 = vmatpush.bf16.msra.mxu2 %v8855_v58  ;;  %v2424_v48 = vpop.f32.mrf.mxu3 }
 0x322   :  { %2978 = vmatpush.bf16.msrb.mxu0 %v8856_v25  ;;  %v2425_v43 = vadd.f32 %v2424_v48, %v7736_v5  ;;  %v8871_v48 = vld [vmem:[#allocation9_spill] sm:$0xff] }
 0x324   :  { %2938 = vmatpush.bf16.msrb.mxu3 %v7262_v28  ;;  %2964 = vmatpush.bf16.msrb.mxu1 %v8854_v16  ;;  %v2438_v0 = vadd.f32 %v2437_v11, %v2425_v43  ;;  %v8872_v43 = vld [vmem:[#allocation52_spill] sm:$0xff] }
 0x325   :  { %2979 = vmatmul.bf16.vlgmr.msrb.gmra.mxu0 %v7777_v14  ;;  %3016 = vmatpush.bf16.msra.mxu2 %v8823_v8  ;;  %v2465_v15 = vpop.f32.mrf.mxu0 }
 0x326   :  { %3036 = vmatpush.bf16.msra.mxu0 %v7311_v9  ;;  %v8873_v15 = vld [vmem:[#allocation53_spill] sm:$0xff] }
 0x328   :  { %2939 = vmatpush.bf16.msrb.mxu3 %v8822_v32  ;;  %2965 = vmatpush.bf16.msrb.mxu1 %v8824_v33 }
 0x329   :  { %3017 = vmatpush.bf16.msra.mxu2 %v8859_v20  ;;  %v8867_v20 = vld [vmem:[#allocation7_spill] sm:$0xff]  ;;  %v2426_v5 = vpop.f32.mrf.mxu3 }
 0x32a   :  { %3037 = vmatpush.bf16.msra.mxu0 %v8858_v27  ;;  %v8864_v27 = vld [vmem:[#allocation44_spill] sm:$0xff]  ;;  %v8875_v5 = vld [vmem:[#allocation10_spill] sm:$0xff] }
 0x32b   :  { %2940 = vmatmul.bf16.vlgmr.msrb.gmra.mxu3 %v7777_v14  ;;  %2966 = vmatmul.bf16.vlgmr.msrb.gmra.mxu1 %v7724_v40  ;;  %v8865_v14 = vld [vmem:[#allocation27_spill] sm:$0xff]  ;;  %v2452_v40 = vpop.f32.mrf.mxu1 }
 0x32c   :  { %2997 = vmatpush.bf16.msra.mxu3 %v8825_v3  ;;  %3029 = vmatpush.bf16.msra.mxu1 %v7350_v18  ;;  %v8863_v18 = vld [vmem:[#allocation43_spill] sm:$0xff] }
 0x32d   :  { %3083 = vmatpush.bf16.msrb.mxu2 %v8862_v22  ;;  %v2686_v22 = vpop.f32.mrf.mxu2  ;;  %v8870_v40 = vld [vmem:[#allocation51_spill] sm:$0xff] }
 0x32e   :  { %3038 = vmatpush.bf16.msra.mxu0 %v8863_v18  ;;  %3018 = vmatmul.bf16.vlgmr.msra.gmra.mxu2 %v8865_v14 }
 0x330   :  { %2998 = vmatpush.bf16.msra.mxu3 %v8860_v21  ;;  %3030 = vmatpush.bf16.msra.mxu1 %v8861_v60  ;;  %v8868_v21 = vld [vmem:[#allocation46_spill] sm:$0xff]  ;;  %v8869_v60 = vld [vmem:[#allocation47_spill] sm:$0xff] }
 0x331   :  { %3084 = vmatpush.bf16.msrb.mxu2 %v8867_v20 }
 0x332   :  { %3039 = vmatpush.bf16.msra.mxu0 %v8868_v21  ;;  %v8874_v21 = vld [vmem:[#allocation66_spill] sm:$0xff] }
 0x333   :  { %v2699_v11 = vpop.f32.mrf.mxu1 }
 0x334   :  { %3049 = vmatpush.bf16.msrb.mxu1 %v8864_v27  ;;  %2999 = vmatpush.bf16.msra.mxu3 %v8866_v51 }
 0x335   :  { %3085 = vmatpush.bf16.msrb.mxu2 %v8833_v4 }
 0x336   :  { %3040 = vmatpush.bf16.msra.mxu0 %v8835_v54  ;;  %v8876_v54 = vld [vmem:[#allocation55_spill] sm:$0xff] }
 0x338   :  { %3050 = vmatpush.bf16.msrb.mxu1 %v8869_v60  ;;  %3000 = vmatpush.bf16.msra.mxu3 %v8834_v44  ;;  %v2688_v60 = vpop.f32.mrf.mxu2 }
 0x339   :  { %3086 = vmatpush.bf16.msrb.mxu2 %v8871_v48  ;;  %v8877_v48 = vld [vmem:[#allocation11_spill] sm:$0xff]  ;;  %v2712_v60 = vpop.f32.mrf.mxu0 }
 0x33a   :  { %3041 = vmatpush.bf16.msra.mxu0 %v8872_v43 }
 0x33b   :  { %5046 = vmatmul.msk.bf16.vlgmr.msra.gmra.mxu1 %vm2392_vm3, %v8874_v21 }
 0x33c   :  { %3051 = vmatpush.bf16.msrb.mxu1 %v8836_v1  ;;  %3001 = vmatpush.bf16.msra.mxu3 %v8870_v40  ;;  %v2701_v40 = vpop.f32.mrf.mxu1 }
 0x33d   :  { %3087 = vmatpush.bf16.msrb.mxu2 %v8875_v5  ;;  %v8878_v5 = vld [vmem:[#allocation64_spill] sm:$0xff] }
 0x33e   :  { %3042 = vmatpush.bf16.msra.mxu0 %v8876_v54  ;;  %v8880_v40 = vld [vmem:[#allocation16_spill] sm:$0xff] }
 0x340   :  { %3052 = vmatpush.bf16.msrb.mxu1 %v8873_v15  ;;  %3002 = vmatpush.bf16.msra.mxu3 %v8841_v56  ;;  %v2713_v15 = vadd.f32 %v2712_v60, %v2477_v42  ;;  %v8882_v60 = vld [vmem:[#allocation3_spill] sm:$0xff] }
 0x341   :  { %3088 = vmatpush.bf16.msrb.mxu2 %v8877_v48 }
 0x342   :  { %3043 = vmatpush.bf16.msra.mxu0 %v8844_v23 }
 0x344   :  { %3053 = vmatpush.bf16.msrb.mxu1 %v8843_v30  ;;  %3003 = vmatpush.bf16.msra.mxu3 %v7548_v52  ;;  %v8879_v30 = vld [vmem:[#allocation5_spill] sm:$0xff] }
 0x345   :  { %3044 = vmatmul.bf16.vlgmr.msra.gmra.mxu0 %v8878_v5  ;;  %3089 = vmatpush.bf16.msrb.mxu2 %v8847_v12  ;;  %v2149_v54 = vunpack.c.l.b16 %v8879_v30  ;;  %v2714_v12 = vpop.f32.mrf.mxu0 }
 0x346   :  { %3115 = vmatpush.bf16.msrb.mxu0 %v8846_v26 }
 0x347   :  { %v7829_v42 = vpack.c.b16 %v2149_v54, %v2149_v54 }
 0x348   :  { %3054 = vmatpush.bf16.msrb.mxu1 %v8845_v55  ;;  %3004 = vmatpush.bf16.msra.mxu3 %v8848_v62  ;;  %v2725_v62 = vpop.f32.mrf.mxu1 }
 0x349   :  { %3090 = vmatpush.bf16.msrb.mxu2 %v8880_v40  ;;  %8881 = vst [vmem:[#allocation34_spill] sm:$0xff] %v7829_v42  ;;  %v8884_v40 = vld [vmem:[#allocation20_spill] sm:$0xff] }
 0x34a   :  { %3116 = vmatpush.bf16.msrb.mxu0 %v6963_v57  ;;  %v2673_v57 = vpop.f32.mrf.mxu3 }
 0x34b   :  { %3005 = vmatmul.bf16.vlgmr.msra.gmra.mxu3 %v8878_v5  ;;  %v2674_v5 = vadd.f32 %v2673_v57, %v2438_v0 }
 0x34c   :  { %3055 = vmatpush.bf16.msrb.mxu1 %v7575_v7  ;;  %3068 = vmatpush.bf16.msrb.mxu3 %v7578_v29  ;;  %v2726_v29 = vadd.f32 %v2725_v62, %v2713_v15  ;;  %v8883_v7 = vld [vmem:[#allocation18_spill] sm:$0xff]  ;;  %v8885_v62 = vld [vmem:[#allocation21_spill] sm:$0xff]  ;;  %v2162_v15 = vpop.permute.xlu0 %2161 }
 0x34d   :  { %3154 = vmatpush.bf16.msra.mxu2 %v6988_v2  ;;  %v2687_v54 = vadd.f32 %v2686_v22, %v2674_v5  ;;  %v7846_v0 = vpop.f32.mrf.mxu0  ;;  %v152_v5 = vld [vmem:[%s8556_s6] sm:$0x3]  ;;  %s5529_s6 = smov 24  }
 0x34e   :  { %3135 = vmatpush.bf16.msra.mxu0 %v6998_v45  ;;  %3091 = vmatmul.bf16.vlgmr.msrb.gmra.mxu2 %v7829_v42 }
 0x34f   :  { %v2700_v12 = vadd.f32 %v2699_v11, %v2687_v54 }
 0x350   :  { %3056 = vmatpush.bf16.msrb.mxu1 %v7606_v34  ;;  %3069 = vmatpush.bf16.msrb.mxu3 %v8882_v60  ;;  %v7839_v34 = vpop.f32.mrf.mxu2  ;;  %v2727_v57 = vpop.f32.mrf.mxu1 }
 0x351   :  { %3155 = vmatpush.bf16.msra.mxu2 %v7035_v49  ;;  %v7861_v57 = vperm.slane %v152_v5, 0 }
 0x352   :  { %3136 = vmatpush.bf16.msra.mxu0 %v8884_v40  ;;  %v2675_v22 = vpop.f32.mrf.mxu3 }
 0x353   :  { %3057 = vmatmul.bf16.vlgmr.msrb.gmra.mxu1 %v8865_v14  ;;  %v2160_v14 = vpop.permute.xlu2 %2159  ;;  %v7868_v22 = vperm.slane %v152_v5, 1 }
 0x354   :  { %3096 = vmatpush.bf16.msra.mxu3 %v7008_v53  ;;  %3122 = vmatpush.bf16.msra.mxu1 %v8883_v7  ;;  %v7852_v11 = vsel %vm2081_vm2, %v2160_v14, %v2162_v15 }
 0x355   :  { %3174 = vmatpush.bf16.msrb.mxu2 %v8885_v62  ;;  %8886 = vst [vmem:[#allocation39_spill] sm:$0xff] %v7852_v11  ;;  %5048 = vmatmul.msk.bf16.vlgmr.msrb.gmra.mxu0 %vm2392_vm3, %v7852_v11  ;;  %v2792_v15 = vpop.f32.mrf.mxu0 }
 0x356   :  { %3137 = vmatpush.bf16.msra.mxu0 %v7091_v35 }
 0x358   :  { %3097 = vmatpush.bf16.msra.mxu3 %v7055_v61  ;;  %3123 = vmatpush.bf16.msra.mxu1 %v7070_v10  ;;  %v2766_v54 = vpop.f32.mrf.mxu2 }
 0x359   :  { %3175 = vmatpush.bf16.msrb.mxu2 %v7097_v59  ;;  %v2747_v54 = vadd.f32 %v7861_v57, %v2700_v12  ;;  %v2150_v12 = vunpack.c.h.b16 %v8879_v30 }
 0x35a   :  { %3138 = vmatpush.bf16.msra.mxu0 %v7127_v19  ;;  %v2738_v19 = vpop.f32.mrf.mxu3 }
 0x35b   :  { %5047 = vmatmul.msk.bf16.vlgmr.msrb.gmra.mxu3 %vm2392_vm3, %v8874_v21  ;;  %v2749_v5 = vmax.f32 %v2747_v54, 0.0  ;;  %v2152_v54 = vpack.c.b16 %v2150_v12, %v2150_v12  ;;  %v8890_v12 = vld [vmem:[#allocation38_spill] sm:$0xff] }
 0x35c   :  { %3098 = vmatpush.bf16.msra.mxu3 %v7095_v63  ;;  %3124 = vmatpush.bf16.msra.mxu1 %v7109_v41 }
 0x35d   :  { %3176 = vmatpush.bf16.msrb.mxu2 %v7133_v24  ;;  %v7895_v30 = vsel %vm2081_vm2, %v2152_v54, %v2160_v14  ;;  %v8892_v54 = vld [vmem:[#allocation41_spill] sm:$0xff] }
 0x35e   :  { %3139 = vmatpush.bf16.msra.mxu0 %v7165_v13  ;;  %5049 = vmatmul.msk.bf16.vlgmr.msra.gmra.mxu2 %vm2392_vm3, %v7852_v11  ;;  %8888 = vst [vmem:[#allocation19_spill] sm:$0xff] %v7895_v30  ;;  %v8894_v11 = vld [vmem:[#allocation6_spill] sm:$0xff] }
 0x360   :  { %3099 = vmatpush.bf16.msra.mxu3 %v7131_v37  ;;  %3125 = vmatpush.bf16.msra.mxu1 %v7147_v6  ;;  %v2739_v6 = vadd.f32 %v2738_v19, %v2726_v29  ;;  %v7878_v15 = vpop.f32.mrf.mxu2 }
 0x361   :  { %3177 = vmatpush.bf16.msrb.mxu2 %v7171_v17 }
 0x362   :  { %3140 = vmatpush.bf16.msra.mxu0 %v7207_v46  ;;  %v2748_v21 = vadd.f32 %v7868_v22, %v2739_v6  ;;  %v2740_v29 = vpop.f32.mrf.mxu3  ;;  %v7890_v6 = vpop.f32.mrf.mxu0 }
 0x363   :  { %v8891_v29 = vld [vmem:[#allocation40_spill] sm:$0xff] }
 0x364   :  { %3100 = vmatpush.bf16.msra.mxu3 %v7169_v39  ;;  %3126 = vmatpush.bf16.msra.mxu1 %v7187_v50  ;;  %v2750_v39 = vmax.f32 %v2748_v21, 0.0 }
 0x365   :  { %3178 = vmatpush.bf16.msrb.mxu2 %v8817_v38 }
 0x366   :  { %3141 = vmatpush.bf16.msra.mxu0 %v8819_v47  ;;  %v7885_v19 = vpack.c.bf16 %v2750_v39, %v2749_v5  ;;  %v7898_v39 = vpop.f32.mrf.mxu1  ;;  %v8889_v5 = vld [vmem:[#allocation37_spill] sm:$0xff] }
 0x368   :  { %3101 = vmatpush.bf16.msra.mxu3 %v7214_v36  ;;  %3127 = vmatpush.bf16.msra.mxu1 %v8818_v31  ;;  %8887 = vst [vmem:[#allocation26_spill] sm:$0xff] %v7885_v19  ;;  %v2831_v21 = vpop.f32.mrf.mxu2  ;;  %v8893_v19 = vld [vmem:[#allocation42_spill] sm:$0xff] }
 0x369   :  { %3179 = vmatpush.bf16.msrb.mxu2 %v8855_v58 }
 0x36a   :  { %3142 = vmatpush.bf16.msra.mxu0 %v8856_v25  ;;  %v2818_v14 = vpop.f32.mrf.mxu0  ;;  %v2777_v21 = vpop.f32.mrf.mxu3 }
 0x36c   :  { %3102 = vmatpush.bf16.msra.mxu3 %v7262_v28  ;;  %3128 = vmatpush.bf16.msra.mxu1 %v8854_v16 }
 0x36d   :  { %3143 = vmatmul.bf16.vlgmr.msra.gmra.mxu0 %v7895_v30  ;;  %3180 = vmatpush.bf16.msrb.mxu2 %v8823_v8 }
 0x36e   :  { %3200 = vmatpush.bf16.msrb.mxu0 %v7311_v9 }
 0x370   :  { %3103 = vmatpush.bf16.msra.mxu3 %v8822_v32  ;;  %3129 = vmatpush.bf16.msra.mxu1 %v8824_v33 }
 0x371   :  { %3181 = vmatpush.bf16.msrb.mxu2 %v8891_v29 }
 0x372   :  { %3201 = vmatpush.bf16.msrb.mxu0 %v8890_v12  ;;  %v2805_v12 = vpop.f32.mrf.mxu1 }
 0x373   :  { %3104 = vmatmul.bf16.vlgmr.msra.gmra.mxu3 %v7895_v30  ;;  %3130 = vmatmul.bf16.vlgmr.msra.gmra.mxu1 %v7829_v42  ;;  %v8895_v30 = vld [vmem:[#allocation35_spill] sm:$0xff]  ;;  %v2855_v42 = vpop.f32.mrf.mxu2 }
 0x374   :  { %3161 = vmatpush.bf16.msrb.mxu3 %v8825_v3  ;;  %3193 = vmatpush.bf16.msrb.mxu1 %v8889_v5  ;;  %v2778_v3 = vadd.f32 %v2777_v21, %v7839_v34  ;;  %v2779_v34 = vpop.f32.mrf.mxu3  ;;  %v8898_v21 = vld [vmem:[#allocation49_spill] sm:$0xff] }
 0x375   :  { %3247 = vmatpush.bf16.msra.mxu2 %v8894_v11  ;;  %v8903_v34 = vld [vmem:[#allocation10_spill] sm:$0xff] }
 0x376   :  { %3202 = vmatpush.bf16.msrb.mxu0 %v8863_v18  ;;  %3182 = vmatmul.bf16.vlgmr.msrb.gmra.mxu2 %v8895_v30  ;;  %v2791_v14 = vadd.f32 %v7846_v0, %v2778_v3  ;;  %v8899_v3 = vld [vmem:[#allocation51_spill] sm:$0xff] }
 0x378   :  { %3162 = vmatpush.bf16.msrb.mxu3 %v8892_v54  ;;  %3194 = vmatpush.bf16.msrb.mxu1 %v8893_v19  ;;  %v8896_v54 = vld [vmem:[#allocation46_spill] sm:$0xff]  ;;  %v8897_v19 = vld [vmem:[#allocation47_spill] sm:$0xff] }
 0x379   :  { %3248 = vmatpush.bf16.msra.mxu2 %v8867_v20 }
 0x37a   :  { %3203 = vmatpush.bf16.msrb.mxu0 %v8896_v54  ;;  %v7925_v12 = vpop.f32.mrf.mxu1  ;;  %v8901_v54 = vld [vmem:[#allocation53_spill] sm:$0xff] }
 0x37b   :  { %v2857_v0 = vpop.f32.mrf.mxu2 }
 0x37c   :  { %3213 = vmatpush.bf16.msra.mxu1 %v8864_v27  ;;  %3163 = vmatpush.bf16.msrb.mxu3 %v8866_v51  ;;  %v8900_v51 = vld [vmem:[#allocation9_spill] sm:$0xff]  ;;  %v2881_v0 = vpop.f32.mrf.mxu0 }
 0x37d   :  { %3249 = vmatpush.bf16.msra.mxu2 %v8833_v4 }
 0x37e   :  { %3204 = vmatpush.bf16.msrb.mxu0 %v8898_v21  ;;  %v8904_v21 = vld [vmem:[#allocation55_spill] sm:$0xff] }
 0x380   :  { %3214 = vmatpush.bf16.msra.mxu1 %v8897_v19  ;;  %3164 = vmatpush.bf16.msrb.mxu3 %v8834_v44  ;;  %v8902_v19 = vld [vmem:[#allocation29_spill] sm:$0xff] }
 0x381   :  { %3250 = vmatpush.bf16.msra.mxu2 %v8900_v51 }
 0x382   :  { %3205 = vmatpush.bf16.msrb.mxu0 %v8872_v43  ;;  %v2870_v4 = vpop.f32.mrf.mxu1  ;;  %v8912_v43 = vld [vmem:[#allocation15_spill] sm:$0xff] }
 0x383   :  { %5050 = vmatmul.msk.bf16.vlgmr.msrb.gmra.mxu1 %vm2392_vm3, %v8902_v19  ;;  %v8910_v4 = vld [vmem:[#allocation61_spill] sm:$0xff] }
 0x384   :  { %3215 = vmatpush.bf16.msra.mxu1 %v8836_v1  ;;  %3165 = vmatpush.bf16.msrb.mxu3 %v8899_v3  ;;  %v8905_v1 = vld [vmem:[#allocation56_spill] sm:$0xff] }
 0x385   :  { %3251 = vmatpush.bf16.msra.mxu2 %v8903_v34  ;;  %v8908_v34 = vld [vmem:[#allocation14_spill] sm:$0xff] }
 0x386   :  { %3206 = vmatpush.bf16.msrb.mxu0 %v8904_v21  ;;  %v8909_v21 = vld [vmem:[#allocation13_spill] sm:$0xff] }
 0x388   :  { %3216 = vmatpush.bf16.msra.mxu1 %v8901_v54  ;;  %3166 = vmatpush.bf16.msrb.mxu3 %v8841_v56  ;;  %v8906_v54 = vld [vmem:[#allocation60_spill] sm:$0xff] }
 0x389   :  { %3252 = vmatpush.bf16.msra.mxu2 %v8877_v48  ;;  %v8907_v56 = vld [vmem:[#allocation28_spill] sm:$0xff] }
 0x38a   :  { %3207 = vmatpush.bf16.msrb.mxu0 %v8844_v23  ;;  %v8913_v23 = vld [vmem:[#allocation16_spill] sm:$0xff] }
 0x38c   :  { %3217 = vmatpush.bf16.msra.mxu1 %v8905_v1  ;;  %3167 = vmatpush.bf16.msrb.mxu3 %v7548_v52  ;;  %v2169_v1 = vunpack.c.l.b16 %v8909_v21  ;;  %v8911_v52 = vld [vmem:[#allocation62_spill] sm:$0xff] }
 0x38d   :  { %3208 = vmatmul.bf16.vlgmr.msrb.gmra.mxu0 %v8907_v56  ;;  %3253 = vmatpush.bf16.msra.mxu2 %v8908_v34  ;;  %v8915_v34 = vld [vmem:[#allocation63_spill] sm:$0xff] }
 0x38e   :  { %3279 = vmatpush.bf16.msra.mxu0 %v8846_v26  ;;  %v2894_v26 = vpop.f32.mrf.mxu1  ;;  %v7952_v48 = vpack.c.b16 %v2169_v1, %v2169_v1 }
 0x390   :  { %3218 = vmatpush.bf16.msra.mxu1 %v8845_v55  ;;  %3168 = vmatpush.bf16.msrb.mxu3 %v8906_v54  ;;  %v2883_v55 = vpop.f32.mrf.mxu0  ;;  %v2842_v54 = vpop.f32.mrf.mxu3  ;;  %8914 = vst [vmem:[#allocation4_spill] sm:$0xff] %v7952_v48 }
 0x391   :  { %3254 = vmatpush.bf16.msra.mxu2 %v8913_v23  ;;  %v7962_v55 = vpop.f32.mrf.mxu2  ;;  %v2843_v1 = vadd.f32 %v2842_v54, %v2791_v14  ;;  %v2182_v54 = vpop.permute.xlu2 %2181 }
 0x392   :  { %3280 = vmatpush.bf16.msra.mxu0 %v8912_v43 }
 0x393   :  { %3169 = vmatmul.bf16.vlgmr.msrb.gmra.mxu3 %v8907_v56 }
 0x394   :  { %3219 = vmatpush.bf16.msra.mxu1 %v8910_v4  ;;  %3232 = vmatpush.bf16.msra.mxu3 %v8911_v52 }
 0x395   :  { %3318 = vmatpush.bf16.msrb.mxu2 %v6988_v2  ;;  %v2856_v2 = vadd.f32 %v2855_v42, %v2843_v1  ;;  %v8918_v1 = vld [vmem:[#allocation24_spill] sm:$0xff] }
 0x396   :  { %3299 = vmatpush.bf16.msrb.mxu0 %v6998_v45  ;;  %3255 = vmatmul.bf16.vlgmr.msra.gmra.mxu2 %v7952_v48  ;;  %v2896_v56 = vpop.f32.mrf.mxu1 }
 0x397   :  { %v2869_v42 = vadd.f32 %v7925_v12, %v2856_v2 }
 0x398   :  { %3220 = vmatpush.bf16.msra.mxu1 %v8915_v34  ;;  %3233 = vmatpush.bf16.msra.mxu3 %v8882_v60 }
 0x399   :  { %3319 = vmatpush.bf16.msrb.mxu2 %v7035_v49 }
 0x39a   :  { %3300 = vmatpush.bf16.msrb.mxu0 %v8884_v40  ;;  %v7971_v40 = vpop.f32.mrf.mxu0 }
 0x39b   :  { %3221 = vmatmul.bf16.vlgmr.msra.gmra.mxu1 %v8895_v30  ;;  %v2844_v30 = vpop.f32.mrf.mxu3 }
 0x39c   :  { %3260 = vmatpush.bf16.msrb.mxu3 %v7008_v53  ;;  %3286 = vmatpush.bf16.msrb.mxu1 %v8883_v7  ;;  %v2817_v7 = vadd.f32 %v7890_v6, %v7898_v39  ;;  %v2180_v53 = vpop.permute.xlu1 %2179  ;;  %v8917_v6 = vld [vmem:[#allocation23_spill] sm:$0xff]  ;;  %v2930_v39 = vpop.f32.mrf.mxu2 }
 0x39d   :  { %3338 = vmatpush.bf16.msra.mxu2 %v8885_v62  ;;  %v7977_v14 = vsel %vm2081_vm2, %v2180_v53, %v2182_v54  ;;  %v2911_v54 = vadd.f32 %v2869_v42, %v7861_v57  ;;  %v8919_v39 = vld [vmem:[#allocation25_spill] sm:$0xff] }
 0x39e   :  { %3301 = vmatpush.bf16.msrb.mxu0 %v7091_v35  ;;  %8916 = vst [vmem:[#allocation31_spill] sm:$0xff] %v7977_v14  ;;  %v2830_v56 = vadd.f32 %v7878_v15, %v2817_v7 }
 0x39f   :  { %5052 = vmatmul.msk.bf16.vlgmr.msra.gmra.mxu0 %vm2392_vm3, %v7977_v14 }
 0x3a0   :  { %3261 = vmatpush.bf16.msrb.mxu3 %v7055_v61  ;;  %3287 = vmatpush.bf16.msrb.mxu1 %v7070_v10  ;;  %v2882_v30 = vadd.f32 %v2881_v0, %v2830_v56 }
 0x3a1   :  { %3339 = vmatpush.bf16.msra.mxu2 %v7097_v59 }
 0x3a2   :  { %3302 = vmatpush.bf16.msrb.mxu0 %v8917_v6  ;;  %v2895_v59 = vadd.f32 %v2894_v26, %v2882_v30  ;;  %v2956_v7 = vpop.f32.mrf.mxu0 }
 0x3a3   :  { %5051 = vmatmul.msk.bf16.vlgmr.msra.gmra.mxu3 %vm2392_vm3, %v8902_v19  ;;  %v2907_v15 = vpop.f32.mrf.mxu3  ;;  %v2913_v19 = vmax.f32 %v2911_v54, 0.0 }
 0x3a4   :  { %3262 = vmatpush.bf16.msrb.mxu3 %v7095_v63  ;;  %3288 = vmatpush.bf16.msrb.mxu1 %v7109_v41  ;;  %v2908_v0 = vadd.f32 %v2907_v15, %v2895_v59  ;;  %v7998_v26 = vpop.f32.mrf.mxu2  ;;  %v2170_v59 = vunpack.c.h.b16 %v8909_v21 }
 0x3a5   :  { %3340 = vmatpush.bf16.msra.mxu2 %v7133_v24 }
 0x3a6   :  { %3303 = vmatpush.bf16.msrb.mxu0 %v7165_v13  ;;  %5053 = vmatmul.msk.bf16.vlgmr.msrb.gmra.mxu2 %vm2392_vm3, %v7977_v14  ;;  %v2912_v2 = vadd.f32 %v2908_v0, %v7868_v22  ;;  %v2172_v54 = vpack.c.b16 %v2170_v59, %v2170_v59  ;;  %v8921_v59 = vld [vmem:[#allocation36_spill] sm:$0xff]  ;;  %v8927_v14 = vld [vmem:[#allocation46_spill] sm:$0xff] }
 0x3a8   :  { %3263 = vmatpush.bf16.msrb.mxu3 %v7131_v37  ;;  %3289 = vmatpush.bf16.msrb.mxu1 %v8918_v1  ;;  %v2914_v12 = vmax.f32 %v2912_v2, 0.0  ;;  %v8012_v21 = vpop.f32.mrf.mxu1 }
 0x3a9   :  { %3341 = vmatpush.bf16.msra.mxu2 %v7171_v17 }
 0x3aa   :  { %3304 = vmatpush.bf16.msrb.mxu0 %v7207_v46  ;;  %v2915_v56 = vpack.c.bf16 %v2914_v12, %v2913_v19  ;;  %v8006_v42 = vpop.f32.mrf.mxu0  ;;  %v8015_v19 = vsel %vm2081_vm2, %v2172_v54, %v2180_v53  ;;  %v8924_v54 = vld [vmem:[#allocation42_spill] sm:$0xff] }
 0x3ab   :  { %v2909_v30 = vpop.f32.mrf.mxu3  ;;  %8920 = vst [vmem:[#allocation30_spill] sm:$0xff] %v8015_v19 }
 0x3ac   :  { %3264 = vmatpush.bf16.msrb.mxu3 %v8919_v39  ;;  %3290 = vmatpush.bf16.msrb.mxu1 %v7187_v50  ;;  %v3743_v7 = vunpack.c.h.b16 %v2915_v56  ;;  %v3742_v15 = vunpack.c.l.b16 %v2915_v56  ;;  %v2995_v2 = vpop.f32.mrf.mxu2  ;;  %v8922_v56 = vld [vmem:[#allocation38_spill] sm:$0xff] }
 0x3ad   :  { %3342 = vmatpush.bf16.msra.mxu2 %v8817_v38 }
 0x3ae   :  { %3305 = vmatpush.bf16.msrb.mxu0 %v8819_v47  ;;  %v3745_v0 = vpack.c.b16 %v3743_v7, %v3743_v7  ;;  %v3744_v12 = vpack.c.b16 %v3742_v15, %v3742_v15  ;;  %v8923_v7 = vld [vmem:[#allocation41_spill] sm:$0xff] }
 0x3b0   :  { %3265 = vmatpush.bf16.msrb.mxu3 %v7214_v36  ;;  %3291 = vmatpush.bf16.msrb.mxu1 %v8818_v31 }
 0x3b1   :  { %3343 = vmatpush.bf16.msra.mxu2 %v8855_v58  ;;  %3748 = vrot.lane.b32.xlu0 %v3745_v0, %s5527_s3  ;;  %v2969_v0 = vpop.f32.mrf.mxu1 }
 0x3b2   :  { %3306 = vmatpush.bf16.msrb.mxu0 %v8856_v25  ;;  %3746 = vrot.lane.b32.xlu2 %v3744_v12, %s5527_s3  ;;  %v2982_v53 = vpop.f32.mrf.mxu0  ;;  %v8925_v12 = vld [vmem:[#allocation19_spill] sm:$0xff]  ;;  %v8929_v0 = vld [vmem:[#allocation8_spill] sm:$0xff]  ;;  %s5530_s3 = smov 36  }
 0x3b3   :  { %v2941_v30 = vpop.f32.mrf.mxu3  ;;  %v8926_v53 = vld [vmem:[#allocation45_spill] sm:$0xff] }
 0x3b4   :  { %3266 = vmatpush.bf16.msrb.mxu3 %v7262_v28  ;;  %3292 = vmatpush.bf16.msrb.mxu1 %v8854_v16  ;;  %v2942_v15 = vadd.f32 %v2941_v30, %v7962_v55  ;;  %v8928_v55 = vld [vmem:[#allocation47_spill] sm:$0xff] }
 0x3b5   :  { %3307 = vmatmul.bf16.vlgmr.msrb.gmra.mxu0 %v8015_v19  ;;  %3344 = vmatpush.bf16.msra.mxu2 %v8823_v8 }
 0x3b6   :  { %3364 = vmatpush.bf16.msra.mxu0 %v7311_v9  ;;  %v2955_v2 = vadd.f32 %v7971_v40, %v2942_v15 }
 0x3b8   :  { %3267 = vmatpush.bf16.msrb.mxu3 %v8822_v32  ;;  %3293 = vmatpush.bf16.msrb.mxu1 %v8824_v33 }
 0x3b9   :  { %3345 = vmatpush.bf16.msra.mxu2 %v8891_v29  ;;  %v8045_v40 = vpop.f32.mrf.mxu1 }
 0x3ba   :  { %3365 = vmatpush.bf16.msra.mxu0 %v8922_v56 }
 0x3bb   :  { %3268 = vmatmul.bf16.vlgmr.msrb.gmra.mxu3 %v8015_v19  ;;  %3294 = vmatmul.bf16.vlgmr.msrb.gmra.mxu1 %v7952_v48  ;;  %v3019_v48 = vpop.f32.mrf.mxu2  ;;  %v2943_v30 = vpop.f32.mrf.mxu3  ;;  %v8930_v19 = vld [vmem:[#allocation49_spill] sm:$0xff] }
 0x3bc   :  { %3325 = vmatpush.bf16.msra.mxu3 %v8921_v59  ;;  %3357 = vmatpush.bf16.msra.mxu1 %v8889_v5  ;;  %v8934_v30 = vld [vmem:[#allocation39_spill] sm:$0xff] }
 0x3bd   :  { %3411 = vmatpush.bf16.msrb.mxu2 %v8894_v11 }
 0x3be   :  { %3366 = vmatpush.bf16.msra.mxu0 %v8863_v18  ;;  %3346 = vmatmul.bf16.vlgmr.msra.gmra.mxu2 %v8925_v12  ;;  %v8944_v18 = vld [vmem:[#allocation60_spill] sm:$0xff] }
 0x3c0   :  { %3326 = vmatpush.bf16.msra.mxu3 %v8923_v7  ;;  %3358 = vmatpush.bf16.msra.mxu1 %v8924_v54 }
 0x3c1   :  { %3412 = vmatpush.bf16.msrb.mxu2 %v8867_v20  ;;  %v8932_v20 = vld [vmem:[#allocation52_spill] sm:$0xff] }
 0x3c2   :  { %3367 = vmatpush.bf16.msra.mxu0 %v8927_v14  ;;  %v8933_v14 = vld [vmem:[#allocation53_spill] sm:$0xff] }
 0x3c3   :  { %v3021_v15 = vpop.f32.mrf.mxu2 }
 0x3c4   :  { %3377 = vmatpush.bf16.msrb.mxu1 %v8864_v27  ;;  %3327 = vmatpush.bf16.msra.mxu3 %v8926_v53  ;;  %v8931_v27 = vld [vmem:[#allocation50_spill] sm:$0xff]  ;;  %v3045_v15 = vpop.f32.mrf.mxu0  ;;  %v8943_v53 = vld [vmem:[#allocation12_spill] sm:$0xff] }
 0x3c5   :  { %3413 = vmatpush.bf16.msrb.mxu2 %v8929_v0  ;;  %v8936_v0 = vld [vmem:[#allocation10_spill] sm:$0xff] }
 0x3c6   :  { %3368 = vmatpush.bf16.msra.mxu0 %v8930_v19  ;;  %v8937_v19 = vld [vmem:[#allocation55_spill] sm:$0xff] }
 0x3c8   :  { %3378 = vmatpush.bf16.msrb.mxu1 %v8928_v55  ;;  %3328 = vmatpush.bf16.msra.mxu3 %v8834_v44  ;;  %v8935_v44 = vld [vmem:[#allocation54_spill] sm:$0xff]  ;;  %v3034_v55 = vpop.f32.mrf.mxu1 }
 0x3c9   :  { %3414 = vmatpush.bf16.msrb.mxu2 %v8900_v51  ;;  %v8940_v51 = vld [vmem:[#allocation11_spill] sm:$0xff] }
 0x3ca   :  { %3369 = vmatpush.bf16.msra.mxu0 %v8932_v20  ;;  %v8941_v20 = vld [vmem:[#allocation58_spill] sm:$0xff] }
 0x3cb   :  { %5054 = vmatmul.msk.bf16.vlgmr.msra.gmra.mxu1 %vm2392_vm3, %v8934_v30 }
 0x3cc   :  { %3379 = vmatpush.bf16.msrb.mxu1 %v8931_v27  ;;  %3329 = vmatpush.bf16.msra.mxu3 %v8899_v3  ;;  %v8938_v27 = vld [vmem:[#allocation56_spill] sm:$0xff]  ;;  %v8939_v3 = vld [vmem:[#allocation57_spill] sm:$0xff]  ;;  %v3047_v55 = vpop.f32.mrf.mxu0 }
 0x3cd   :  { %3415 = vmatpush.bf16.msrb.mxu2 %v8936_v0  ;;  %v8946_v0 = vld [vmem:[#allocation14_spill] sm:$0xff] }
 0x3ce   :  { %3370 = vmatpush.bf16.msra.mxu0 %v8937_v19  ;;  %v8947_v19 = vld [vmem:[#allocation65_spill] sm:$0xff] }
 0x3d0   :  { %3380 = vmatpush.bf16.msrb.mxu1 %v8933_v14  ;;  %3330 = vmatpush.bf16.msra.mxu3 %v8935_v44  ;;  %v8942_v14 = vld [vmem:[#allocation59_spill] sm:$0xff]  ;;  %v8945_v44 = vld [vmem:[#allocation34_spill] sm:$0xff] }
 0x3d1   :  { %3416 = vmatpush.bf16.msrb.mxu2 %v8940_v51  ;;  %v8082_v55 = vpop.f32.mrf.mxu2 }
 0x3d2   :  { %3371 = vmatpush.bf16.msra.mxu0 %v8941_v20 }
 0x3d4   :  { %3381 = vmatpush.bf16.msrb.mxu1 %v8938_v27  ;;  %3331 = vmatpush.bf16.msra.mxu3 %v8939_v3  ;;  %v2189_v27 = vunpack.c.l.b16 %v8947_v19 }
 0x3d5   :  { %3372 = vmatmul.bf16.vlgmr.msra.gmra.mxu0 %v8945_v44  ;;  %3417 = vmatpush.bf16.msrb.mxu2 %v8946_v0 }
 0x3d6   :  { %3443 = vmatpush.bf16.msrb.mxu0 %v8943_v53  ;;  %v3058_v53 = vpop.f32.mrf.mxu1 }
 0x3d8   :  { %3382 = vmatpush.bf16.msrb.mxu1 %v8942_v14  ;;  %3332 = vmatpush.bf16.msra.mxu3 %v8944_v18  ;;  %v3006_v18 = vpop.f32.mrf.mxu3  ;;  %v8072_v14 = vpack.c.b16 %v2189_v27, %v2189_v27 }
 0x3d9   :  { %3418 = vmatpush.bf16.msrb.mxu2 %v8913_v23  ;;  %v3007_v27 = vadd.f32 %v3006_v18, %v2955_v2  ;;  %v8953_v2 = vld [vmem:[#allocation22_spill] sm:$0xff] }
 0x3da   :  { %3444 = vmatpush.bf16.msrb.mxu0 %v8912_v43  ;;  %8948 = vst [vmem:[#allocation32_spill] sm:$0xff] %v8072_v14  ;;  %v8951_v43 = vld [vmem:[#allocation18_spill] sm:$0xff] }
 0x3db   :  { %3333 = vmatmul.bf16.vlgmr.msra.gmra.mxu3 %v8945_v44  ;;  %v8952_v44 = vld [vmem:[#allocation20_spill] sm:$0xff]  ;;  %v3020_v18 = vadd.f32 %v3019_v48, %v3007_v27 }
 0x3dc   :  { %3383 = vmatpush.bf16.msrb.mxu1 %v8910_v4  ;;  %3396 = vmatpush.bf16.msrb.mxu3 %v8911_v52  ;;  %v8949_v4 = vld [vmem:[#allocation17_spill] sm:$0xff]  ;;  %v8950_v52 = vld [vmem:[#allocation2_spill] sm:$0xff] }
 0x3dd   :  { %3482 = vmatpush.bf16.msra.mxu2 %v8949_v4  ;;  %v2200_v4 = vpop.permute.xlu0 %2199  ;;  %v3033_v48 = vadd.f32 %v8045_v40, %v3020_v18  ;;  %v2190_v18 = vunpack.c.h.b16 %v8947_v19 }
 0x3de   :  { %3463 = vmatpush.bf16.msra.mxu0 %v6998_v45  ;;  %3419 = vmatmul.bf16.vlgmr.msrb.gmra.mxu2 %v8072_v14 }
 0x3e0   :  { %3384 = vmatpush.bf16.msrb.mxu1 %v8915_v34  ;;  %3397 = vmatpush.bf16.msrb.mxu3 %v8882_v60  ;;  %v2202_v60 = vpop.permute.xlu1 %2201 }
 0x3e1   :  { %3483 = vmatpush.bf16.msra.mxu2 %v7035_v49 }
 0x3e2   :  { %3464 = vmatpush.bf16.msra.mxu0 %v8952_v44  ;;  %v8091_v44 = vpop.f32.mrf.mxu0 }
 0x3e3   :  { %3385 = vmatmul.bf16.vlgmr.msrb.gmra.mxu1 %v8925_v12  ;;  %v3008_v12 = vpop.f32.mrf.mxu3 }
 0x3e4   :  { %3424 = vmatpush.bf16.msra.mxu3 %v8950_v52  ;;  %3450 = vmatpush.bf16.msra.mxu1 %v8951_v43  ;;  %v3060_v52 = vpop.f32.mrf.mxu1  ;;  %v2981_v43 = vadd.f32 %v8006_v42, %v8012_v21  ;;  %v3094_v42 = vpop.f32.mrf.mxu2 }
 0x3e5   :  { %3502 = vmatpush.bf16.msrb.mxu2 %v8885_v62  ;;  %v8097_v62 = vsel %vm2081_vm2, %v2200_v4, %v2202_v60 }
 0x3e6   :  { %3465 = vmatpush.bf16.msra.mxu0 %v7091_v35  ;;  %8954 = vst [vmem:[#allocation27_spill] sm:$0xff] %v8097_v62  ;;  %v2994_v52 = vadd.f32 %v7998_v26, %v2981_v43  ;;  %v3075_v26 = vadd.f32 %v3033_v48, %v7861_v57 }
 0x3e7   :  { %5056 = vmatmul.msk.bf16.vlgmr.msrb.gmra.mxu0 %vm2392_vm3, %v8097_v62 }
 0x3e8   :  { %3425 = vmatpush.bf16.msra.mxu3 %v7055_v61  ;;  %3451 = vmatpush.bf16.msra.mxu1 %v7070_v10  ;;  %v3046_v21 = vadd.f32 %v3045_v15, %v2994_v52 }
 0x3e9   :  { %3503 = vmatpush.bf16.msrb.mxu2 %v8953_v2 }
 0x3ea   :  { %3466 = vmatpush.bf16.msra.mxu0 %v8917_v6  ;;  %v3059_v27 = vadd.f32 %v3058_v53, %v3046_v21  ;;  %v3120_v43 = vpop.f32.mrf.mxu0 }
 0x3eb   :  { %5055 = vmatmul.msk.bf16.vlgmr.msrb.gmra.mxu3 %vm2392_vm3, %v8934_v30  ;;  %v3071_v60 = vpop.f32.mrf.mxu3  ;;  %v3077_v30 = vmax.f32 %v3075_v26, 0.0  ;;  %v2192_v43 = vpack.c.b16 %v2190_v18, %v2190_v18 }
 0x3ec   :  { %3426 = vmatpush.bf16.msra.mxu3 %v7095_v63  ;;  %3452 = vmatpush.bf16.msra.mxu1 %v7109_v41  ;;  %v3072_v15 = vadd.f32 %v3071_v60, %v3059_v27  ;;  %v8118_v40 = vpop.f32.mrf.mxu2 }
 0x3ed   :  { %3504 = vmatpush.bf16.msrb.mxu2 %v7133_v24 }
 0x3ee   :  { %3467 = vmatpush.bf16.msra.mxu0 %v7165_v13  ;;  %5057 = vmatmul.msk.bf16.vlgmr.msra.gmra.mxu2 %vm2392_vm3, %v8097_v62  ;;  %v3076_v53 = vadd.f32 %v3072_v15, %v7868_v22  ;;  %v8135_v15 = vsel %vm2081_vm2, %v2192_v43, %v2200_v4  ;;  %v8958_v43 = vld [vmem:[#allocation45_spill] sm:$0xff] }
 0x3f0   :  { %3427 = vmatpush.bf16.msra.mxu3 %v7131_v37  ;;  %3453 = vmatpush.bf16.msra.mxu1 %v8918_v1  ;;  %v3078_v12 = vmax.f32 %v3076_v53, 0.0  ;;  %v8132_v19 = vpop.f32.mrf.mxu1 }
 0x3f1   :  { %3505 = vmatpush.bf16.msrb.mxu2 %v7171_v17 }
 0x3f2   :  { %3468 = vmatpush.bf16.msra.mxu0 %v7207_v46  ;;  %v3079_v52 = vpack.c.bf16 %v3078_v12, %v3077_v30  ;;  %v8126_v21 = vpop.f32.mrf.mxu0 }
 0x3f3   :  { %v3073_v42 = vpop.f32.mrf.mxu3 }
 0x3f4   :  { %3428 = vmatpush.bf16.msra.mxu3 %v8919_v39  ;;  %3454 = vmatpush.bf16.msra.mxu1 %v7187_v50  ;;  %v3753_v48 = vunpack.c.h.b16 %v3079_v52  ;;  %v3752_v27 = vunpack.c.l.b16 %v3079_v52  ;;  %v3159_v26 = vpop.f32.mrf.mxu2  ;;  %v8955_v52 = vld [vmem:[#allocation43_spill] sm:$0xff]  ;;  %v8956_v42 = vld [vmem:[#allocation44_spill] sm:$0xff] }
 0x3f5   :  { %3506 = vmatpush.bf16.msrb.mxu2 %v8817_v38  ;;  %v8959_v26 = vld [vmem:[#allocation7_spill] sm:$0xff] }
 0x3f6   :  { %3469 = vmatpush.bf16.msra.mxu0 %v8819_v47  ;;  %v3755_v60 = vpack.c.b16 %v3753_v48, %v3753_v48  ;;  %v3754_v53 = vpack.c.b16 %v3752_v27, %v3752_v27  ;;  %v8957_v27 = vld [vmem:[#allocation30_spill] sm:$0xff] }
 0x3f8   :  { %3429 = vmatpush.bf16.msra.mxu3 %v7214_v36  ;;  %3455 = vmatpush.bf16.msra.mxu1 %v8818_v31  ;;  %v3133_v18 = vpop.f32.mrf.mxu1 }
 0x3f9   :  { %3507 = vmatpush.bf16.msrb.mxu2 %v8855_v58  ;;  %3758 = vrot.lane.b32.xlu2 %v3755_v60, %s5529_s6  ;;  %v8964_v18 = vld [vmem:[#allocation49_spill] sm:$0xff] }
 0x3fa   :  { %3470 = vmatpush.bf16.msra.mxu0 %v8856_v25  ;;  %3756 = vrot.lane.b32.xlu1 %v3754_v53, %s5529_s6  ;;  %v3146_v4 = vpop.f32.mrf.mxu0  ;;  %v8960_v53 = vld [vmem:[#allocation46_spill] sm:$0xff] }
 0x3fb   :  { %v3105_v30 = vpop.f32.mrf.mxu3 }
 0x3fc   :  { %3430 = vmatpush.bf16.msra.mxu3 %v7262_v28  ;;  %3456 = vmatpush.bf16.msra.mxu1 %v8854_v16  ;;  %v3106_v12 = vadd.f32 %v3105_v30, %v8082_v55  ;;  %v3183_v60 = vpop.f32.mrf.mxu2  ;;  %v8961_v55 = vld [vmem:[#allocation47_spill] sm:$0xff]  ;;  %v8963_v30 = vld [vmem:[#allocation8_spill] sm:$0xff] }
 0x3fd   :  { %3471 = vmatmul.bf16.vlgmr.msra.gmra.mxu0 %v8135_v15  ;;  %3508 = vmatpush.bf16.msrb.mxu2 %v8823_v8 }
 0x3fe   :  { %3528 = vmatpush.bf16.msrb.mxu0 %v7311_v9  ;;  %v3119_v48 = vadd.f32 %v8091_v44, %v3106_v12  ;;  %v8966_v12 = vld [vmem:[#allocation51_spill] sm:$0xff] }
 0x400   :  { %3431 = vmatpush.bf16.msra.mxu3 %v8822_v32  ;;  %3457 = vmatpush.bf16.msra.mxu1 %v8824_v33  ;;  %v3196_v44 = vpop.f32.mrf.mxu1 }
 0x401   :  { %3509 = vmatpush.bf16.msrb.mxu2 %v8891_v29 }
 0x402   :  { %3529 = vmatpush.bf16.msrb.mxu0 %v8922_v56 }
 0x403   :  { %3458 = vmatmul.bf16.vlgmr.msra.gmra.mxu1 %v8072_v14  ;;  %3432 = vmatmul.bf16.vlgmr.msra.gmra.mxu3 %v8135_v15  ;;  %v3107_v4 = vpop.f32.mrf.mxu3  ;;  %v8965_v14 = vld [vmem:[#allocation50_spill] sm:$0xff] }
 0x404   :  { %3489 = vmatpush.bf16.msrb.mxu3 %v8921_v59  ;;  %3521 = vmatpush.bf16.msrb.mxu1 %v8889_v5  ;;  %v3185_v62 = vpop.f32.mrf.mxu2  ;;  %v8971_v4 = vld [vmem:[#allocation54_spill] sm:$0xff] }
 0x405   :  { %3574 = vmatpush.bf16.msra.mxu2 %v8894_v11  ;;  %v8962_v11 = vld [vmem:[#allocation48_spill] sm:$0xff] }
 0x406   :  { %3530 = vmatpush.bf16.msrb.mxu0 %v8955_v52  ;;  %3510 = vmatmul.bf16.vlgmr.msrb.gmra.mxu2 %v8957_v27 }
 0x408   :  { %3490 = vmatpush.bf16.msrb.mxu3 %v8923_v7  ;;  %3522 = vmatpush.bf16.msrb.mxu1 %v8924_v54 }
 0x409   :  { %3575 = vmatpush.bf16.msra.mxu2 %v8959_v26  ;;  %v8968_v26 = vld [vmem:[#allocation52_spill] sm:$0xff] }
 0x40a   :  { %3531 = vmatpush.bf16.msrb.mxu0 %v8960_v53  ;;  %v8969_v53 = vld [vmem:[#allocation53_spill] sm:$0xff]  ;;  %v3209_v62 = vpop.f32.mrf.mxu0 }
 0x40c   :  { %3541 = vmatpush.bf16.msra.mxu1 %v8956_v42  ;;  %3491 = vmatpush.bf16.msrb.mxu3 %v8958_v43  ;;  %v8967_v43 = vld [vmem:[#allocation9_spill] sm:$0xff] }
 0x40d   :  { %3576 = vmatpush.bf16.msra.mxu2 %v8963_v30  ;;  %v8972_v30 = vld [vmem:[#allocation10_spill] sm:$0xff] }
 0x40e   :  { %3532 = vmatpush.bf16.msrb.mxu0 %v8964_v18  ;;  %v8973_v18 = vld [vmem:[#allocation55_spill] sm:$0xff] }
 0x410   :  { %3542 = vmatpush.bf16.msra.mxu1 %v8961_v55  ;;  %3492 = vmatpush.bf16.msrb.mxu3 %v8962_v11  ;;  %v8970_v55 = vld [vmem:[#allocation31_spill] sm:$0xff]  ;;  %v3198_v11 = vpop.f32.mrf.mxu1 }
 0x411   :  { %3577 = vmatpush.bf16.msra.mxu2 %v8967_v43  ;;  %v8975_v43 = vld [vmem:[#allocation59_spill] sm:$0xff]  ;;  %v8980_v11 = vld [vmem:[#allocation61_spill] sm:$0xff] }
 0x412   :  { %3533 = vmatpush.bf16.msrb.mxu0 %v8968_v26  ;;  %v8977_v26 = vld [vmem:[#allocation60_spill] sm:$0xff] }
 0x413   :  { %5058 = vmatmul.msk.bf16.vlgmr.msrb.gmra.mxu1 %vm2392_vm3, %v8970_v55 }
 0x414   :  { %3543 = vmatpush.bf16.msra.mxu1 %v8965_v14  ;;  %3493 = vmatpush.bf16.msrb.mxu3 %v8966_v12  ;;  %v8974_v14 = vld [vmem:[#allocation56_spill] sm:$0xff] }
 0x415   :  { %3578 = vmatpush.bf16.msra.mxu2 %v8972_v30  ;;  %v8979_v30 = vld [vmem:[#allocation33_spill] sm:$0xff] }
 0x416   :  { %3534 = vmatpush.bf16.msrb.mxu0 %v8973_v18  ;;  %v8982_v18 = vld [vmem:[#allocation15_spill] sm:$0xff] }
 0x418   :  { %3544 = vmatpush.bf16.msra.mxu1 %v8969_v53  ;;  %3494 = vmatpush.bf16.msrb.mxu3 %v8971_v4  ;;  %v8976_v53 = vld [vmem:[#allocation12_spill] sm:$0xff] }
 0x419   :  { %3579 = vmatpush.bf16.msra.mxu2 %v8940_v51  ;;  %v8978_v4 = vld [vmem:[#allocation4_spill] sm:$0xff]  ;;  %v3211_v51 = vpop.f32.mrf.mxu0 }
 0x41a   :  { %3535 = vmatpush.bf16.msrb.mxu0 %v8941_v20 }
 0x41c   :  { %3545 = vmatpush.bf16.msra.mxu1 %v8974_v14  ;;  %3495 = vmatpush.bf16.msrb.mxu3 %v8939_v3  ;;  %v2209_v14 = vunpack.c.l.b16 %v8979_v30  ;;  %v8981_v3 = vld [vmem:[#allocation62_spill] sm:$0xff] }
 0x41d   :  { %3536 = vmatmul.bf16.vlgmr.msrb.gmra.mxu0 %v8978_v4  ;;  %3580 = vmatpush.bf16.msra.mxu2 %v8946_v0  ;;  %v8983_v0 = vld [vmem:[#allocation3_spill] sm:$0xff] }
 0x41e   :  { %3606 = vmatpush.bf16.msra.mxu0 %v8976_v53  ;;  %v3222_v53 = vpop.f32.mrf.mxu1 }
 0x420   :  { %3546 = vmatpush.bf16.msra.mxu1 %v8975_v43  ;;  %3496 = vmatpush.bf16.msrb.mxu3 %v8977_v26  ;;  %v3170_v26 = vpop.f32.mrf.mxu3  ;;  %v8188_v43 = vpack.c.b16 %v2209_v14, %v2209_v14 }
 0x421   :  { %3581 = vmatpush.bf16.msra.mxu2 %v8913_v23  ;;  %v8198_v23 = vpop.f32.mrf.mxu2  ;;  %v3171_v14 = vadd.f32 %v3170_v26, %v3119_v48  ;;  %v8207_v51 = vpop.f32.mrf.mxu0 }
 0x422   :  { %3607 = vmatpush.bf16.msra.mxu0 %v8982_v18  ;;  %v8986_v18 = vld [vmem:[#allocation18_spill] sm:$0xff] }
 0x423   :  { %3497 = vmatmul.bf16.vlgmr.msrb.gmra.mxu3 %v8978_v4  ;;  %v8988_v4 = vld [vmem:[#allocation21_spill] sm:$0xff] }
 0x424   :  { %3547 = vmatpush.bf16.msra.mxu1 %v8980_v11  ;;  %3560 = vmatpush.bf16.msra.mxu3 %v8981_v3  ;;  %v8984_v11 = vld [vmem:[#allocation17_spill] sm:$0xff]  ;;  %v8985_v3 = vld [vmem:[#allocation2_spill] sm:$0xff] }
 0x425   :  { %3645 = vmatpush.bf16.msrb.mxu2 %v8984_v11  ;;  %v3145_v11 = vadd.f32 %v8126_v21, %v8132_v19 }
 0x426   :  { %3626 = vmatpush.bf16.msrb.mxu0 %v6998_v45  ;;  %3582 = vmatmul.bf16.vlgmr.msra.gmra.mxu2 %v8188_v43  ;;  %v8987_v45 = vld [vmem:[#allocation20_spill] sm:$0xff] }
 0x428   :  { %3548 = vmatpush.bf16.msra.mxu1 %v8915_v34  ;;  %3561 = vmatpush.bf16.msra.mxu3 %v8983_v0 }
 0x429   :  { %3646 = vmatpush.bf16.msrb.mxu2 %v7035_v49  ;;  %v3158_v49 = vadd.f32 %v8118_v40, %v3145_v11  ;;  %v9002_v11 = vld [vmem:[#allocation57_spill] sm:$0xff] }
 0x42a   :  { %3627 = vmatpush.bf16.msrb.mxu0 %v8987_v45  ;;  %v8999_v45 = vld [vmem:[#allocation54_spill] sm:$0xff] }
 0x42b   :  { %3549 = vmatmul.bf16.vlgmr.msra.gmra.mxu1 %v8957_v27  ;;  %v3172_v27 = vpop.f32.mrf.mxu3  ;;  %v3210_v21 = vadd.f32 %v3209_v62, %v3158_v49  ;;  %v5452_v62 = vld [vmem:[%s8557_s7 + $0x18] sm:$0xff]  ;;  %v5471_v49 = vld [vmem:[%s8557_s7 + $0xb0] sm:$0xff] }
 0x42c   :  { %3587 = vmatpush.bf16.msrb.mxu3 %v8985_v3  ;;  %3613 = vmatpush.bf16.msrb.mxu1 %v8986_v18  ;;  %v3224_v3 = vpop.f32.mrf.mxu1  ;;  %v3184_v18 = vadd.f32 %v3183_v60, %v3171_v14  ;;  %v8994_v60 = vld [vmem:[#allocation49_spill] sm:$0xff]  ;;  %v9001_v14 = vld [vmem:[#allocation56_spill] sm:$0xff]  ;;  %v5450_v27 = vld [vmem:[%s8557_s7 + $0x8] sm:$0xff] }
 0x42d   :  { %3665 = vmatpush.bf16.msra.mxu2 %v8988_v4  ;;  %v5472_v3 = vld [vmem:[%s8557_s7 + $0xb8] sm:$0xff] }
 0x42e   :  { %3628 = vmatpush.bf16.msrb.mxu0 %v7091_v35  ;;  %v3197_v19 = vadd.f32 %v3196_v44, %v3184_v18  ;;  %v3223_v35 = vadd.f32 %v3222_v53, %v3210_v21  ;;  %v8998_v53 = vld [vmem:[#allocation27_spill] sm:$0xff]  ;;  %v5449_v21 = vld [vmem:[%s8557_s7] sm:$0xff] }
 0x42f   :  { %v9003_v18 = vld [vmem:[#allocation59_spill] sm:$0xff] }
 0x430   :  { %3588 = vmatpush.bf16.msrb.mxu3 %v7055_v61  ;;  %3614 = vmatpush.bf16.msrb.mxu1 %v7070_v10  ;;  %v3258_v61 = vpop.f32.mrf.mxu2  ;;  %v8989_v10 = vmov 0  }
 0x431   :  { %3666 = vmatpush.bf16.msra.mxu2 %v8953_v2  ;;  %3608 = vmatmul.bf16.vlgmr.msra.gmra.mxu0 %v8989_v10  ;;  %v9004_v61 = vld [vmem:[#allocation60_spill] sm:$0xff] }
 0x432   :  { %3629 = vmatpush.bf16.msrb.mxu0 %v8917_v6  ;;  %v3239_v6 = vadd.f32 %v3197_v19, %v7861_v57  ;;  %v9006_v19 = vld [vmem:[#allocation26_spill] sm:$0xff] }
 0x433   :  { %5059 = vmatmul.msk.bf16.vlgmr.msra.gmra.mxu3 %vm2392_vm3, %v8970_v55  ;;  %v8995_v55 = vld [vmem:[#allocation50_spill] sm:$0xff] }
 0x434   :  { %3589 = vmatpush.bf16.msrb.mxu3 %v7095_v63  ;;  %3615 = vmatpush.bf16.msrb.mxu1 %v7109_v41  ;;  %v3284_v63 = vpop.f32.mrf.mxu0  ;;  %v3235_v41 = vpop.f32.mrf.mxu3 }
 0x435   :  { %3667 = vmatpush.bf16.msra.mxu2 %v7133_v24  ;;  %v3236_v2 = vadd.f32 %v3235_v41, %v3223_v35  ;;  %v3736_v35 = vunpack.c.l.b16 %v9006_v19  ;;  %v9007_v63 = vld [vmem:[#allocation61_spill] sm:$0xff] }
 0x436   :  { %3630 = vmatpush.bf16.msrb.mxu0 %v7165_v13  ;;  %3647 = vmatmul.bf16.vlgmr.msrb.gmra.mxu2 %v8989_v10  ;;  %v3241_v13 = vmax.f32 %v3239_v6, 0.0  ;;  %v9005_v10 = vld [vmem:[#allocation32_spill] sm:$0xff]  ;;  %v5464_v41 = vld [vmem:[%s8557_s7 + $0x78] sm:$0xff]  ;;  %v5470_v6 = vld [vmem:[%s8557_s7 + $0xa8] sm:$0xff] }
 0x438   :  { %3590 = vmatpush.bf16.msrb.mxu3 %v7131_v37  ;;  %3616 = vmatpush.bf16.msrb.mxu1 %v8918_v1  ;;  %v3240_v37 = vadd.f32 %v3236_v2, %v7868_v22  ;;  %v8228_v24 = vpop.f32.mrf.mxu2 }
 0x439   :  { %3668 = vmatpush.bf16.msra.mxu2 %v7171_v17  ;;  %v2210_v17 = vunpack.c.h.b16 %v8979_v30  ;;  %v8997_v30 = vld [vmem:[#allocation53_spill] sm:$0xff] }
 0x43a   :  { %3631 = vmatpush.bf16.msrb.mxu0 %v7207_v46  ;;  %v3242_v1 = vmax.f32 %v3240_v37, 0.0 }
 0x43c   :  { %3591 = vmatpush.bf16.msrb.mxu3 %v8919_v39  ;;  %3617 = vmatpush.bf16.msrb.mxu1 %v7187_v50  ;;  %v3243_v39 = vpack.c.bf16 %v3242_v1, %v3241_v13  ;;  %v3237_v50 = vpop.f32.mrf.mxu3  ;;  %v8236_v46 = vpop.f32.mrf.mxu0  ;;  %v3738_v1 = vpack.c.b16 %v3736_v35, %v3736_v35 }
 0x43d   :  { %3669 = vmatpush.bf16.msra.mxu2 %v8817_v38  ;;  %v2212_v38 = vpack.c.b16 %v2210_v17, %v2210_v17  ;;  %v5469_v17 = vld [vmem:[%s8557_s7 + $0xa0] sm:$0xff] }
 0x43e   :  { %3632 = vmatpush.bf16.msrb.mxu0 %v8819_v47  ;;  %v3763_v40 = vunpack.c.l.b16 %v3243_v39  ;;  %v3764_v48 = vunpack.c.h.b16 %v3243_v39  ;;  %v8243_v47 = vpop.f32.mrf.mxu1  ;;  %v5463_v39 = vld [vmem:[%s8557_s7 + $0x70] sm:$0xff] }
 0x440   :  { %3592 = vmatpush.bf16.msrb.mxu3 %v7214_v36  ;;  %3618 = vmatpush.bf16.msrb.mxu1 %v8818_v31  ;;  %v3765_v36 = vpack.c.b16 %v3763_v40, %v3763_v40  ;;  %v3323_v31 = vpop.f32.mrf.mxu2 }
 0x441   :  { %3670 = vmatpush.bf16.msra.mxu2 %v8855_v58 }
 0x442   :  { %3633 = vmatpush.bf16.msrb.mxu0 %v8856_v25  ;;  %3767 = vrot.lane.b32.xlu0 %v3765_v36, %s5530_s3  ;;  %v3309_v36 = vadd.f32 %v8236_v46, %v8243_v47  ;;  %v5460_v47 = vld [vmem:[%s8557_s7 + $0x58] sm:$0xff] }
 0x444   :  { %3593 = vmatpush.bf16.msrb.mxu3 %v7262_v28  ;;  %3619 = vmatpush.bf16.msrb.mxu1 %v8854_v16  ;;  %v3766_v28 = vpack.c.b16 %v3764_v48, %v3764_v48  ;;  %v5455_v16 = vld [vmem:[%s8557_s7 + $0x30] sm:$0xff] }
 0x445   :  { %5061 = vmatmul.msk.bf16.vlgmr.msrb.gmra.mxu0 %vm2081_vm2, %v2212_v38  ;;  %3671 = vmatpush.bf16.msra.mxu2 %v8823_v8 }
 0x446   :  { %3691 = vmatpush.bf16.msra.mxu0 %v7311_v9  ;;  %v5456_v9 = vld [vmem:[%s8557_s7 + $0x38] sm:$0xff]  ;;  %3769 = vrot.lane.b32.xlu1 %v3766_v28, %s5530_s3  ;;  %v3297_v58 = vpop.f32.mrf.mxu1  ;;  %v5461_v28 = vld [vmem:[%s8557_s7 + $0x60] sm:$0xff] }
 0x448   :  { %3594 = vmatpush.bf16.msrb.mxu3 %v8822_v32  ;;  %3620 = vmatpush.bf16.msrb.mxu1 %v8824_v33  ;;  %v3310_v32 = vpop.f32.mrf.mxu0  ;;  %v3269_v33 = vpop.f32.mrf.mxu3 }
 0x449   :  { %3672 = vmatpush.bf16.msra.mxu2 %v8891_v29  ;;  %v3270_v8 = vadd.f32 %v3269_v33, %v8198_v23  ;;  %v8270_v29 = vpop.f32.mrf.mxu2  ;;  %v9000_v23 = vld [vmem:[#allocation55_spill] sm:$0xff]  ;;  %v3322_v32 = vadd.f32 %v8228_v24, %v3309_v36  ;;  %v5480_v24 = vld [vmem:[%s8557_s7 + $0xf8] sm:$0xff] }
 0x44a   :  { %3692 = vmatpush.bf16.msra.mxu0 %v8922_v56  ;;  %v8991_v56 = vld [vmem:[#allocation46_spill] sm:$0xff] }
 0x44b   :  { %5060 = vmatmul.msk.bf16.vlgmr.msrb.gmra.mxu3 %vm2081_vm2, %v2212_v38  ;;  %3621 = vmatmul.bf16.vlgmr.msrb.gmra.mxu1 %v8188_v43  ;;  %v8266_v25 = vadd.f32 %v8207_v51, %v3270_v8  ;;  %v8996_v43 = vld [vmem:[#allocation52_spill] sm:$0xff] }
 0x44c   :  { %3652 = vmatpush.bf16.msra.mxu3 %v8921_v59  ;;  %3684 = vmatpush.bf16.msra.mxu1 %v8889_v5  ;;  %v8990_v5 = vld [vmem:[#allocation45_spill] sm:$0xff]  ;;  %v5454_v59 = vld [vmem:[%s8557_s7 + $0x28] sm:$0xff] }
 0x44d   :  { %4338 = vmatpush.bf16.msrb.mxu2 %v5456_v9  ;;  %v5467_v9 = vld [vmem:[%s8557_s7 + $0x90] sm:$0xff] }
 0x44e   :  { %3693 = vmatpush.bf16.msra.mxu0 %v8955_v52  ;;  %3673 = vmatmul.bf16.vlgmr.msra.gmra.mxu2 %v8135_v15  ;;  %v8993_v52 = vld [vmem:[#allocation48_spill] sm:$0xff]  ;;  %v8283_v44 = vpop.f32.mrf.mxu1 }
 0x450   :  { %3653 = vmatpush.bf16.msra.mxu3 %v8923_v7  ;;  %3685 = vmatpush.bf16.msra.mxu1 %v8924_v54  ;;  %v8992_v7 = vld [vmem:[#allocation47_spill] sm:$0xff]  ;;  %v3271_v54 = vpop.f32.mrf.mxu3 }
 0x451   :  { %4339 = vmatpush.bf16.msrb.mxu2 %v5455_v16  ;;  %v3349_v26 = vpop.f32.mrf.mxu2  ;;  %v5466_v16 = vld [vmem:[%s8557_s7 + $0x88] sm:$0xff]  ;;  %v3749_v54 = vpop.permute.xlu0 %3748 }
 0x452   :  { %3694 = vmatpush.bf16.msra.mxu0 %v8991_v56  ;;  %v3373_v51 = vpop.f32.mrf.mxu0  ;;  %v5459_v56 = vld [vmem:[%s8557_s7 + $0x50] sm:$0xff] }
 0x453   :  { %v3374_v8 = vadd.f32 %v3373_v51, %v3322_v32  ;;  %v5478_v51 = vld [vmem:[%s8557_s7 + $0xe8] sm:$0xff] }
 0x454   :  { %3704 = vmatpush.bf16.msrb.mxu1 %v8956_v42  ;;  %3654 = vmatpush.bf16.msra.mxu3 %v8990_v5  ;;  %v5453_v42 = vld [vmem:[%s8557_s7 + $0x20] sm:$0xff] }
 0x455   :  { %4340 = vmatpush.bf16.msrb.mxu2 %v5454_v59 }
 0x456   :  { %3695 = vmatpush.bf16.msra.mxu0 %v8994_v60  ;;  %v3362_v4 = vpop.f32.mrf.mxu1 }
 0x457   :  { %v5457_v4 = vld [vmem:[%s8557_s7 + $0x40] sm:$0xff] }
 0x458   :  { %3705 = vmatpush.bf16.msrb.mxu1 %v8992_v7  ;;  %3655 = vmatpush.bf16.msra.mxu3 %v8993_v52  ;;  %v5465_v7 = vld [vmem:[%s8557_s7 + $0x80] sm:$0xff] }
 0x459   :  { %4341 = vmatpush.bf16.msrb.mxu2 %v5453_v42 }
 0x45a   :  { %3696 = vmatpush.bf16.msra.mxu0 %v8996_v43  ;;  %v3375_v2 = vpop.f32.mrf.mxu0 }
 0x45b   :  { %5062 = vmatmul.msk.bf16.vlgmr.msra.gmra.mxu1 %vm2392_vm3, %v8998_v53 }
 0x45c   :  { %3706 = vmatpush.bf16.msrb.mxu1 %v8995_v55  ;;  %3656 = vmatpush.bf16.msra.mxu3 %v8966_v12  ;;  %v5451_v12 = vld [vmem:[%s8557_s7 + $0x10] sm:$0xff]  ;;  %v3747_v55 = vpop.permute.xlu2 %3746 }
 0x45d   :  { %4342 = vmatpush.bf16.msrb.mxu2 %v5452_v62  ;;  %v5458_v62 = vld [vmem:[%s8557_s7 + $0x48] sm:$0xff]  ;;  %v3750_v43 = vsel %vm2081_vm2, %v3747_v55, %v3749_v54 }
 0x45e   :  { %3697 = vmatpush.bf16.msra.mxu0 %v9000_v23  ;;  %v3334_v13 = vpop.f32.mrf.mxu3  ;;  %v3737_v23 = vunpack.c.h.b16 %v9006_v19  ;;  %v5477_v19 = vld [vmem:[%s8557_s7 + $0xe0] sm:$0xff] }
 0x45f   :  { %v3335_v40 = vadd.f32 %v3334_v13, %v8266_v25  ;;  %v5475_v13 = vld [vmem:[%s8557_s7 + $0xd0] sm:$0xff] }
 0x460   :  { %3707 = vmatpush.bf16.msrb.mxu1 %v8997_v30  ;;  %3657 = vmatpush.bf16.msra.mxu3 %v8999_v45  ;;  %v3386_v37 = vpop.f32.mrf.mxu1 }
 0x461   :  { %4343 = vmatpush.bf16.msrb.mxu2 %v5451_v12  ;;  %v8335_v50 = vpop.f32.mrf.mxu2  ;;  %v3348_v31 = vadd.f32 %v8270_v29, %v3335_v40  ;;  %v3387_v58 = vadd.f32 %v3386_v37, %v3374_v8  ;;  %v5479_v12 = vld [vmem:[%s8557_s7 + $0xf0] sm:$0xff]  ;;  %v5473_v40 = vld [vmem:[%s8557_s7 + $0xc0] sm:$0xff] }
 0x462   :  { %3698 = vmatpush.bf16.msra.mxu0 %v8941_v20  ;;  %v9008_v20 = vld [vmem:[#allocation62_spill] sm:$0xff] }
 0x463   :  { %v3361_v46 = vadd.f32 %v8283_v44, %v3348_v31  ;;  %v5485_v8 = vld [vmem:[%s8557_s7 + $0x120] sm:$0xff] }
 0x464   :  { %3708 = vmatpush.bf16.msrb.mxu1 %v9001_v14  ;;  %3658 = vmatpush.bf16.msra.mxu3 %v9002_v11  ;;  %v8346_v38 = vpop.f32.mrf.mxu0 }
 0x465   :  { %3699 = vmatmul.bf16.vlgmr.msra.gmra.mxu0 %v9005_v10  ;;  %4344 = vmatpush.bf16.msrb.mxu2 %v5450_v27  ;;  %v3403_v29 = vadd.f32 %v3361_v46, %v7861_v57 }
 0x466   :  { %4364 = vmatpush.bf16.msrb.mxu0 %v5472_v3 }
 0x467   :  { %v3405_v44 = vmax.f32 %v3403_v29, 0.0  ;;  %v3759_v29 = vpop.permute.xlu2 %3758 }
 0x468   :  { %3709 = vmatpush.bf16.msrb.mxu1 %v9003_v18  ;;  %3659 = vmatpush.bf16.msra.mxu3 %v9004_v61  ;;  %v3388_v48 = vpop.f32.mrf.mxu1 }
 0x469   :  { %4345 = vmatpush.bf16.msrb.mxu2 %v5449_v21  ;;  %v3422_v33 = vpop.f32.mrf.mxu2  ;;  %v5488_v48 = vld [vmem:[%s8557_s7 + $0x138] sm:$0xff] }
 0x46a   :  { %4365 = vmatpush.bf16.msrb.mxu0 %v5471_v49 }
 0x46b   :  { %3660 = vmatmul.bf16.vlgmr.msra.gmra.mxu3 %v9005_v10  ;;  %v3739_v10 = vpack.c.b16 %v3737_v23, %v3737_v23  ;;  %v5481_v23 = vld [vmem:[%s8557_s7 + $0x100] sm:$0xff] }
 0x46c   :  { %3710 = vmatpush.bf16.msrb.mxu1 %v9007_v63  ;;  %3723 = vmatpush.bf16.msrb.mxu3 %v9008_v20  ;;  %v3448_v25 = vpop.f32.mrf.mxu0  ;;  %v8376_v42 = vpop.permute.xlu1 %3756 }
 0x46d   :  { %4346 = vmatmul.bf16.vlgmr.msrb.gmra.mxu2 %v3738_v1  ;;  %v3808_v21 = vsel %vm2081_vm2, %v3739_v10, %v3747_v55  ;;  %v5484_v25 = vld [vmem:[%s8557_s7 + $0x118] sm:$0xff]  ;;  %v5483_v55 = vld [vmem:[%s8557_s7 + $0x110] sm:$0xff] }
 0x46e   :  { %4366 = vmatpush.bf16.msrb.mxu0 %v5470_v6  ;;  %v5476_v6 = vld [vmem:[%s8557_s7 + $0xd8] sm:$0xff]  ;;  %4390 = vmatpush.bf16.msra.mxu2 %v5488_v48 }
 0x470   :  { %3711 = vmatpush.bf16.msrb.mxu1 %v8915_v34  ;;  %3724 = vmatpush.bf16.msrb.mxu3 %v8983_v0  ;;  %v5462_v34 = vld [vmem:[%s8557_s7 + $0x68] sm:$0xff]  ;;  %v5468_v0 = vld [vmem:[%s8557_s7 + $0x98] sm:$0xff] }
 0x471   :  { %v8378_v60 = vpop.f32.mrf.mxu2 }
 0x472   :  { %4367 = vmatpush.bf16.msrb.mxu0 %v5469_v17 }
 0x473   :  { %3712 = vmatmul.bf16.vlgmr.msrb.gmra.mxu1 %v8135_v15  ;;  %v3336_v15 = vpop.f32.mrf.mxu3 }
 0x474   :  { %4351 = vmatpush.bf16.msra.mxu3 %v5464_v41  ;;  %4377 = vmatpush.bf16.msra.mxu1 %v5480_v24  ;;  %v5487_v15 = vld [vmem:[%s8557_s7 + $0x130] sm:$0xff] }
 0x475   :  { %4391 = vmatpush.bf16.msra.mxu2 %v5487_v15 }
 0x476   :  { %4368 = vmatpush.bf16.msrb.mxu0 %v5468_v0 }
 0x478   :  { %4352 = vmatpush.bf16.msra.mxu3 %v5463_v39  ;;  %4378 = vmatpush.bf16.msra.mxu1 %v5479_v12  ;;  %v5474_v39 = vld [vmem:[%s8557_s7 + $0xc8] sm:$0xff] }
 0x479   :  { %v3487_v61 = vpop.f32.mrf.mxu2 }
 0x47a   :  { %4369 = vmatpush.bf16.msrb.mxu0 %v5467_v9  ;;  %v3472_v14 = vpop.f32.mrf.mxu0 }
 0x47b   :  { %5063 = vmatmul.msk.bf16.vlgmr.msrb.gmra.mxu3 %vm2392_vm3, %v8998_v53  ;;  %v3399_v5 = vpop.f32.mrf.mxu3  ;;  %v3812_v53 = vsel %vm2392_vm3, %v3750_v43, %v8376_v42 }
 0x47c   :  { %4353 = vmatpush.bf16.msra.mxu3 %v5462_v34  ;;  %v3400_v59 = vadd.f32 %v3399_v5, %v3387_v58  ;;  %4379 = vmatpush.bf16.msra.mxu1 %v5478_v51 }
 0x47e   :  { %4370 = vmatpush.bf16.msrb.mxu0 %v5466_v16  ;;  %v3404_v52 = vadd.f32 %v3400_v59, %v7868_v22  ;;  %v3761_v59 = vsel %vm2392_vm3, %v8376_v42, %v3759_v29 }
 0x480   :  { %4354 = vmatpush.bf16.msra.mxu3 %v5461_v28  ;;  %v3406_v26 = vmax.f32 %v3404_v52, 0.0  ;;  %v3459_v49 = vpop.f32.mrf.mxu1  ;;  %4380 = vmatpush.bf16.msra.mxu1 %v5477_v19  ;;  %v5486_v28 = vld [vmem:[%s8557_s7 + $0x128] sm:$0xff] }
 0x481   :  { %4392 = vmatpush.bf16.msra.mxu2 %v5486_v28  ;;  %v3473_v46 = vadd.f32 %v3472_v14, %v3459_v49 }
 0x482   :  { %4371 = vmatpush.bf16.msrb.mxu0 %v5465_v7  ;;  %v3407_v30 = vpack.c.bf16 %v3406_v26, %v3405_v44  ;;  %v3474_v35 = vpop.f32.mrf.mxu0 }
 0x483   :  { %v3401_v45 = vpop.f32.mrf.mxu3  ;;  %v3486_v24 = vadd.f32 %v8378_v60, %v3473_v46 }
 0x484   :  { %4355 = vmatpush.bf16.msra.mxu3 %v5460_v47  ;;  %v3775_v3 = vunpack.c.h.b16 %v3407_v30  ;;  %v3774_v11 = vunpack.c.l.b16 %v3407_v30  ;;  %4381 = vmatpush.bf16.msra.mxu1 %v5476_v6 }
 0x485   :  { %4372 = vmatmul.bf16.vlgmr.msrb.gmra.mxu0 %v3812_v53  ;;  %4393 = vmatpush.bf16.msra.mxu2 %v5485_v8  ;;  %v5495_v8 = vld [vmem:[%s8557_s7 + $0x170] sm:$0xff] }
 0x486   :  { %v3777_v27 = vpack.c.b16 %v3775_v3, %v3775_v3  ;;  %v3776_v18 = vpack.c.b16 %v3774_v11, %v3774_v11 }
 0x488   :  { %4356 = vmatpush.bf16.msra.mxu3 %v5459_v56  ;;  %3780 = vrot.lane.b32.xlu0 %v3777_v27, %s5531_s26  ;;  %v3461_v41 = vpop.f32.mrf.mxu1 }
 0x489   :  { %3778 = vrot.lane.b32.xlu2 %v3776_v18, %s5531_s26  ;;  %v3511_v37 = vpop.f32.mrf.mxu2  ;;  %4382 = vmatpush.bf16.msra.mxu1 %v5475_v13 }
 0x48a   :  { %4394 = vmatpush.bf16.msra.mxu2 %v5484_v25 }
 0x48b   :  { %v3433_v63 = vpop.f32.mrf.mxu3 }
 0x48c   :  { %4357 = vmatpush.bf16.msra.mxu3 %v5458_v62  ;;  %v3434_v20 = vadd.f32 %v3433_v63, %v8335_v50  ;;  %v5482_v62 = vld [vmem:[%s8557_s7 + $0x108] sm:$0xff] }
 0x48d   :  { %4383 = vmatpush.bf16.msra.mxu1 %v5474_v39 }
 0x48e   :  { %v3447_v2 = vadd.f32 %v8346_v38, %v3434_v20  ;;  %4395 = vmatpush.bf16.msra.mxu2 %v5483_v55  ;;  %v5494_v55 = vld [vmem:[%s8557_s7 + $0x168] sm:$0xff] }
 0x490   :  { %4358 = vmatpush.bf16.msra.mxu3 %v5457_v4  ;;  %v3524_v17 = vpop.f32.mrf.mxu1 }
 0x491   :  { %v3513_v50 = vpop.f32.mrf.mxu2  ;;  %4384 = vmatpush.bf16.msra.mxu1 %v5473_v40 }
 0x492   :  { %4396 = vmatpush.bf16.msra.mxu2 %v5482_v62  ;;  %v5493_v62 = vld [vmem:[%s8557_s7 + $0x160] sm:$0xff] }
 0x493   :  { %4359 = vmatmul.bf16.vlgmr.msra.gmra.mxu3 %v3808_v21  ;;  %v3435_v1 = vpop.f32.mrf.mxu3 }
 0x496   :  { %4397 = vmatpush.bf16.msra.mxu2 %v5481_v23 }
 0x498   :  { %v3526_v34 = vpop.f32.mrf.mxu1 }
 0x49a   :  { %v3537_v0 = vpop.f32.mrf.mxu0 }
 0x49b   :  { %v3538_v56 = vadd.f32 %v3537_v0, %v3486_v24 }
 0x4a2   :  { %v3539_v36 = vpop.f32.mrf.mxu0 }
 0x4a6   :  { %v3498_v31 = vpop.f32.mrf.mxu3 }
 0x4a7   :  { %v3499_v32 = vadd.f32 %v3498_v31, %v3447_v2 }
 0x4a8   :  { %v3550_v38 = vpop.f32.mrf.mxu1 }
 0x4a9   :  { %v3583_v9 = vpop.f32.mrf.mxu2  ;;  %v3512_v58 = vadd.f32 %v3511_v37, %v3499_v32  ;;  %v3551_v44 = vadd.f32 %v3550_v38, %v3538_v56 }
 0x4ab   :  { %v3525_v7 = vadd.f32 %v3524_v17, %v3512_v58 }
 0x4ad   :  { %v3567_v42 = vadd.f32 %v3525_v7, %v7861_v57 }
 0x4ae   :  { %v3500_v47 = vpop.f32.mrf.mxu3  ;;  %v3609_v16 = vpop.f32.mrf.mxu0 }
 0x4af   :  { %v3569_v45 = vmax.f32 %v3567_v42, 0.0 }
 0x4b0   :  { %v3552_v33 = vpop.f32.mrf.mxu1 }
 0x4b1   :  { %v3585_v5 = vpop.f32.mrf.mxu2 }
 0x4b4   :  { %v3768_v54 = vpop.permute.xlu0 %3767 }
 0x4b5   :  { %v3817_v52 = vsel %vm3771_vm5, %v3761_v59, %v3768_v54 }
 0x4b6   :  { %v3611_v26 = vpop.f32.mrf.mxu0  ;;  %4385 = vmatmul.bf16.vlgmr.msra.gmra.mxu1 %v3817_v52  ;;  %v3563_v60 = vpop.f32.mrf.mxu3 }
 0x4b7   :  { %v3564_v43 = vadd.f32 %v3563_v60, %v3551_v44 }
 0x4b8   :  { %v3770_v37 = vpop.permute.xlu1 %3769 }
 0x4b9   :  { %v3568_v30 = vadd.f32 %v3564_v43, %v7868_v22  ;;  %v3648_v53 = vpop.f32.mrf.mxu2  ;;  %v3772_v1 = vsel %vm3771_vm5, %v3768_v54, %v3770_v37  ;;  %v5500_v37 = vld [vmem:[%s8557_s7 + $0x198] sm:$0xff] }
 0x4bb   :  { %v3570_v12 = vmax.f32 %v3568_v30, 0.0  ;;  %v5492_v30 = vld [vmem:[%s8557_s7 + $0x158] sm:$0xff] }
 0x4bd   :  { %v3571_v14 = vpack.c.bf16 %v3570_v12, %v3569_v45  ;;  %v5491_v12 = vld [vmem:[%s8557_s7 + $0x150] sm:$0xff] }
 0x4be   :  { %v3565_v4 = vpop.f32.mrf.mxu3 }
 0x4bf   :  { %v3786_v11 = vunpack.c.h.b16 %v3571_v14  ;;  %v3785_v51 = vunpack.c.l.b16 %v3571_v14  ;;  %v5490_v4 = vld [vmem:[%s8557_s7 + $0x148] sm:$0xff] }
 0x4c1   :  { %v3788_v27 = vpack.c.b16 %v3786_v11, %v3786_v11  ;;  %v3787_v18 = vpack.c.b16 %v3785_v51, %v3785_v51  ;;  %v3650_v49 = vpop.f32.mrf.mxu2  ;;  %v5489_v11 = vld [vmem:[%s8557_s7 + $0x140] sm:$0xff]  ;;  %v5504_v51 = vld [vmem:[%s8557_s7 + $0x1b8] sm:$0xff] }
 0x4c2   :  { %v3635_v3 = vpop.f32.mrf.mxu0  ;;  %4416 = vmatpush.bf16.msra.mxu0 %v5504_v51 }
 0x4c3   :  { %3791 = vrot.lane.b32.xlu2 %v3788_v27, %s5532_s27  ;;  %3789 = vrot.lane.b32.xlu1 %v3787_v18, %s5532_s27  ;;  %v3956_v27 = vld [vmem:[%s8557_s7 + $0x1e8] sm:$0x3]  ;;  %v5503_v18 = vld [vmem:[%s8557_s7 + $0x1b0] sm:$0xff] }
 0x4c4   :  { %v4206_v49 = vunpack.c.l.b16 %v3956_v27 }
 0x4c6   :  { %4417 = vmatpush.bf16.msra.mxu0 %v5503_v18 }
 0x4c8   :  { %v3622_v61 = vpop.f32.mrf.mxu1 }
 0x4c9   :  { %v3636_v38 = vadd.f32 %v3635_v3, %v3622_v61  ;;  %v4268_v61 = vpack.c.b16 %v4206_v49, %v4206_v49 }
 0x4ca   :  { %v3637_v10 = vpop.f32.mrf.mxu0 }
 0x4cb   :  { %v3649_v32 = vadd.f32 %v3648_v53, %v3636_v38  ;;  %v5502_v10 = vld [vmem:[%s8557_s7 + $0x1a8] sm:$0xff] }
 0x4cc   :  { %4418 = vmatpush.bf16.msra.mxu0 %v5502_v10 }
 0x4ce   :  { %v3596_v21 = vpop.f32.mrf.mxu3 }
 0x4cf   :  { %v3597_v19 = vadd.f32 %v3596_v21, %v3583_v9  ;;  %v5496_v9 = vld [vmem:[%s8557_s7 + $0x178] sm:$0xff]  ;;  %v4336_v21 = vsel %vm4334_vm7, %v4268_v61, 0 }
 0x4d0   :  { %v3624_v35 = vpop.f32.mrf.mxu1  ;;  %4403 = vmatpush.bf16.msrb.mxu3 %v5496_v9  ;;  %4431 = vmatpush.bf16.msrb.mxu1 %v4336_v21 }
 0x4d1   :  { %v3610_v63 = vadd.f32 %v3609_v16, %v3597_v19  ;;  %v3674_v20 = vpop.f32.mrf.mxu2 }
 0x4d4   :  { %4404 = vmatpush.bf16.msrb.mxu3 %v5495_v8  ;;  %v5516_v8 = vld [vmem:[%s8560_s9 + $0x30] sm:$0xff] }
 0x4d6   :  { %v3598_v41 = vpop.f32.mrf.mxu3 }
 0x4d8   :  { %v3687_v6 = vpop.f32.mrf.mxu1  ;;  %4405 = vmatpush.bf16.msrb.mxu3 %v5494_v55 }
 0x4d9   :  { %v3676_v2 = vpop.f32.mrf.mxu2 }
 0x4da   :  { %v5509_v2 = vld [vmem:[%s8557_s7 + $0x1e0] sm:$0xff] }
 0x4db   :  { %4432 = vmatpush.bf16.msrb.mxu1 %v5509_v2 }
 0x4dc   :  { %4406 = vmatpush.bf16.msrb.mxu3 %v5493_v62  ;;  %v5526_v62 = vld [vmem:[%s8559_s10] ss:$0 sm:$0xff] }
 0x4e0   :  { %v3689_v13 = vpop.f32.mrf.mxu1  ;;  %4407 = vmatpush.bf16.msrb.mxu3 %v5492_v30 }
 0x4e1   :  { %v5508_v13 = vld [vmem:[%s8557_s7 + $0x1d8] sm:$0xff] }
 0x4e2   :  { %v3700_v39 = vpop.f32.mrf.mxu0  ;;  %4433 = vmatpush.bf16.msrb.mxu1 %v5508_v13 }
 0x4e3   :  { %v3779_v17 = vpop.permute.xlu2 %3778  ;;  %v3701_v46 = vadd.f32 %v3700_v39, %v3649_v32  ;;  %v5507_v39 = vld [vmem:[%s8557_s7 + $0x1d0] sm:$0xff] }
 0x4e4   :  { %v3822_v50 = vsel %vm3782_vm6, %v3772_v1, %v3779_v17  ;;  %4408 = vmatpush.bf16.msrb.mxu3 %v5491_v12  ;;  %v5499_v1 = vld [vmem:[%s8557_s7 + $0x190] sm:$0xff] }
 0x4e5   :  { %4398 = vmatmul.bf16.vlgmr.msra.gmra.mxu2 %v3822_v50  ;;  %v5506_v50 = vld [vmem:[%s8557_s7 + $0x1c8] sm:$0xff] }
 0x4e6   :  { %4434 = vmatpush.bf16.msrb.mxu1 %v5507_v39 }
 0x4e8   :  { %4409 = vmatpush.bf16.msrb.mxu3 %v5490_v4 }
 0x4ea   :  { %v3702_v40 = vpop.f32.mrf.mxu0  ;;  %4435 = vmatpush.bf16.msrb.mxu1 %v5506_v50 }
 0x4eb   :  { %v5497_v40 = vld [vmem:[%s8557_s7 + $0x180] sm:$0xff] }
 0x4ec   :  { %4410 = vmatpush.bf16.msrb.mxu3 %v5489_v11 }
 0x4ee   :  { %v3661_v0 = vpop.f32.mrf.mxu3 }
 0x4ef   :  { %v3662_v36 = vadd.f32 %v3661_v0, %v3610_v63 }
 0x4f0   :  { %v3713_v34 = vpop.f32.mrf.mxu1  ;;  %v4347_v48 = vpop.f32.mrf.mxu2 }
 0x4f1   :  { %v3675_v28 = vadd.f32 %v3674_v20, %v3662_v36  ;;  %v3714_v58 = vadd.f32 %v3713_v34, %v3701_v46  ;;  %v5505_v34 = vld [vmem:[%s8557_s7 + $0x1c0] sm:$0xff]  ;;  %v5515_v46 = vld [vmem:[%s8560_s9 + $0x28] sm:$0xff] }
 0x4f2   :  { %4436 = vmatpush.bf16.msrb.mxu1 %v5505_v34 }
 0x4f3   :  { %v3688_v47 = vadd.f32 %v3687_v6, %v3675_v28  ;;  %v5501_v6 = vld [vmem:[%s8557_s7 + $0x1a0] sm:$0xff] }
 0x4f4   :  { %4419 = vmatpush.bf16.msra.mxu0 %v5501_v6 }
 0x4f5   :  { %v3730_v5 = vadd.f32 %v3688_v47, %v7861_v57  ;;  %v5514_v47 = vld [vmem:[%s8560_s9 + $0x20] sm:$0xff] }
 0x4f6   :  { %v3663_v31 = vpop.f32.mrf.mxu3 }
 0x4f7   :  { %v3732_v7 = vmax.f32 %v3730_v5, 0.0  ;;  %v5511_v5 = vld [vmem:[%s8560_s9 + $0x8] sm:$0xff] }
 0x4f8   :  { %v3715_v15 = vpop.f32.mrf.mxu1  ;;  %v4349_v33 = vpop.f32.mrf.mxu2  ;;  %4420 = vmatpush.bf16.msra.mxu0 %v5500_v37 }
 0x4f9   :  { %v5517_v33 = vld [vmem:[%s8560_s9 + $0x38] sm:$0xff] }
 0x4fa   :  { %v3781_v16 = vpop.permute.xlu0 %3780  ;;  %4512 = vmatpush.bf16.msrb.mxu2 %v5517_v33 }
 0x4fb   :  { %v3783_v25 = vsel %vm3782_vm6, %v3779_v17, %v3781_v16  ;;  %v5498_v17 = vld [vmem:[%s8557_s7 + $0x188] sm:$0xff]  ;;  %v5513_v16 = vld [vmem:[%s8560_s9 + $0x18] sm:$0xff] }
 0x4fc   :  { %4421 = vmatpush.bf16.msra.mxu0 %v5499_v1 }
 0x4fe   :  { %v3726_v24 = vpop.f32.mrf.mxu3  ;;  %4513 = vmatpush.bf16.msrb.mxu2 %v5516_v8 }
 0x4ff   :  { %v3727_v29 = vadd.f32 %v3726_v24, %v3714_v58  ;;  %v5512_v58 = vld [vmem:[%s8560_s9 + $0x10] sm:$0xff] }
 0x500   :  { %4422 = vmatpush.bf16.msra.mxu0 %v5498_v17 }
 0x501   :  { %v3731_v59 = vadd.f32 %v3727_v29, %v7868_v22  ;;  %v5525_v22 = vld [vmem:[%s8558_s8] ss:$0 sm:$0xff] }
 0x502   :  { %v4373_v56 = vpop.f32.mrf.mxu0  ;;  %v4348_v53 = vadd.f32 %v5525_v22, %v4347_v48  ;;  %4514 = vmatpush.bf16.msrb.mxu2 %v5515_v46  ;;  %v5510_v29 = vld [vmem:[%s8560_s9] sm:$0xff] }
 0x503   :  { %v3733_v54 = vmax.f32 %v3731_v59, 0.0 }
 0x504   :  { %4423 = vmatpush.bf16.msra.mxu0 %v5497_v40 }
 0x505   :  { %v3734_v52 = vpack.c.bf16 %v3733_v54, %v3732_v7 }
 0x506   :  { %v3728_v44 = vpop.f32.mrf.mxu3  ;;  %4515 = vmatpush.bf16.msrb.mxu2 %v5514_v47 }
 0x507   :  { %v3796_v26 = vunpack.c.l.b16 %v3734_v52  ;;  %v3797_v60 = vunpack.c.h.b16 %v3734_v52 }
 0x509   :  { %v3798_v57 = vpack.c.b16 %v3796_v26, %v3796_v26  ;;  %v3799_v42 = vpack.c.b16 %v3797_v60, %v3797_v60 }
 0x50a   :  { %v4375_v43 = vpop.f32.mrf.mxu0  ;;  %4516 = vmatpush.bf16.msrb.mxu2 %v5513_v16 }
 0x50b   :  { %3800 = vrot.lane.b32.xlu0 %v3798_v57, %s5533_s16  ;;  %3802 = vrot.lane.b32.xlu1 %v3799_v42, %s5533_s16 }
 0x50e   :  { %4517 = vmatpush.bf16.msrb.mxu2 %v5512_v58 }
 0x512   :  { %4518 = vmatpush.bf16.msrb.mxu2 %v5511_v5 }
 0x516   :  { %v4360_v45 = vpop.f32.mrf.mxu3  ;;  %4519 = vmatpush.bf16.msrb.mxu2 %v5510_v29 }
 0x517   :  { %v4361_v23 = vadd.f32 %v4360_v45, %v4348_v53 }
 0x519   :  { %v4374_v14 = vadd.f32 %v4373_v56, %v4361_v23 }
 0x51d   :  { %v3792_v38 = vpop.permute.xlu2 %3791 }
 0x51e   :  { %v4362_v3 = vpop.f32.mrf.mxu3 }
 0x533   :  { %v4386_v19 = vpop.f32.mrf.mxu1 }
 0x534   :  { %v4387_v35 = vadd.f32 %v4386_v19, %v4374_v14 }
 0x535   :  { %v3790_v63 = vpop.permute.xlu1 %3789 }
 0x536   :  { %v3827_v20 = vsel %vm3793_vm8, %v3783_v25, %v3790_v63  ;;  %v3794_v15 = vsel %vm3793_vm8, %v3790_v63, %v3792_v38 }
 0x537   :  { %4411 = vmatmul.bf16.vlgmr.msrb.gmra.mxu3 %v3827_v20 }
 0x53b   :  { %v4388_v41 = vpop.f32.mrf.mxu1 }
 0x568   :  { %v4399_v0 = vpop.f32.mrf.mxu2 }
 0x569   :  { %v4400_v48 = vadd.f32 %v4399_v0, %v4387_v35 }
 0x570   :  { %v4401_v36 = vpop.f32.mrf.mxu2 }
 0x57d   :  { %v3801_v31 = vpop.permute.xlu0 %3800  ;;  %v3803_v28 = vpop.permute.xlu1 %3802 }
 0x57e   :  { %v3832_v9 = vsel %vm3804_vm9, %v3794_v15, %v3801_v31  ;;  %v3805_v32 = vsel %vm3804_vm9, %v3801_v31, %v3803_v28 }
 0x57f   :  { %4424 = vmatmul.bf16.vlgmr.msra.gmra.mxu0 %v3832_v9  ;;  %5308 = vmatmul.msk.bf16.vlgmr.msrb.gmra.mxu1 %vm4330_vm10, %v3805_v32 }
 0x5ba   :  { %v4412_v25 = vpop.f32.mrf.mxu3 }
 0x5bb   :  { %v4413_v59 = vadd.f32 %v4412_v25, %v4400_v48 }
 0x5c2   :  { %v4414_v24 = vpop.f32.mrf.mxu3 }
 0x5fc   :  { %v4425_v56 = vpop.f32.mrf.mxu0  ;;  %v4438_v7 = vpop.f32.mrf.mxu1 }
 0x5fd   :  { %v4426_v54 = vadd.f32 %v4425_v56, %v4413_v59 }
 0x5ff   :  { %v4439_v52 = vadd.f32 %v4438_v7, %v4426_v54 }
 0x601   :  { %v4442_v55 = vmax.f32 %v4439_v52, 0.0 }
 0x603   :  { %v4443_v44 = vpack.c.bf16 %v4442_v55, %v4442_v55 }
 0x604   :  { %v4427_v26 = vpop.f32.mrf.mxu0  ;;  %v4440_v60 = vpop.f32.mrf.mxu1 }
 0x605   :  { %4520 = vmatmul.bf16.vlgmr.msrb.gmra.mxu2 %v4443_v44 }
 0x688   :  { %v4521_v57 = vpop.f32.mrf.mxu2 }
 0x689   :  { %v4522_v42 = vadd.f32 %v5526_v62, %v4521_v57 }
 0x68b   :  { %4525 = vst [vmem:[%s8561_s11] sm:$0xff] %v4522_v42 }
 0x690   :  { %v4523_v43 = vpop.f32.mrf.mxu2 }

</bundles_post_ra>
